<compile_context>
chip_gen: v6e
topology: v6e:2x2x1
jax: 0.10.0
libtpu: 0.0.40
codegen_flags: <defaults>
</compile_context>

<pallas_src>
import numpy as np
import jax
import jax.numpy as jnp
from jax import lax
from jax.experimental import pallas as pl
from jax.experimental.pallas import tpu as pltpu

CLIP_EMBED_DIM = 512            # ViT-B/32 embedding dim
CLIP_IMAGE_SIZE = 224           # CLIP input resolution
PATCH = 32                      # ViT-B/32 patch size
GRID = CLIP_IMAGE_SIZE // PATCH # 7x7 patch grid

_IN_BLOCK_BUDGET = 8 << 20      # f32 input-block byte budget per grid step (v7x-safe)


# ---------------------------------------------------------------------------
# Host-side (numpy) linear operators: resize + patch-grid mean pool folded
# into one (32,H) / (W,32) matrix pair, so kernel 1 does L @ clamp(x) @ R.
# ---------------------------------------------------------------------------
def _resize_matrix(in_size, out_size):
    """F.interpolate(mode='bilinear', align_corners=False) as a matrix.

    Exactly the identity when in_size == out_size (224 inputs skip the resize).
    """
    out_idx = np.arange(out_size, dtype=np.float64)
    src = (out_idx + 0.5) * (in_size / out_size) - 0.5
    src = np.clip(src, 0.0, in_size - 1)
    i0 = np.floor(src).astype(np.int64)
    i1 = np.minimum(i0 + 1, in_size - 1)
    w1 = (src - i0).astype(np.float32)
    w0 = (1.0 - w1).astype(np.float32)
    m = np.zeros((out_size, in_size), dtype=np.float32)
    m[np.arange(out_size), i0] += w0
    m[np.arange(out_size), i1] += w1
    return m


def _pool_matrix():
    """(32, 224) mean-pool over the 7x7 patch grid: A[p, h] = 1/7 iff h%32==p."""
    a = np.zeros((PATCH, CLIP_IMAGE_SIZE), dtype=np.float32)
    h = np.arange(CLIP_IMAGE_SIZE)
    a[h % PATCH, h] = 1.0 / GRID
    return a


def _fold_matrices(h_in, w_in):
    """Fold resize + patch-grid mean pool into L=(32,H), R=(W,32) (f32)."""
    rh = _resize_matrix(h_in, CLIP_IMAGE_SIZE)           # (224, H)
    rw = _resize_matrix(w_in, CLIP_IMAGE_SIZE)           # (224, W)
    a = _pool_matrix()                                   # (32, 224)
    l_mat = a @ rh                                       # (32, H)
    r_mat = rw.T @ a.T                                   # (W, 32)
    return jnp.asarray(l_mat, jnp.float32), jnp.asarray(r_mat, jnp.float32)


# ---------------------------------------------------------------------------
# Tiling heuristics (byte-budget and layout aware).
# ---------------------------------------------------------------------------
def _choose_w_tile(w):
    """W (contraction) tile: multiple of 128 and <=512 when possible, else full W."""
    if w <= 512:
        return w
    for tw in (512, 384, 256, 128):
        if w % tw == 0:
            return tw
    return w


def _choose_plane_group(n, h, tw):
    """Planes per grid step.

    Legal pg: divides n and keeps the (32, pg*32) output block lane-legal
    (pg % 4 == 0 so pg*32 % 128 == 0, or pg == n -> full dim).  Prefer the
    largest pg under the input byte budget that leaves >=2 grid steps
    (megacore on v5e/v6e, both TensorCores on v7x), then the largest
    in-budget pg, then the smallest legal pg.
    """
    legal = [pg for pg in range(1, n + 1)
             if n % pg == 0 and (pg % 4 == 0 or pg == n)]
    in_budget = [pg for pg in legal if pg * h * tw * 4 <= _IN_BLOCK_BUDGET]
    multi_step = [pg for pg in in_budget if n // pg >= 2]
    if multi_step:
        return max(multi_step)
    if in_budget:
        return max(in_budget)
    return min(legal)


def _kernel1_vmem_limit(pg, h, tw):
    """Explicit VMEM cap: double-buffered input + bf16 copy + scratch + misc."""
    in_block = pg * h * tw * 4
    bf16_copy = pg * h * tw * 2
    t_acc = pg * h * PATCH * 4
    t2 = h * pg * PATCH * 2
    out_blk = PATCH * pg * PATCH * 2
    lr = (PATCH * h + tw * PATCH) * 2
    need = 2 * in_block + bf16_copy + t_acc + 2 * t2 + 2 * out_blk + 2 * lr
    need = int(need * 1.25) + (4 << 20)
    return max(32 << 20, min(need, 128 << 20))


# ---------------------------------------------------------------------------
# Kernel 1: clamp + (folded) bilinear resize + 7x7 patch-grid mean pool.
#   grid = (plane groups [parallel], W tiles [arbitrary, innermost])
#   x block (pg, H, tW) -> accumulate t = clamp(x) @ R in a VMEM scratch;
#   on the last W step, re-stack t along lanes and do ONE wide L matmul,
#   storing a lane-dense (32, pg*32) bf16 block.
# ---------------------------------------------------------------------------
def _clamp_resize_pool_kernel(x_ref, l_ref, r_ref, o_ref, t_acc):
    j = pl.program_id(1)
    pg, h, tw = x_ref.shape

    @pl.when(j == 0)
    def _():
        t_acc[...] = jnp.zeros_like(t_acc)

    x = x_ref[...].reshape(pg * h, tw)                      # major-dim merge
    x = jnp.clip(x, -1.0, 1.0).astype(jnp.bfloat16)
    t_acc[...] += jnp.dot(x, r_ref[...],
                          preferred_element_type=jnp.float32)   # (pg*H, 32)

    @pl.when(j == pl.num_programs(1) - 1)
    def _():
        t = t_acc[...].astype(jnp.bfloat16)                 # (pg*H, 32)
        # Stack the pg planes along lanes: (H, pg*32).  Lane concat of small
        # tiles is cheap; it replaces pg tiny matmuls with one wide one.
        t2 = jnp.concatenate([t[p * h:(p + 1) * h, :] for p in range(pg)],
                             axis=1)
        out = jnp.dot(l_ref[...], t2,
                      preferred_element_type=jnp.float32)   # (32, pg*32)
        o_ref[...] = out.astype(o_ref.dtype)


def clamp_resize_pool(images):
    """[B,C,H,W] f32 -> pooled patch vector [B, C*32*32] bf16.

    Equals: clamp(-1,1) -> bilinear resize to 224 -> mean over the 49 ViT
    patches, flattened in (c, y, x) order.
    """
    B, C, H, W = images.shape
    n = B * C
    tw = _choose_w_tile(W)
    pg = _choose_plane_group(n, H, tw)
    l_mat, r_mat = _fold_matrices(H, W)
    x = images.reshape(n, H, W).astype(jnp.float32)

    out = pl.pallas_call(
        _clamp_resize_pool_kernel,
        out_shape=jax.ShapeDtypeStruct((PATCH, n * PATCH), jnp.bfloat16),
        grid=(n // pg, W // tw),
        in_specs=[
            pl.BlockSpec((pg, H, tw), lambda i, j: (i, 0, j)),
            pl.BlockSpec((PATCH, H), lambda i, j: (0, 0)),
            pl.BlockSpec((tw, PATCH), lambda i, j: (j, 0)),
        ],
        out_specs=pl.BlockSpec((PATCH, pg * PATCH), lambda i, j: (0, i)),
        scratch_shapes=[pltpu.VMEM((pg * H, PATCH), jnp.float32)],
        compiler_params=pltpu.CompilerParams(
            dimension_semantics=("parallel", "arbitrary"),
            vmem_limit_bytes=_kernel1_vmem_limit(pg, H, tw)),
    )(x, l_mat.astype(jnp.bfloat16), r_mat.astype(jnp.bfloat16))

    # out[y, (b*C+c)*32 + x] = pooled_plane[b,c][y,x]; tiny bf16 relayout to
    # (B, 3072) in (c, y, x) row order for the encoder (negligible vs kernel 1).
    pooled = out.reshape(PATCH, n, PATCH).transpose(1, 0, 2)
    return pooled.reshape(B, C * PATCH * PATCH)


# ---------------------------------------------------------------------------
# Kernel 2: synthetic encoder (batched patch-embed + projection, bf16 on MXU)
#           with the loss fused into the epilogue:
#           L2-normalize, cosine similarity, nan_to_num, 1 - mean.
# Single grid step (B is small); f32 epilogue math.
# TODO(synk): for large B (>~256) add a batch-tiled reduction grid axis.
# ---------------------------------------------------------------------------
def _encode_loss_kernel(p_ref, w1_ref, w2_ref, t_ref, o_ref):
    pooled = p_ref[...]                                                 # (B, 3072) bf16
    h = jnp.dot(pooled, w1_ref[...], preferred_element_type=jnp.float32)  # (B, 512)
    feat = jnp.dot(h.astype(jnp.bfloat16), w2_ref[...],
                   preferred_element_type=jnp.float32)                  # (B, 512)
    txt = t_ref[...]                                                    # (B, 512) f32
    d = jnp.sum(feat * txt, axis=-1, keepdims=True)
    n_img = jnp.sum(feat * feat, axis=-1, keepdims=True)
    n_txt = jnp.sum(txt * txt, axis=-1, keepdims=True)
    sim = d * lax.rsqrt(n_img * n_txt)                                  # cosine sim
    big = jnp.finfo(jnp.float32).max
    sim = jnp.where(jnp.isnan(sim), 0.0, sim)                           # nan -> 0
    sim = jnp.clip(sim, -big, big)                                      # +/-inf -> +/-max
    o_ref[...] = jnp.reshape(1.0 - jnp.mean(sim), (1, 1))


def encode_and_loss(pooled, w_patch, w_proj, text_embeddings):
    B, Dp = pooled.shape
    out = pl.pallas_call(
        _encode_loss_kernel,
        out_shape=jax.ShapeDtypeStruct((1, 1), jnp.float32),
        grid=(1,),
        in_specs=[
            pl.BlockSpec((B, Dp), lambda i: (0, 0)),
            pl.BlockSpec((Dp, CLIP_EMBED_DIM), lambda i: (0, 0)),
            pl.BlockSpec((CLIP_EMBED_DIM, CLIP_EMBED_DIM), lambda i: (0, 0)),
            pl.BlockSpec((B, CLIP_EMBED_DIM), lambda i: (0, 0)),
        ],
        out_specs=pl.BlockSpec((1, 1), lambda i: (0, 0)),
        compiler_params=pltpu.CompilerParams(vmem_limit_bytes=32 << 20),
    )(pooled, w_patch, w_proj, text_embeddings)
    return out[0, 0]


# ---------------------------------------------------------------------------
# Full CLIPLoss.forward equivalent.
# ---------------------------------------------------------------------------
def clip_loss_forward(images, text_embeddings, w_patch, w_proj):
    if images is None:
        return jnp.float32(0.0)
    pooled = clamp_resize_pool(images)                                  # [B, 3072] bf16
    return encode_and_loss(
        pooled,
        w_patch.astype(jnp.bfloat16),
        w_proj.astype(jnp.bfloat16),
        text_embeddings.astype(jnp.float32),
    )


# ---------------------------------------------------------------------------
# Pure-JAX f32 reference of the same (stand-in) pipeline, for a tolerance test.
# ---------------------------------------------------------------------------
def _reference_forward(images, text_embeddings, w_patch, w_proj):
    B, C, H, W = images.shape
    l_mat, r_mat = _fold_matrices(H, W)
    xc = jnp.clip(images.astype(jnp.float32), -1.0, 1.0)
    pooled = jnp.einsum("yh,bchw,wx->bcyx", l_mat, xc, r_mat)
    pooled = pooled.reshape(B, C * PATCH * PATCH)
    feat = (pooled @ w_patch) @ w_proj
    img_n = feat / jnp.linalg.norm(feat, axis=-1, keepdims=True)
    txt_n = text_embeddings / jnp.linalg.norm(text_embeddings, axis=-1, keepdims=True)
    sim = jnp.nan_to_num(jnp.sum(img_n * txt_n, axis=-1))
    return pooled, 1.0 - jnp.mean(sim)


if __name__ == "__main__":
    key = jax.random.PRNGKey(0)
    k_img, k_txt, k_w1, k_w2 = jax.random.split(key, 4)

    B, C, H, W = 2, 3, 32, 32
    images = 1.5 * jax.random.normal(k_img, (B, C, H, W), dtype=jnp.float32)
    text_embeddings = jax.random.normal(k_txt, (B, CLIP_EMBED_DIM), dtype=jnp.float32)

    d_patch = C * PATCH * PATCH
    w_patch = jax.random.normal(k_w1, (d_patch, CLIP_EMBED_DIM), jnp.float32) / np.sqrt(d_patch)
    w_proj = jax.random.normal(k_w2, (CLIP_EMBED_DIM, CLIP_EMBED_DIM), jnp.float32) / np.sqrt(CLIP_EMBED_DIM)

    loss = jax.jit(clip_loss_forward)(images, text_embeddings, w_patch, w_proj)
    loss = jax.block_until_ready(loss)
    assert loss.shape == () and bool(jnp.isfinite(loss))

    # Tolerance check against the pure-JAX f32 reference (bf16 matmuls inside
    # the kernels -> loose tolerances).
    pooled_k = jax.block_until_ready(jax.jit(clamp_resize_pool)(images))
    pooled_ref, loss_ref = _reference_forward(images, text_embeddings, w_patch, w_proj)
    assert bool(jnp.allclose(pooled_k.astype(jnp.float32), pooled_ref,
                             rtol=5e-2, atol=1e-2)), "pooled mismatch vs reference"
    assert abs(float(loss) - float(loss_ref)) < 2.5e-2, "loss mismatch vs reference"

    print("KERNEL_OK")
</pallas_src>

<mosaic_0001>
module attributes {stable_mosaic.version = 11 : i64} {
  func.func @_clamp_resize_pool_kernel(%arg0: i32, %arg1: i32, %arg2: memref<6x32x32xf32, #tpu.memory_space<vmem>>, %arg3: memref<32x32xbf16, #tpu.memory_space<vmem>>, %arg4: memref<32x32xbf16, #tpu.memory_space<vmem>>, %arg5: memref<32x192xbf16, #tpu.memory_space<vmem>>, %arg6: memref<192x32xf32, #tpu.memory_space<vmem>>) attributes {dimension_semantics = [#tpu.dimension_semantics<parallel>, #tpu.dimension_semantics<arbitrary>], iteration_bounds = array<i64: 1, 1>, scalar_prefetch = 0 : i64, scratch_operands = 1 : i64, tpu.core_type = #tpu.core_type<tc>, window_params = [{transform_indices = @transform_0, window_bounds = array<i64: 6, 32, 32>}, {pipeline_mode = #tpu.pipeline_mode<synchronous>, transform_indices = @transform_1, window_bounds = array<i64: 32, 32>}, {transform_indices = @transform_2, window_bounds = array<i64: 32, 32>}, {transform_indices = @transform_3, window_bounds = array<i64: 32, 192>}]} {
    %c0_i32 = arith.constant 0 : i32
    %0 = arith.cmpi eq, %arg1, %c0_i32 : i32
    %1 = arith.extui %0 : i1 to i32
    %c0_i32_0 = arith.constant 0 : i32
    %2 = arith.cmpi ne, %1, %c0_i32_0 : i32
    scf.if %2 {
      %cst_13 = arith.constant 0.000000e+00 : f32
      %18 = vector.broadcast %cst_13 : f32 to vector<192x32xf32>
      %c0_14 = arith.constant 0 : index
      %c0_15 = arith.constant 0 : index
      %19 = vector.load %arg6[%c0_14, %c0_15] : memref<192x32xf32, #tpu.memory_space<vmem>>, vector<192x32xf32>
      tpu.vector_store %arg6[%c0_14, %c0_15], %18 {strides = array<i32>} : memref<192x32xf32, #tpu.memory_space<vmem>>, vector<192x32xf32>,
    } else {
    }
    %c0 = arith.constant 0 : index
    %c0_1 = arith.constant 0 : index
    %c0_2 = arith.constant 0 : index
    %3 = vector.load %arg2[%c0, %c0_1, %c0_2] : memref<6x32x32xf32, #tpu.memory_space<vmem>>, vector<6x32x32xf32>
    %4 = vector.shape_cast %3 : vector<6x32x32xf32> to vector<192x32xf32>
    %cst = arith.constant -1.000000e+00 : f32
    %cst_3 = arith.constant 1.000000e+00 : f32
    %5 = vector.broadcast %cst : f32 to vector<192x32xf32>
    %6 = arith.maximumf %5, %4 : vector<192x32xf32>
    %7 = vector.broadcast %cst_3 : f32 to vector<192x32xf32>
    %8 = arith.minimumf %7, %6 : vector<192x32xf32>
    %9 = arith.truncf %8 : vector<192x32xf32> to vector<192x32xbf16>
    %c0_4 = arith.constant 0 : index
    %c0_5 = arith.constant 0 : index
    %10 = vector.load %arg6[%c0_4, %c0_5] : memref<192x32xf32, #tpu.memory_space<vmem>>, vector<192x32xf32>
    %c0_6 = arith.constant 0 : index
    %c0_7 = arith.constant 0 : index
    %11 = vector.load %arg4[%c0_6, %c0_7] : memref<32x32xbf16, #tpu.memory_space<vmem>>, vector<32x32xbf16>
    %cst_8 = arith.constant dense<0.000000e+00> : vector<192x32xf32>
    %12 = tpu.matmul %9, %11, %cst_8 {dimension_numbers = #tpu.dot_dimension_numbers<[1], [0], [0], [1], [0, 0, 1, 1], [], []>} : vector<192x32xbf16>, vector<32x32xbf16>, vector<192x32xf32> -> vector<192x32xf32>
    %13 = arith.addf %10, %12 : vector<192x32xf32>
    %c0_9 = arith.constant 0 : index
    %c0_10 = arith.constant 0 : index
    %14 = vector.load %arg6[%c0_9, %c0_10] : memref<192x32xf32, #tpu.memory_space<vmem>>, vector<192x32xf32>
    tpu.vector_store %arg6[%c0_9, %c0_10], %13 {strides = array<i32>} : memref<192x32xf32, #tpu.memory_space<vmem>>, vector<192x32xf32>,
    %c0_i32_11 = arith.constant 0 : i32
    %15 = arith.cmpi eq, %arg1, %c0_i32_11 : i32
    %16 = arith.extui %15 : i1 to i32
    %c0_i32_12 = arith.constant 0 : i32
    %17 = arith.cmpi ne, %16, %c0_i32_12 : i32
    scf.if %17 {
      %c0_13 = arith.constant 0 : index
      %c0_14 = arith.constant 0 : index
      %18 = vector.load %arg6[%c0_13, %c0_14] : memref<192x32xf32, #tpu.memory_space<vmem>>, vector<192x32xf32>
      %19 = arith.truncf %18 : vector<192x32xf32> to vector<192x32xbf16>
      %20 = vector.extract_strided_slice %19 {offsets = [0, 0], sizes = [32, 32], strides = [1, 1]} : vector<192x32xbf16> to vector<32x32xbf16>
      %21 = vector.extract_strided_slice %19 {offsets = [32, 0], sizes = [32, 32], strides = [1, 1]} : vector<192x32xbf16> to vector<32x32xbf16>
      %22 = vector.extract_strided_slice %19 {offsets = [64, 0], sizes = [32, 32], strides = [1, 1]} : vector<192x32xbf16> to vector<32x32xbf16>
      %23 = vector.extract_strided_slice %19 {offsets = [96, 0], sizes = [32, 32], strides = [1, 1]} : vector<192x32xbf16> to vector<32x32xbf16>
      %24 = vector.extract_strided_slice %19 {offsets = [128, 0], sizes = [32, 32], strides = [1, 1]} : vector<192x32xbf16> to vector<32x32xbf16>
      %25 = vector.extract_strided_slice %19 {offsets = [160, 0], sizes = [32, 32], strides = [1, 1]} : vector<192x32xbf16> to vector<32x32xbf16>
      %26 = tpu.concatenate %20, %21, %22, %23, %24, %25 in 1 : vector<32x32xbf16>, vector<32x32xbf16>, vector<32x32xbf16>, vector<32x32xbf16>, vector<32x32xbf16>, vector<32x32xbf16> -> vector<32x192xbf16>
      %c0_15 = arith.constant 0 : index
      %c0_16 = arith.constant 0 : index
      %27 = vector.load %arg3[%c0_15, %c0_16] : memref<32x32xbf16, #tpu.memory_space<vmem>>, vector<32x32xbf16>
      %cst_17 = arith.constant dense<0.000000e+00> : vector<32x192xf32>
      %28 = tpu.matmul %27, %26, %cst_17 {dimension_numbers = #tpu.dot_dimension_numbers<[1], [0], [0], [1], [0, 0, 1, 1], [], []>} : vector<32x32xbf16>, vector<32x192xbf16>, vector<32x192xf32> -> vector<32x192xf32>
      %29 = arith.truncf %28 : vector<32x192xf32> to vector<32x192xbf16>
      %c0_18 = arith.constant 0 : index
      %c0_19 = arith.constant 0 : index
      %30 = vector.load %arg5[%c0_18, %c0_19] : memref<32x192xbf16, #tpu.memory_space<vmem>>, vector<32x192xbf16>
      tpu.vector_store %arg5[%c0_18, %c0_19], %29 {strides = array<i32>} : memref<32x192xbf16, #tpu.memory_space<vmem>>, vector<32x192xbf16>,
    } else {
    }
    return
  }
  func.func @transform_0(%arg0: i32, %arg1: i32) -> (i32, i32, i32) {
    %c0_i32 = arith.constant 0 : i32
    %c0_i32_0 = arith.constant 0 : i32
    return %arg0, %c0_i32, %arg1 : i32, i32, i32
  }
  func.func @transform_1(%arg0: i32, %arg1: i32) -> (i32, i32) {
    %c0_i32 = arith.constant 0 : i32
    %c0_i32_0 = arith.constant 0 : i32
    %c0_i32_1 = arith.constant 0 : i32
    return %c0_i32, %c0_i32_0 : i32, i32
  }
  func.func @transform_2(%arg0: i32, %arg1: i32) -> (i32, i32) {
    %c0_i32 = arith.constant 0 : i32
    %c0_i32_0 = arith.constant 0 : i32
    return %arg1, %c0_i32 : i32, i32
  }
  func.func @transform_3(%arg0: i32, %arg1: i32) -> (i32, i32) {
    %c0_i32 = arith.constant 0 : i32
    %c0_i32_0 = arith.constant 0 : i32
    return %c0_i32, %arg0 : i32, i32
  }
}

module attributes {stable_mosaic.version = 11 : i64} {
  func.func @_encode_loss_kernel(%arg0: i32, %arg1: memref<2x3072xbf16, #tpu.memory_space<vmem>>, %arg2: memref<3072x512xbf16, #tpu.memory_space<vmem>>, %arg3: memref<512x512xbf16, #tpu.memory_space<vmem>>, %arg4: memref<2x512xf32, #tpu.memory_space<vmem>>, %arg5: memref<1x1xf32, #tpu.memory_space<vmem>>) attributes {dimension_semantics = [#tpu.dimension_semantics<arbitrary>], iteration_bounds = array<i64: 1>, scalar_prefetch = 0 : i64, scratch_operands = 0 : i64, tpu.core_type = #tpu.core_type<tc>, window_params = [{pipeline_mode = #tpu.pipeline_mode<synchronous>, transform_indices = @transform_0, window_bounds = array<i64: 2, 3072>}, {pipeline_mode = #tpu.pipeline_mode<synchronous>, transform_indices = @transform_1, window_bounds = array<i64: 3072, 512>}, {pipeline_mode = #tpu.pipeline_mode<synchronous>, transform_indices = @transform_2, window_bounds = array<i64: 512, 512>}, {pipeline_mode = #tpu.pipeline_mode<synchronous>, transform_indices = @transform_3, window_bounds = array<i64: 2, 512>}, {pipeline_mode = #tpu.pipeline_mode<synchronous>, transform_indices = @transform_4, window_bounds = array<i64: 1, 1>}]} {
    %c0 = arith.constant 0 : index
    %c0_0 = arith.constant 0 : index
    %0 = vector.load %arg1[%c0, %c0_0] : memref<2x3072xbf16, #tpu.memory_space<vmem>>, vector<2x3072xbf16>
    %c0_1 = arith.constant 0 : index
    %c0_2 = arith.constant 0 : index
    %1 = vector.load %arg2[%c0_1, %c0_2] : memref<3072x512xbf16, #tpu.memory_space<vmem>>, vector<3072x512xbf16>
    %cst = arith.constant dense<0.000000e+00> : vector<2x512xf32>
    %2 = tpu.matmul %0, %1, %cst {dimension_numbers = #tpu.dot_dimension_numbers<[1], [0], [0], [1], [0, 0, 1, 1], [], []>} : vector<2x3072xbf16>, vector<3072x512xbf16>, vector<2x512xf32> -> vector<2x512xf32>
    %3 = arith.truncf %2 : vector<2x512xf32> to vector<2x512xbf16>
    %c0_3 = arith.constant 0 : index
    %c0_4 = arith.constant 0 : index
    %4 = vector.load %arg3[%c0_3, %c0_4] : memref<512x512xbf16, #tpu.memory_space<vmem>>, vector<512x512xbf16>
    %cst_5 = arith.constant dense<0.000000e+00> : vector<2x512xf32>
    %5 = tpu.matmul %3, %4, %cst_5 {dimension_numbers = #tpu.dot_dimension_numbers<[1], [0], [0], [1], [0, 0, 1, 1], [], []>} : vector<2x512xbf16>, vector<512x512xbf16>, vector<2x512xf32> -> vector<2x512xf32>
    %c0_6 = arith.constant 0 : index
    %c0_7 = arith.constant 0 : index
    %6 = vector.load %arg4[%c0_6, %c0_7] : memref<2x512xf32, #tpu.memory_space<vmem>>, vector<2x512xf32>
    %7 = arith.mulf %5, %6 : vector<2x512xf32>
    %cst_8 = arith.constant dense<0.000000e+00> : vector<2xf32>
    %8 = vector.multi_reduction <add>, %7, %cst_8 [1] : vector<2x512xf32> to vector<2xf32>
    %9 = vector.shape_cast %8 : vector<2xf32> to vector<2x1xf32>
    %10 = arith.mulf %5, %5 : vector<2x512xf32>
    %cst_9 = arith.constant dense<0.000000e+00> : vector<2xf32>
    %11 = vector.multi_reduction <add>, %10, %cst_9 [1] : vector<2x512xf32> to vector<2xf32>
    %12 = vector.shape_cast %11 : vector<2xf32> to vector<2x1xf32>
    %13 = arith.mulf %6, %6 : vector<2x512xf32>
    %cst_10 = arith.constant dense<0.000000e+00> : vector<2xf32>
    %14 = vector.multi_reduction <add>, %13, %cst_10 [1] : vector<2x512xf32> to vector<2xf32>
    %15 = vector.shape_cast %14 : vector<2xf32> to vector<2x1xf32>
    %16 = arith.mulf %12, %15 : vector<2x1xf32>
    %17 = math.rsqrt %16 : vector<2x1xf32>
    %18 = arith.mulf %9, %17 : vector<2x1xf32>
    %19 = arith.cmpf one, %18, %18 : vector<2x1xf32>
    %cst_11 = arith.constant 0.000000e+00 : f32
    %20 = vector.broadcast %cst_11 : f32 to vector<2x1xf32>
    %21 = arith.select %19, %20, %18 : vector<2x1xi1>, vector<2x1xf32>
    %cst_12 = arith.constant -3.40282347E+38 : f32
    %cst_13 = arith.constant 3.40282347E+38 : f32
    %22 = vector.broadcast %cst_12 : f32 to vector<2x1xf32>
    %23 = arith.maximumf %22, %21 : vector<2x1xf32>
    %24 = vector.broadcast %cst_13 : f32 to vector<2x1xf32>
    %25 = arith.minimumf %24, %23 : vector<2x1xf32>
    %26 = vector.shape_cast %25 : vector<2x1xf32> to vector<1x2x1xf32>
    %cst_14 = arith.constant dense<0.000000e+00> : vector<1xf32>
    %27 = vector.multi_reduction <add>, %26, %cst_14 [1, 2] : vector<1x2x1xf32> to vector<1xf32>
    %28 = vector.shape_cast %27 : vector<1xf32> to vector<1x1x1xf32>
    %29 = vector.extract %28[0, 0, 0] : f32 from vector<1x1x1xf32>
    %cst_15 = arith.constant 2.000000e+00 : f32
    %30 = arith.divf %29, %cst_15 : f32
    %cst_16 = arith.constant 1.000000e+00 : f32
    %31 = arith.subf %cst_16, %30 : f32
    %32 = vector.broadcast %31 : f32 to vector<1x1xf32>
    %c0_17 = arith.constant 0 : index
    %c0_18 = arith.constant 0 : index
    %33 = vector.load %arg5[%c0_17, %c0_18] : memref<1x1xf32, #tpu.memory_space<vmem>>, vector<1x1xf32>
    tpu.vector_store %arg5[%c0_17, %c0_18], %32 {strides = array<i32>} : memref<1x1xf32, #tpu.memory_space<vmem>>, vector<1x1xf32>,
    return
  }
  func.func @transform_0(%arg0: i32) -> (i32, i32) {
    %c0_i32 = arith.constant 0 : i32
    %c0_i32_0 = arith.constant 0 : i32
    %c0_i32_1 = arith.constant 0 : i32
    return %c0_i32, %c0_i32_0 : i32, i32
  }
  func.func @transform_1(%arg0: i32) -> (i32, i32) {
    %c0_i32 = arith.constant 0 : i32
    %c0_i32_0 = arith.constant 0 : i32
    %c0_i32_1 = arith.constant 0 : i32
    return %c0_i32, %c0_i32_0 : i32, i32
  }
  func.func @transform_2(%arg0: i32) -> (i32, i32) {
    %c0_i32 = arith.constant 0 : i32
    %c0_i32_0 = arith.constant 0 : i32
    %c0_i32_1 = arith.constant 0 : i32
    return %c0_i32, %c0_i32_0 : i32, i32
  }
  func.func @transform_3(%arg0: i32) -> (i32, i32) {
    %c0_i32 = arith.constant 0 : i32
    %c0_i32_0 = arith.constant 0 : i32
    %c0_i32_1 = arith.constant 0 : i32
    return %c0_i32, %c0_i32_0 : i32, i32
  }
  func.func @transform_4(%arg0: i32) -> (i32, i32) {
    %c0_i32 = arith.constant 0 : i32
    %c0_i32_0 = arith.constant 0 : i32
    %c0_i32_1 = arith.constant 0 : i32
    return %c0_i32, %c0_i32_0 : i32, i32
  }
}

</mosaic_0001>

<bundles_post_ra>
// kernel: clip_loss_forward.2
= control target key start
LH: loop header
LB: loop body
LE: loop exit
PB: predicated region body
PF: predicated region fallthrough
CT: control target
= control target key end

     0   :  { %8 = vsyncpa [#allocation4], 0  ;;  %s927_s0 = inlined_call_operand.hbm [shape: f32[6,32,32], index: 0, kind: input, shape index: {}]   ;;  %s928_s1 = inlined_call_operand.hbm [shape: bf16[32,32], index: 1, kind: input, shape index: {}]   ;;  %s929_s2 = inlined_call_operand.hbm [shape: bf16[32,32], index: 2, kind: input, shape index: {}]   ;;  %s930_s3 = inlined_call_operand.vmem [shape: bf16[32,192], index: 3, kind: output, shape index: {}]  }
   0x1   :  { %9 = vsyncpa [#allocation6], 0  ;;  %s797_s12 = smov [#allocation5]  }
   0x2   :  { %s27_s13 = sshll.u32 %s797_s12, 4  ;;  %s28_s13 = int_to_ptr.vmem [resolvable:$true] %s27_s13 }
   0x3   :  { %s741_s14 = scalar_lea.vmem %s28_s13, 256  ;;  %p746_p1 = scmp.lt.s32.totalorder %s28_s13, %s28_s13 }
   0x4   :  { %p742_p0 = scmp.ne.s32.totalorder %s28_s13, %s741_s14  ;;  %p747_p2 = scmp.lt.s32.totalorder %s741_s14, %s741_s14 }
   0x6   :  { %p748_p3 = por %p747_p2, %p746_p1 }
   0x8   :  { %p749_p4 = pnand %p748_p3, %p742_p0 }
   0xa   :  { %752 = shalt.err (!%p749_p4)
}
   0xb   :  { %s798_s15 = smov 64   ;;  %s799_s16 = smov 4  }
   0xc   :  { %33 = dma.hbm_to_vmem [thread:$0]  %s928_s1, 256, %s28_s13, [#allocation6], %s798_s15, %s798_s15, %s799_s16  }
   0xd   :  { %s800_s19 = smov [#allocation3]  }
   0xe   :  { %s15_s20 = sshll.u32 %s800_s19, 4  ;;  %s16_s20 = int_to_ptr.vmem [resolvable:$true] %s15_s20 }
   0xf   :  { %s761_s21 = scalar_lea.vmem %s16_s20, 3072  ;;  %p766_p6 = scmp.lt.s32.totalorder %s16_s20, %s16_s20 }
  0x10   :  { %p762_p5 = scmp.ne.s32.totalorder %s16_s20, %s761_s21  ;;  %p767_p7 = scmp.lt.s32.totalorder %s761_s21, %s761_s21 }
  0x12   :  { %p768_p8 = por %p767_p7, %p766_p6 }
  0x14   :  { %p769_p9 = pnand %p768_p8, %p762_p5 }
  0x16   :  { %772 = shalt.err (!%p769_p9)
}
  0x17   :  { %s801_s22 = smov 128   ;;  %s802_s23 = smov 8  }
  0x18   :  { %21 = dma.hbm_to_vmem [thread:$0]  %s927_s0, 3072, %s16_s20, [#allocation4], %s801_s22, %s801_s22, %s802_s23  }
  0x19   :  { %s803_s26 = smov [#allocation7]  }
  0x1a   :  { %s39_s27 = sshll.u32 %s803_s26, 4  ;;  %s40_s27 = int_to_ptr.vmem [resolvable:$true] %s39_s27 }
  0x1b   :  { %s781_s1 = scalar_lea.vmem %s40_s27, 256  ;;  %p786_p11 = scmp.lt.s32.totalorder %s40_s27, %s40_s27 }
  0x1c   :  { %p782_p10 = scmp.ne.s32.totalorder %s40_s27, %s781_s1  ;;  %p787_p12 = scmp.lt.s32.totalorder %s781_s1, %s781_s1 }
  0x1e   :  { %p788_p13 = por %p787_p12, %p786_p11 }
  0x20   :  { %p789_p0 = pnand %p788_p13, %p782_p10 }
  0x22   :  { %792 = shalt.err (!%p789_p0)
}
  0x23   :  { %45 = dma.hbm_to_vmem [thread:$0]  %s929_s2, 256, %s40_s27, [#allocation6], %s798_s15, %s798_s15, %s799_s16  }
  0x24   :  { %793 = dma.done.wait [#allocation4], 3072  }
  0x25   :  { %794 = vsyncadd [#allocation4], 4294964224 }
  0x26   :  { %795 = dma.done.wait [#allocation6], 512  }
  0x27   :  { %796 = vsyncadd [#allocation6], 4294966784  ;;  %vm60_vm0 = vcmask 261120   ;;  %v804_v0 = vmov 0.0   ;;  %v729_v1 = vld [vmem:[#allocation7 + $0x8] sm:$0xff]   ;;  %v730_v2 = vld [vmem:[#allocation7] sm:$0xff]  }
  0x28   :  { %63 = vst.msk [vmem:[#allocation2 + $0x10] sm:$0xff] %vm60_vm0, %v804_v0  ;;  %61 = vst.msk [vmem:[#allocation2] sm:$0xff] %vm60_vm0, %v804_v0  ;;  %686 = vmatprep.subr.bf16.mxu0 %v729_v1  ;;  %714 = vmatprep.subr.bf16.mxu1 %v729_v1  ;;  %v85_v3 = vld [vmem:[#allocation3] sm:$0xff]  ;;  %v86_v4 = vld [vmem:[#allocation3 + $0x8] sm:$0xff]  ;;  %s805_s0 = smov 32   ;;  %s807_s2 = smov 96  }
  0x29   :  { %62 = vst.msk [vmem:[#allocation2 + $0x8] sm:$0xff] %vm60_vm0, %v804_v0  ;;  %64 = vst.msk [vmem:[#allocation2 + $0x18] sm:$0xff] %vm60_vm0, %v804_v0  ;;  %v101_v5 = vld [vmem:[#allocation3 + $0x80] sm:$0xff]  ;;  %687 = vmatpush3.bf16.msra.mxu0 %v729_v1  ;;  %716 = vmatpush3.bf16.msra.mxu1 %v729_v1  ;;  %v622_v6 = vclamps-f32 %v85_v3, 1.0  ;;  %v623_v7 = vclamps-f32 %v86_v4, 1.0  ;;  %v102_v8 = vld [vmem:[#allocation3 + $0x88] sm:$0xff] }
  0x2a   :  { %65 = vst.msk [vmem:[#allocation2 + $0x20] sm:$0xff] %vm60_vm0, %v804_v0  ;;  %66 = vst.msk [vmem:[#allocation2 + $0x28] sm:$0xff] %vm60_vm0, %v804_v0  ;;  %v638_v9 = vclamps-f32 %v101_v5, 1.0  ;;  %v87_v10 = vld [vmem:[#allocation3 + $0x10] sm:$0xff]  ;;  %v88_v11 = vld [vmem:[#allocation3 + $0x18] sm:$0xff]  ;;  %688 = vmatprep.subr.bf16.mxu0 %v730_v2  ;;  %715 = vmatprep.subr.bf16.mxu1 %v730_v2  ;;  %v639_v12 = vclamps-f32 %v102_v8, 1.0 }
  0x2b   :  { %67 = vst.msk [vmem:[#allocation2 + $0x30] sm:$0xff] %vm60_vm0, %v804_v0  ;;  %68 = vst.msk [vmem:[#allocation2 + $0x38] sm:$0xff] %vm60_vm0, %v804_v0  ;;  %v624_v13 = vclamps-f32 %v87_v10, 1.0  ;;  %v625_v14 = vclamps-f32 %v88_v11, 1.0  ;;  %v103_v15 = vld [vmem:[#allocation3 + $0x90] sm:$0xff]  ;;  %v104_v16 = vld [vmem:[#allocation3 + $0x98] sm:$0xff]  ;;  %v157_v18 = vpack.c.bf16 %v623_v7, %v622_v6 }
  0x2c   :  { %69 = vst.msk [vmem:[#allocation2 + $0x40] sm:$0xff] %vm60_vm0, %v804_v0  ;;  %70 = vst.msk [vmem:[#allocation2 + $0x48] sm:$0xff] %vm60_vm0, %v804_v0  ;;  %v89_v17 = vld [vmem:[#allocation3 + $0x20] sm:$0xff]  ;;  %v640_v19 = vclamps-f32 %v103_v15, 1.0  ;;  %v641_v20 = vclamps-f32 %v104_v16, 1.0  ;;  %v90_v21 = vld [vmem:[#allocation3 + $0x28] sm:$0xff]  ;;  %v165_v25 = vpack.c.bf16 %v639_v12, %v638_v9 }
  0x2d   :  { %71 = vst.msk [vmem:[#allocation2 + $0x50] sm:$0xff] %vm60_vm0, %v804_v0  ;;  %72 = vst.msk [vmem:[#allocation2 + $0x58] sm:$0xff] %vm60_vm0, %v804_v0  ;;  %v626_v22 = vclamps-f32 %v89_v17, 1.0  ;;  %v105_v23 = vld [vmem:[#allocation3 + $0xa0] sm:$0xff]  ;;  %v106_v24 = vld [vmem:[#allocation3 + $0xa8] sm:$0xff]  ;;  %v158_v26 = vpack.c.bf16 %v625_v14, %v624_v13  ;;  %v627_v27 = vclamps-f32 %v90_v21, 1.0  ;;  %689 = vmatpush3.bf16.msra.mxu0 %v730_v2  ;;  %717 = vmatpush3.bf16.msra.mxu1 %v730_v2 }
  0x2e   :  { %73 = vst.msk [vmem:[#allocation2 + $0x60] sm:$0xff] %vm60_vm0, %v804_v0  ;;  %74 = vst.msk [vmem:[#allocation2 + $0x68] sm:$0xff] %vm60_vm0, %v804_v0  ;;  %v642_v28 = vclamps-f32 %v105_v23, 1.0  ;;  %v91_v29 = vld [vmem:[#allocation3 + $0x30] sm:$0xff]  ;;  %v166_v30 = vpack.c.bf16 %v641_v20, %v640_v19  ;;  %v643_v31 = vclamps-f32 %v106_v24, 1.0  ;;  %v92_v32 = vld [vmem:[#allocation3 + $0x38] sm:$0xff]  ;;  %690 = vmatprep.mubr.msk.bf16.mxu0 %vm60_vm0, %v157_v18  ;;  %706 = vmatprep.mubr.msk.bf16.mxu1 %vm60_vm0, %v165_v25 }
  0x2f   :  { %75 = vst.msk [vmem:[#allocation2 + $0x70] sm:$0xff] %vm60_vm0, %v804_v0  ;;  %76 = vst.msk [vmem:[#allocation2 + $0x78] sm:$0xff] %vm60_vm0, %v804_v0  ;;  %v107_v33 = vld [vmem:[#allocation3 + $0xb0] sm:$0xff]  ;;  %v108_v34 = vld [vmem:[#allocation3 + $0xb8] sm:$0xff]  ;;  %v159_v35 = vpack.c.bf16 %v627_v27, %v626_v22  ;;  %v628_v39 = vclamps-f32 %v91_v29, 1.0  ;;  %v629_v40 = vclamps-f32 %v92_v32, 1.0 }
  0x30   :  { %77 = vst.msk [vmem:[#allocation2 + $0x80] sm:$0xff] %vm60_vm0, %v804_v0  ;;  %78 = vst.msk [vmem:[#allocation2 + $0x88] sm:$0xff] %vm60_vm0, %v804_v0  ;;  %v93_v36 = vld [vmem:[#allocation3 + $0x40] sm:$0xff]  ;;  %v94_v37 = vld [vmem:[#allocation3 + $0x48] sm:$0xff]  ;;  %v167_v38 = vpack.c.bf16 %v643_v31, %v642_v28  ;;  %691 = vmatmul.mubr.msk.bf16.vlgmr.msra.gmra.mxu0 %vm60_vm0, %v158_v26  ;;  %707 = vmatmul.mubr.msk.bf16.vlgmr.msra.gmra.mxu1 %vm60_vm0, %v166_v30  ;;  %v644_v41 = vclamps-f32 %v107_v33, 1.0  ;;  %v645_v42 = vclamps-f32 %v108_v34, 1.0 }
  0x31   :  { %79 = vst.msk [vmem:[#allocation2 + $0x90] sm:$0xff] %vm60_vm0, %v804_v0  ;;  %80 = vst.msk [vmem:[#allocation2 + $0x98] sm:$0xff] %vm60_vm0, %v804_v0  ;;  %694 = vmatprep.mubr.msk.bf16.mxu0 %vm60_vm0, %v159_v35  ;;  %v630_v43 = vclamps-f32 %v93_v36, 1.0  ;;  %v631_v44 = vclamps-f32 %v94_v37, 1.0  ;;  %v160_v45 = vpack.c.bf16 %v629_v40, %v628_v39  ;;  %v95_v48 = vld [vmem:[#allocation3 + $0x50] sm:$0xff]  ;;  %v96_v49 = vld [vmem:[#allocation3 + $0x58] sm:$0xff] }
  0x32   :  { %81 = vst.msk [vmem:[#allocation2 + $0xa0] sm:$0xff] %vm60_vm0, %v804_v0  ;;  %82 = vst.msk [vmem:[#allocation2 + $0xa8] sm:$0xff] %vm60_vm0, %v804_v0  ;;  %710 = vmatprep.mubr.msk.bf16.mxu1 %vm60_vm0, %v167_v38  ;;  %v168_v46 = vpack.c.bf16 %v645_v42, %v644_v41  ;;  %v97_v50 = vld [vmem:[#allocation3 + $0x60] sm:$0xff]  ;;  %v98_v51 = vld [vmem:[#allocation3 + $0x68] sm:$0xff]  ;;  %v632_v52 = vclamps-f32 %v95_v48, 1.0  ;;  %v633_v53 = vclamps-f32 %v96_v49, 1.0 }
  0x33   :  { %83 = vst.msk [vmem:[#allocation2 + $0xb0] sm:$0xff] %vm60_vm0, %v804_v0  ;;  %84 = vst.msk [vmem:[#allocation2 + $0xb8] sm:$0xff] %vm60_vm0, %v804_v0  ;;  %v161_v47 = vpack.c.bf16 %v631_v44, %v630_v43  ;;  %v634_v54 = vclamps-f32 %v97_v50, 1.0  ;;  %v635_v55 = vclamps-f32 %v98_v51, 1.0  ;;  %v99_v58 = vld [vmem:[#allocation3 + $0x70] sm:$0xff]  ;;  %v100_v59 = vld [vmem:[#allocation3 + $0x78] sm:$0xff] }
  0x34   :  { %v162_v56 = vpack.c.bf16 %v633_v53, %v632_v52  ;;  %v636_v60 = vclamps-f32 %v99_v58, 1.0  ;;  %v637_v61 = vclamps-f32 %v100_v59, 1.0  ;;  %v171_v63 = vld [vmem:[#allocation2 + $0x10] sm:$0xff]  ;;  %v169_v3 = vld [vmem:[#allocation2] sm:$0xff]  ;;  %v172_v9 = vld [vmem:[#allocation2 + $0x18] sm:$0xff]  ;;  %vm492_vm1 = vcmask 523264  }
  0x35   :  { %v163_v57 = vpack.c.bf16 %v635_v55, %v634_v54  ;;  %v170_v15 = vld [vmem:[#allocation2 + $0x8] sm:$0xff]  ;;  %v175_v21 = vld [vmem:[#allocation2 + $0x30] sm:$0xff]  ;;  %v173_v27 = vld [vmem:[#allocation2 + $0x20] sm:$0xff]  ;;  %vm497_vm2 = vcmask 785408   ;;  %vm609_vm3 = vcmask 1043456   ;;  %vm610_vm4 = vcmask 523268  }
  0x36   :  { %v164_v62 = vpack.c.bf16 %v637_v61, %v636_v60  ;;  %v176_v33 = vld [vmem:[#allocation2 + $0x38] sm:$0xff]  ;;  %v174_v39 = vld [vmem:[#allocation2 + $0x28] sm:$0xff]  ;;  %v179_v44 = vld [vmem:[#allocation2 + $0x50] sm:$0xff] }
  0x37   :  { %v185_v4 = vld [vmem:[#allocation2 + $0x80] sm:$0xff]  ;;  %v186_v16 = vld [vmem:[#allocation2 + $0x88] sm:$0xff]  ;;  %v180_v52 = vld [vmem:[#allocation2 + $0x58] sm:$0xff] }
  0x38   :  { %695 = vmatmul.mubr.msk.bf16.gmra.mxu0 %vm60_vm0, %v160_v45  ;;  %711 = vmatmul.mubr.msk.bf16.gmra.mxu1 %vm60_vm0, %v168_v46  ;;  %v187_v0 = vld [vmem:[#allocation2 + $0x90] sm:$0xff]  ;;  %v188_v10 = vld [vmem:[#allocation2 + $0x98] sm:$0xff]  ;;  %v177_v49 = vld [vmem:[#allocation2 + $0x40] sm:$0xff] }
  0x39   :  { %698 = vmatprep.mubr.msk.bf16.mxu0 %vm60_vm0, %v161_v47  ;;  %v189_v28 = vld [vmem:[#allocation2 + $0xa0] sm:$0xff]  ;;  %v190_v40 = vld [vmem:[#allocation2 + $0xa8] sm:$0xff]  ;;  %v183_v58 = vld [vmem:[#allocation2 + $0x70] sm:$0xff] }
  0x3a   :  { %v191_v22 = vld [vmem:[#allocation2 + $0xb0] sm:$0xff]  ;;  %v192_v34 = vld [vmem:[#allocation2 + $0xb8] sm:$0xff]  ;;  %v178_v55 = vld [vmem:[#allocation2 + $0x48] sm:$0xff] }
  0x3b   :  { %vm611_vm5 = vmor %vm610_vm4, %vm609_vm3 }
  0x40   :  { %699 = vmatmul.mubr.msk.bf16.gmra.mxu0 %vm60_vm0, %v162_v56 }
  0x41   :  { %702 = vmatprep.mubr.msk.bf16.mxu0 %vm60_vm0, %v163_v57 }
  0x48   :  { %703 = vmatmul.mubr.msk.bf16.gmra.mxu0 %vm60_vm0, %v164_v62 }
  0xf0   :  { %v692_v1 = vpop.f32.mrf.mxu0  ;;  %v708_v2 = vpop.f32.mrf.mxu1 }
  0xf1   :  { %v377_v5 = vadd.f32 %v692_v1, %v171_v63  ;;  %v393_v6 = vadd.f32 %v708_v2, %v187_v0 }
  0xf2   :  { %v280_v7 = vpop.f32.mrf.mxu0  ;;  %v344_v8 = vpop.f32.mrf.mxu1 }
  0xf3   :  { %401 = vst.msk [vmem:[#allocation2 + $0x10] sm:$0xff] %vm60_vm0, %v377_v5  ;;  %417 = vst.msk [vmem:[#allocation2 + $0x90] sm:$0xff] %vm60_vm0, %v393_v6  ;;  %v375_v11 = vadd.f32 %v280_v7, %v169_v3  ;;  %v391_v12 = vadd.f32 %v344_v8, %v185_v4  ;;  %v181_v3 = vld [vmem:[#allocation2 + $0x60] sm:$0xff]  ;;  %v184_v7 = vld [vmem:[#allocation2 + $0x78] sm:$0xff] }
  0xf4   :  { %v693_v13 = vpop.f32.mrf.mxu0  ;;  %v709_v14 = vpop.f32.mrf.mxu1 }
  0xf5   :  { %399 = vst.msk [vmem:[#allocation2] sm:$0xff] %vm60_vm0, %v375_v11  ;;  %415 = vst.msk [vmem:[#allocation2 + $0x80] sm:$0xff] %vm60_vm0, %v391_v12  ;;  %v378_v17 = vadd.f32 %v693_v13, %v172_v9  ;;  %v394_v18 = vadd.f32 %v709_v14, %v188_v10  ;;  %v182_v12 = vld [vmem:[#allocation2 + $0x68] sm:$0xff] }
  0xf6   :  { %v283_v19 = vpop.f32.mrf.mxu0  ;;  %v347_v20 = vpop.f32.mrf.mxu1 }
  0xf7   :  { %402 = vst.msk [vmem:[#allocation2 + $0x18] sm:$0xff] %vm60_vm0, %v378_v17  ;;  %418 = vst.msk [vmem:[#allocation2 + $0x98] sm:$0xff] %vm60_vm0, %v394_v18  ;;  %v376_v23 = vadd.f32 %v283_v19, %v170_v15  ;;  %v392_v24 = vadd.f32 %v347_v20, %v186_v16 }
  0xf8   :  { %v696_v25 = vpop.f32.mrf.mxu0  ;;  %v712_v26 = vpop.f32.mrf.mxu1 }
  0xf9   :  { %400 = vst.msk [vmem:[#allocation2 + $0x8] sm:$0xff] %vm60_vm0, %v376_v23  ;;  %416 = vst.msk [vmem:[#allocation2 + $0x88] sm:$0xff] %vm60_vm0, %v392_v24  ;;  %v381_v29 = vadd.f32 %v696_v25, %v175_v21  ;;  %v397_v30 = vadd.f32 %v712_v26, %v191_v22  ;;  %v806_v24 = vmov 0  }
  0xfa   :  { %v296_v31 = vpop.f32.mrf.mxu0  ;;  %v360_v32 = vpop.f32.mrf.mxu1  ;;  %564 = vmatprep.mubr.bf16.mxu1 %v806_v24 }
  0xfb   :  { %405 = vst.msk [vmem:[#allocation2 + $0x30] sm:$0xff] %vm60_vm0, %v381_v29  ;;  %421 = vst.msk [vmem:[#allocation2 + $0xb0] sm:$0xff] %vm60_vm0, %v397_v30  ;;  %v379_v35 = vadd.f32 %v296_v31, %v173_v27  ;;  %v395_v36 = vadd.f32 %v360_v32, %v189_v28  ;;  %v444_v32 = vld [vmem:[#allocation2 + $0x90] sm:$0xff] }
  0xfc   :  { %v697_v37 = vpop.f32.mrf.mxu0  ;;  %v713_v38 = vpop.f32.mrf.mxu1 }
  0xfd   :  { %403 = vst.msk [vmem:[#allocation2 + $0x20] sm:$0xff] %vm60_vm0, %v379_v35  ;;  %419 = vst.msk [vmem:[#allocation2 + $0xa0] sm:$0xff] %vm60_vm0, %v395_v36  ;;  %v382_v41 = vadd.f32 %v697_v37, %v176_v33  ;;  %v398_v42 = vadd.f32 %v713_v38, %v192_v34 }
  0xfe   :  { %v299_v43 = vpop.f32.mrf.mxu0  ;;  %v363_v45 = vpop.f32.mrf.mxu1  ;;  %v445_v33 = vld [vmem:[#allocation2 + $0x98] sm:$0xff] }
  0xff   :  { %406 = vst.msk [vmem:[#allocation2 + $0x38] sm:$0xff] %vm60_vm0, %v382_v41  ;;  %422 = vst.msk [vmem:[#allocation2 + $0xb8] sm:$0xff] %vm60_vm0, %v398_v42  ;;  %v380_v46 = vadd.f32 %v299_v43, %v174_v39  ;;  %v396_v47 = vadd.f32 %v363_v45, %v190_v40  ;;  %v459_v34 = vpack.c.bf16 %v445_v33, %v444_v32  ;;  %v429_v40 = vld [vmem:[#allocation2 + $0x18] sm:$0xff]  ;;  %v428_v41 = vld [vmem:[#allocation2 + $0x10] sm:$0xff] }
 0x100   :  { %v700_v48 = vpop.f32.mrf.mxu0  ;;  %v451_v43 = vpack.c.bf16 %v429_v40, %v428_v41  ;;  %v443_v45 = vld [vmem:[#allocation2 + $0x88] sm:$0xff] }
 0x101   :  { %404 = vst.msk [vmem:[#allocation2 + $0x28] sm:$0xff] %vm60_vm0, %v380_v46  ;;  %v385_v50 = vadd.f32 %v700_v48, %v179_v44  ;;  %420 = vst.msk [vmem:[#allocation2 + $0xa8] sm:$0xff] %vm60_vm0, %v396_v47  ;;  %v442_v44 = vld [vmem:[#allocation2 + $0x80] sm:$0xff]  ;;  %v427_v46 = vld [vmem:[#allocation2 + $0x8] sm:$0xff] }
 0x102   :  { %v312_v51 = vpop.f32.mrf.mxu0  ;;  %v448_v56 = vld [vmem:[#allocation2 + $0xb0] sm:$0xff] }
 0x103   :  { %409 = vst.msk [vmem:[#allocation2 + $0x50] sm:$0xff] %vm60_vm0, %v385_v50  ;;  %v383_v53 = vadd.f32 %v312_v51, %v177_v49  ;;  %v432_v61 = vld [vmem:[#allocation2 + $0x30] sm:$0xff]  ;;  %v426_v49 = vld [vmem:[#allocation2] sm:$0xff] }
 0x104   :  { %v701_v54 = vpop.f32.mrf.mxu0  ;;  %v430_v8 = vld [vmem:[#allocation2 + $0x20] sm:$0xff] }
 0x105   :  { %407 = vst.msk [vmem:[#allocation2 + $0x40] sm:$0xff] %vm60_vm0, %v383_v53  ;;  %v386_v57 = vadd.f32 %v701_v54, %v180_v52  ;;  %v446_v19 = vld [vmem:[#allocation2 + $0xa0] sm:$0xff]  ;;  %v458_v52 = vpack.c.bf16 %v443_v45, %v442_v44  ;;  %v450_v53 = vpack.c.bf16 %v427_v46, %v426_v49 }
 0x106   :  { %v315_v59 = vpop.f32.mrf.mxu0  ;;  %v449_v60 = vld [vmem:[#allocation2 + $0xb8] sm:$0xff] }
 0x107   :  { %v433_v62 = vld [vmem:[#allocation2 + $0x38] sm:$0xff]  ;;  %410 = vst.msk [vmem:[#allocation2 + $0x58] sm:$0xff] %vm60_vm0, %v386_v57  ;;  %v384_v63 = vadd.f32 %v315_v59, %v178_v55  ;;  %v461_v0 = vpack.c.bf16 %v449_v60, %v448_v56  ;;  %v731_v60 = vld [vmem:[#allocation5] sm:$0xff]  }
 0x108   :  { %v453_v1 = vpack.c.bf16 %v433_v62, %v432_v61  ;;  %v704_v2 = vpop.f32.mrf.mxu0  ;;  %v431_v4 = vld [vmem:[#allocation2 + $0x28] sm:$0xff] }
 0x109   :  { %408 = vst.msk [vmem:[#allocation2 + $0x48] sm:$0xff] %vm60_vm0, %v384_v63  ;;  %v389_v5 = vadd.f32 %v704_v2, %v183_v58  ;;  %484 = vrot.lane.b32.xlu1 %v461_v0, %s805_s0  ;;  %v452_v10 = vpack.c.bf16 %v431_v4, %v430_v8  ;;  %v447_v22 = vld [vmem:[#allocation2 + $0xa8] sm:$0xff] }
 0x10a   :  { %466 = vrot.lane.b32.xlu0 %v453_v1, %s805_s0  ;;  %v328_v6 = vpop.f32.mrf.mxu0  ;;  %v436_v15 = vld [vmem:[#allocation2 + $0x50] sm:$0xff]  ;;  %v460_v25 = vpack.c.bf16 %v447_v22, %v446_v19  ;;  %v732_v61 = vld [vmem:[#allocation5 + $0x8] sm:$0xff]  }
 0x10b   :  { %413 = vst.msk [vmem:[#allocation2 + $0x70] sm:$0xff] %vm60_vm0, %v389_v5  ;;  %v387_v9 = vadd.f32 %v328_v6, %v181_v3 }
 0x10c   :  { %v705_v11 = vpop.f32.mrf.mxu0  ;;  %v434_v20 = vld [vmem:[#allocation2 + $0x40] sm:$0xff] }
 0x10d   :  { %411 = vst.msk [vmem:[#allocation2 + $0x60] sm:$0xff] %vm60_vm0, %v387_v9  ;;  %v390_v13 = vadd.f32 %v705_v11, %v184_v7 }
 0x10e   :  { %464 = vrot.lane.b32.xlu0 %v452_v10, %s805_s0  ;;  %v331_v14 = vpop.f32.mrf.mxu0  ;;  %v437_v16 = vld [vmem:[#allocation2 + $0x58] sm:$0xff] }
 0x10f   :  { %414 = vst.msk [vmem:[#allocation2 + $0x78] sm:$0xff] %vm60_vm0, %v390_v13  ;;  %v388_v17 = vadd.f32 %v331_v14, %v182_v12  ;;  %v455_v18 = vpack.c.bf16 %v437_v16, %v436_v15 }
 0x110   :  { %v435_v21 = vld [vmem:[#allocation2 + $0x48] sm:$0xff] }
 0x111   :  { %412 = vst.msk [vmem:[#allocation2 + $0x68] sm:$0xff] %vm60_vm0, %v388_v17  ;;  %v454_v23 = vpack.c.bf16 %v435_v21, %v434_v20 }
 0x112   :  { %472 = vrot.lane.b32.xlu0 %v455_v18, %s798_s15  ;;  %v440_v26 = vld [vmem:[#allocation2 + $0x70] sm:$0xff] }
 0x113   :  { %470 = vrot.lane.b32.xlu1 %v454_v23, %s798_s15 }
 0x114   :  { %v438_v30 = vld [vmem:[#allocation2 + $0x60] sm:$0xff] }
 0x116   :  { %482 = vrot.lane.b32.xlu0 %v460_v25, %s805_s0  ;;  %v441_v27 = vld [vmem:[#allocation2 + $0x78] sm:$0xff] }
 0x117   :  { %v457_v28 = vpack.c.bf16 %v441_v27, %v440_v26 }
 0x118   :  { %v439_v29 = vld [vmem:[#allocation2 + $0x68] sm:$0xff] }
 0x119   :  { %478 = vrot.lane.b32.xlu1 %v457_v28, %s807_s2  ;;  %v456_v31 = vpack.c.bf16 %v439_v29, %v438_v30 }
 0x11d   :  { %476 = vrot.lane.b32.xlu1 %v456_v31, %s807_s2 }
 0x17b   :  { %v485_v35 = vpop.permute.xlu1 %484 }
 0x17c   :  { %v467_v36 = vpop.permute.xlu0 %466  ;;  %v510_v37 = vsel %vm60_vm0, %v459_v34, %v485_v35 }
 0x17d   :  { %544 = vmatprep.subr.bf16.mxu1 %v510_v37  ;;  %v491_v47 = vsel %vm60_vm0, %v451_v43, %v467_v36 }
 0x180   :  { %v465_v38 = vpop.permute.xlu0 %464 }
 0x181   :  { %v488_v56 = vsel %vm60_vm0, %v450_v53, %v465_v38 }
 0x184   :  { %v473_v39 = vpop.permute.xlu0 %472 }
 0x185   :  { %v471_v42 = vpop.permute.xlu1 %470  ;;  %v496_v50 = vsel %vm492_vm1, %v491_v47, %v473_v39 }
 0x186   :  { %v494_v57 = vsel %vm492_vm1, %v488_v56, %v471_v42 }
 0x188   :  { %v483_v48 = vpop.permute.xlu0 %482 }
 0x189   :  { %v506_v55 = vsel %vm60_vm0, %v458_v52, %v483_v48 }
 0x18b   :  { %v479_v51 = vpop.permute.xlu1 %478 }
 0x18c   :  { %v502_v54 = vsel %vm497_vm2, %v496_v50, %v479_v51 }
 0x18d   :  { %545 = vmatpush1.bf16.msra.mxu1 %v502_v54 }
 0x18e   :  { %546 = vmatprep.subr.bf16.mxu1 %v506_v55 }
 0x18f   :  { %v477_v58 = vpop.permute.xlu1 %476 }
 0x190   :  { %v499_v59 = vsel %vm497_vm2, %v494_v57, %v477_v58 }
 0x191   :  { %547 = vmatpush1.bf16.msra.mxu1 %v499_v59 }
 0x194   :  { %662 = vmatmul.mubr.msk.bf16.vlgmr.msra.gmra.mxu1 %vm60_vm0, %v731_v60 }
 0x195   :  { %574 = vmatprep.mubr.bf16.mxu1 %v806_v24 }
 0x19c   :  { %663 = vmatmul.mubr.msk.bf16.gmra.mxu1 %vm60_vm0, %v732_v61 }
 0x254   :  { %v566_v62 = vpop.f32.mrf.mxu1 }
 0x256   :  { %v568_v63 = vpop.f32.mrf.mxu1 }
 0x257   :  { %v668_v0 = vpack.c.bf16 %v568_v63, %v566_v62 }
 0x258   :  { %v570_v1 = vpop.f32.mrf.mxu1 }
 0x259   :  { %612 = vst.msk [vmem:[%s930_s3] sm:$0xff] %vm611_vm5, %v668_v0 }
 0x25a   :  { %v572_v2 = vpop.f32.mrf.mxu1 }
 0x25b   :  { %v669_v3 = vpack.c.bf16 %v572_v2, %v570_v1 }
 0x25c   :  { %v576_v4 = vpop.f32.mrf.mxu1 }
 0x25d   :  { %613 = vst.msk [vmem:[%s930_s3 + $0x8] sm:$0xff] %vm611_vm5, %v669_v3 }
 0x25e   :  { %v578_v5 = vpop.f32.mrf.mxu1 }
 0x25f   :  { %v670_v6 = vpack.c.bf16 %v578_v5, %v576_v4 }
 0x260   :  { %v580_v7 = vpop.f32.mrf.mxu1 }
 0x261   :  { %614 = vst.msk [vmem:[%s930_s3 + $0x10] sm:$0xff] %vm611_vm5, %v670_v6 }
 0x262   :  { %v582_v8 = vpop.f32.mrf.mxu1 }
 0x263   :  { %v671_v9 = vpack.c.bf16 %v582_v8, %v580_v7 }
 0x265   :  { %615 = vst.msk [vmem:[%s930_s3 + $0x18] sm:$0xff] %vm611_vm5, %v671_v9 }
 0x266   :  { %620 = vsyncpa [#allocation4], 1 }
 0x267   :  { %621 = vsyncpa [#allocation6], 1 }

// kernel: clip_loss_forward.3
= control target key start
LH: loop header
LB: loop body
LE: loop exit
PB: predicated region body
PF: predicated region fallthrough
CT: control target
= control target key end

     0   :  { %v9118_v36 = vmov 1966171168   ;;  %v796_v38 = vlaneseq  ;;  %s12114_s0 = inlined_call_operand.vmem [shape: bf16[2,3072], index: 0, kind: input, shape index: {}]   ;;  %s12115_s1 = inlined_call_operand.vmem [shape: bf16[3072,512], index: 1, kind: input, shape index: {}]   ;;  %s12116_s2 = inlined_call_operand.vmem [shape: bf16[512,512], index: 2, kind: input, shape index: {}]   ;;  %s12117_s3 = inlined_call_operand.vmem [shape: f32[2,512], index: 3, kind: input, shape index: {}]   ;;  %s12118_s4 = inlined_call_operand.hbm [shape: f32[1,1], index: 4, kind: output, shape index: {}]  }
   0x1   :  { %v7746_v0 = vld [vmem:[%s12115_s1 + $0xe4] ss:$16 sps:$4 sm:$0xff]   ;;  %v7750_v2 = vld [vmem:[%s12115_s1 + $0xe0] ss:$16 sps:$4 sm:$0xff]   ;;  %v794_v37 = vunpack.c.l.s4 %v9118_v36 }
   0x2   :  { %v7748_v1 = vld [vmem:[%s12115_s1 + $0x2e4] ss:$16 sps:$4 sm:$0xff]   ;;  %4803 = vmatprep.subr.bf16.mxu0 %v7746_v0  ;;  %v7751_v3 = vld [vmem:[%s12115_s1 + $0x2e0] ss:$16 sps:$4 sm:$0xff]   ;;  %v9263_v43 = vshrl.u32 %v796_v38, 7 }
   0x3   :  { %4844 = vmatprep.subr.bf16.mxu1 %v7748_v1  ;;  %v7752_v4 = vld [vmem:[%s12115_s1 + $0xc4] ss:$16 sps:$4 sm:$0xff]   ;;  %4804 = vmatpush1.bf16.msra.mxu0 %v7750_v2  ;;  %v7756_v6 = vld [vmem:[%s12115_s1 + $0xc0] ss:$16 sps:$4 sm:$0xff]   ;;  %v795_v42 = vunpack.c.0.s8 %v794_v37 }
   0x4   :  { %4845 = vmatpush1.bf16.msra.mxu1 %v7751_v3  ;;  %v7754_v5 = vld [vmem:[%s12115_s1 + $0x2c4] ss:$16 sps:$4 sm:$0xff]   ;;  %4805 = vmatprep.subr.bf16.mxu0 %v7752_v4  ;;  %v7757_v7 = vld [vmem:[%s12115_s1 + $0x2c0] ss:$16 sps:$4 sm:$0xff]  }
   0x5   :  { %4846 = vmatprep.subr.bf16.mxu1 %v7754_v5  ;;  %v7758_v8 = vld [vmem:[%s12115_s1 + $0xa4] ss:$16 sps:$4 sm:$0xff]   ;;  %v7762_v10 = vld [vmem:[%s12115_s1 + $0xa0] ss:$16 sps:$4 sm:$0xff]   ;;  %v9281_v49 = vsub.s32 %v795_v42, %v9263_v43 }
   0x6   :  { %v7760_v9 = vld [vmem:[%s12115_s1 + $0x2a4] ss:$16 sps:$4 sm:$0xff]   ;;  %v7763_v11 = vld [vmem:[%s12115_s1 + $0x2a0] ss:$16 sps:$4 sm:$0xff]  }
   0x7   :  { %4806 = vmatpush1.bf16.msra.mxu0 %v7756_v6  ;;  %v7764_v12 = vld [vmem:[%s12115_s1 + $0x84] ss:$16 sps:$4 sm:$0xff]   ;;  %v7768_v14 = vld [vmem:[%s12115_s1 + $0x80] ss:$16 sps:$4 sm:$0xff]  }
   0x8   :  { %4847 = vmatpush1.bf16.msra.mxu1 %v7757_v7  ;;  %4807 = vmatprep.subr.bf16.mxu0 %v7758_v8  ;;  %v7766_v13 = vld [vmem:[%s12115_s1 + $0x284] ss:$16 sps:$4 sm:$0xff]   ;;  %v7769_v15 = vld [vmem:[%s12115_s1 + $0x280] ss:$16 sps:$4 sm:$0xff]  }
   0x9   :  { %4848 = vmatprep.subr.bf16.mxu1 %v7760_v9  ;;  %v7770_v16 = vld [vmem:[%s12115_s1 + $0x64] ss:$16 sps:$4 sm:$0xff]   ;;  %v7774_v18 = vld [vmem:[%s12115_s1 + $0x60] ss:$16 sps:$4 sm:$0xff]  }
   0xa   :  { %v7772_v17 = vld [vmem:[%s12115_s1 + $0x264] ss:$16 sps:$4 sm:$0xff]   ;;  %v7775_v19 = vld [vmem:[%s12115_s1 + $0x260] ss:$16 sps:$4 sm:$0xff]  }
   0xb   :  { %4808 = vmatpush1.bf16.msra.mxu0 %v7762_v10  ;;  %v7776_v20 = vld [vmem:[%s12115_s1 + $0x44] ss:$16 sps:$4 sm:$0xff]   ;;  %v7780_v22 = vld [vmem:[%s12115_s1 + $0x40] ss:$16 sps:$4 sm:$0xff]  }
   0xc   :  { %4849 = vmatpush1.bf16.msra.mxu1 %v7763_v11  ;;  %4809 = vmatprep.subr.bf16.mxu0 %v7764_v12  ;;  %v7778_v21 = vld [vmem:[%s12115_s1 + $0x244] ss:$16 sps:$4 sm:$0xff]   ;;  %v7781_v23 = vld [vmem:[%s12115_s1 + $0x240] ss:$16 sps:$4 sm:$0xff]  }
   0xd   :  { %4850 = vmatprep.subr.bf16.mxu1 %v7766_v13  ;;  %v7782_v24 = vld [vmem:[%s12115_s1 + $0x24] ss:$16 sps:$4 sm:$0xff]   ;;  %v7786_v26 = vld [vmem:[%s12115_s1 + $0x20] ss:$16 sps:$4 sm:$0xff]  }
   0xe   :  { %v7784_v25 = vld [vmem:[%s12115_s1 + $0x224] ss:$16 sps:$4 sm:$0xff]   ;;  %v7787_v27 = vld [vmem:[%s12115_s1 + $0x220] ss:$16 sps:$4 sm:$0xff]  }
   0xf   :  { %4810 = vmatpush1.bf16.msra.mxu0 %v7768_v14  ;;  %v7788_v28 = vld [vmem:[%s12115_s1 + $0x4] ss:$16 sps:$4 sm:$0xff]   ;;  %v7792_v30 = vld [vmem:[%s12115_s1] ss:$16 sps:$4 sm:$0xff]  }
  0x10   :  { %4851 = vmatpush1.bf16.msra.mxu1 %v7769_v15  ;;  %4811 = vmatprep.subr.bf16.mxu0 %v7770_v16  ;;  %v7790_v29 = vld [vmem:[%s12115_s1 + $0x204] ss:$16 sps:$4 sm:$0xff]   ;;  %v7793_v31 = vld [vmem:[%s12115_s1 + $0x200] ss:$16 sps:$4 sm:$0xff]  }
  0x11   :  { %4852 = vmatprep.subr.bf16.mxu1 %v7772_v17  ;;  %v7794_v32 = vld [vmem:[%s12115_s1 + $0x1e4] ss:$16 sps:$4 sm:$0xff]   ;;  %v7798_v34 = vld [vmem:[%s12115_s1 + $0x1e0] ss:$16 sps:$4 sm:$0xff]  }
  0x12   :  { %v7796_v33 = vld [vmem:[%s12115_s1 + $0x3e4] ss:$16 sps:$4 sm:$0xff]   ;;  %v7799_v35 = vld [vmem:[%s12115_s1 + $0x3e0] ss:$16 sps:$4 sm:$0xff]  }
  0x13   :  { %4812 = vmatpush1.bf16.msra.mxu0 %v7774_v18  ;;  %v7800_v39 = vld [vmem:[%s12115_s1 + $0x1c4] ss:$16 sps:$4 sm:$0xff]   ;;  %v7804_v41 = vld [vmem:[%s12115_s1 + $0x1c0] ss:$16 sps:$4 sm:$0xff]  }
  0x14   :  { %4853 = vmatpush1.bf16.msra.mxu1 %v7775_v19  ;;  %4813 = vmatprep.subr.bf16.mxu0 %v7776_v20  ;;  %v7802_v40 = vld [vmem:[%s12115_s1 + $0x3c4] ss:$16 sps:$4 sm:$0xff]   ;;  %v7805_v44 = vld [vmem:[%s12115_s1 + $0x3c0] ss:$16 sps:$4 sm:$0xff]  }
  0x15   :  { %4854 = vmatprep.subr.bf16.mxu1 %v7778_v21  ;;  %v7806_v45 = vld [vmem:[%s12115_s1 + $0x1a4] ss:$16 sps:$4 sm:$0xff]   ;;  %v7810_v47 = vld [vmem:[%s12115_s1 + $0x1a0] ss:$16 sps:$4 sm:$0xff]  }
  0x16   :  { %v7808_v46 = vld [vmem:[%s12115_s1 + $0x3a4] ss:$16 sps:$4 sm:$0xff]   ;;  %v7811_v48 = vld [vmem:[%s12115_s1 + $0x3a0] ss:$16 sps:$4 sm:$0xff]  }
  0x17   :  { %4814 = vmatpush1.bf16.msra.mxu0 %v7780_v22  ;;  %v7812_v50 = vld [vmem:[%s12115_s1 + $0x184] ss:$16 sps:$4 sm:$0xff]   ;;  %v7816_v53 = vld [vmem:[%s12115_s1 + $0x180] ss:$16 sps:$4 sm:$0xff]  }
  0x18   :  { %4855 = vmatpush1.bf16.msra.mxu1 %v7781_v23  ;;  %4815 = vmatprep.subr.bf16.mxu0 %v7782_v24  ;;  %v7814_v51 = vld [vmem:[%s12115_s1 + $0x384] ss:$16 sps:$4 sm:$0xff]   ;;  %v7817_v55 = vld [vmem:[%s12115_s1 + $0x380] ss:$16 sps:$4 sm:$0xff]  }
  0x19   :  { %4856 = vmatprep.subr.bf16.mxu1 %v7784_v25  ;;  %v18_v52 = vld [vmem:[%s12114_s0] sm:$0xff] }
  0x1a   :  { %v799_v54 = vrot.slane %v18_v52, %v9281_v49  ;;  %v7818_v56 = vld [vmem:[%s12115_s1 + $0x164] ss:$16 sps:$4 sm:$0xff]   ;;  %v7822_v59 = vld [vmem:[%s12115_s1 + $0x160] ss:$16 sps:$4 sm:$0xff]   ;;  %v792_v1 = vcombine.high %v18_v52, %v18_v52 }
  0x1b   :  { %4816 = vmatpush1.bf16.msra.mxu0 %v7786_v26  ;;  %v7820_v57 = vld [vmem:[%s12115_s1 + $0x364] ss:$16 sps:$4 sm:$0xff]   ;;  %v7823_v61 = vld [vmem:[%s12115_s1 + $0x360] ss:$16 sps:$4 sm:$0xff]  }
  0x1c   :  { %4857 = vmatpush1.bf16.msra.mxu1 %v7787_v27  ;;  %4817 = vmatprep.subr.bf16.mxu0 %v7788_v28  ;;  %v807_v58 = vcombine.high %v799_v54, %v799_v54  ;;  %v7824_v62 = vld [vmem:[%s12115_s1 + $0x144] ss:$16 sps:$4 sm:$0xff]   ;;  %v7828_v2 = vld [vmem:[%s12115_s1 + $0x140] ss:$16 sps:$4 sm:$0xff]   ;;  %v9339_v6 = vrot.slane %v792_v1, %v9281_v49  ;;  %v9359_v13 = vrot.slane %v799_v54, %v9281_v49 }
  0x1d   :  { %4858 = vmatprep.subr.bf16.mxu1 %v7790_v29  ;;  %v7826_v63 = vld [vmem:[%s12115_s1 + $0x344] ss:$16 sps:$4 sm:$0xff]   ;;  %v7829_v3 = vld [vmem:[%s12115_s1 + $0x340] ss:$16 sps:$4 sm:$0xff]  }
  0x1e   :  { %v9309_v60 = vrot.slane %v807_v58, %v9281_v49  ;;  %v7830_v4 = vld [vmem:[%s12115_s1 + $0x124] ss:$16 sps:$4 sm:$0xff]   ;;  %v7834_v7 = vld [vmem:[%s12115_s1 + $0x120] ss:$16 sps:$4 sm:$0xff]   ;;  %v808_v11 = vcombine.high %v9339_v6, %v9339_v6  ;;  %v9375_v18 = vcombine.high %v9359_v13, %v9359_v13 }
  0x1f   :  { %4818 = vmatpush1.bf16.msra.mxu0 %v7792_v30  ;;  %v7832_v5 = vld [vmem:[%s12115_s1 + $0x324] ss:$16 sps:$4 sm:$0xff]   ;;  %v7835_v8 = vld [vmem:[%s12115_s1 + $0x320] ss:$16 sps:$4 sm:$0xff]  }
  0x20   :  { %4859 = vmatpush1.bf16.msra.mxu1 %v7793_v31  ;;  %4819 = vmatprep.subr.bf16.mxu0 %v7794_v32  ;;  %v9322_v0 = vcombine.high %v9309_v60, %v9309_v60  ;;  %v7836_v9 = vld [vmem:[%s12115_s1 + $0x104] ss:$16 sps:$4 sm:$0xff]   ;;  %v7840_v12 = vld [vmem:[%s12115_s1 + $0x100] ss:$16 sps:$4 sm:$0xff]   ;;  %v9371_v17 = vrot.slane %v808_v11, %v9281_v49 }
  0x21   :  { %4860 = vmatprep.subr.bf16.mxu1 %v7796_v33  ;;  %4835 = vmatprep.mubr.bf16.mxu0 %v9309_v60  ;;  %v7838_v10 = vld [vmem:[%s12115_s1 + $0x304] ss:$16 sps:$4 sm:$0xff]   ;;  %v7841_v14 = vld [vmem:[%s12115_s1 + $0x300] ss:$16 sps:$4 sm:$0xff]  }
  0x22   :  { %4876 = vmatprep.mubr.bf16.mxu1 %v9322_v0  ;;  %v7844_v15 = vld [vmem:[%s12115_s1 + $0x4e4] ss:$16 sps:$4 sm:$0xff]   ;;  %v7842_v19 = vld [vmem:[%s12115_s1 + $0x4e0] ss:$16 sps:$4 sm:$0xff]   ;;  %v9391_v23 = vcombine.high %v9371_v17, %v9371_v17 }
  0x23   :  { %4820 = vmatpush2.bf16.msra.mxu0 %v7798_v34  ;;  %v7847_v16 = vld [vmem:[%s12115_s1 + $0x6e4] ss:$16 sps:$4 sm:$0xff]   ;;  %v7845_v20 = vld [vmem:[%s12115_s1 + $0x6e0] ss:$16 sps:$4 sm:$0xff]  }
  0x24   :  { %4861 = vmatpush2.bf16.msra.mxu1 %v7799_v35  ;;  %4821 = vmatprep.subr.bf16.mxu0 %v7800_v39  ;;  %v7850_v21 = vld [vmem:[%s12115_s1 + $0x4c4] ss:$16 sps:$4 sm:$0xff]   ;;  %v7848_v24 = vld [vmem:[%s12115_s1 + $0x4c0] ss:$16 sps:$4 sm:$0xff]  }
  0x25   :  { %4862 = vmatprep.subr.bf16.mxu1 %v7802_v40  ;;  %v7853_v22 = vld [vmem:[%s12115_s1 + $0x6c4] ss:$16 sps:$4 sm:$0xff]   ;;  %v7851_v25 = vld [vmem:[%s12115_s1 + $0x6c0] ss:$16 sps:$4 sm:$0xff]  }
  0x26   :  { %v7856_v26 = vld [vmem:[%s12115_s1 + $0x4a4] ss:$16 sps:$4 sm:$0xff]   ;;  %v7854_v28 = vld [vmem:[%s12115_s1 + $0x4a0] ss:$16 sps:$4 sm:$0xff]  }
  0x27   :  { %4822 = vmatpush2.bf16.msra.mxu0 %v7804_v41  ;;  %v7859_v27 = vld [vmem:[%s12115_s1 + $0x6a4] ss:$16 sps:$4 sm:$0xff]   ;;  %v7857_v29 = vld [vmem:[%s12115_s1 + $0x6a0] ss:$16 sps:$4 sm:$0xff]  }
  0x28   :  { %4863 = vmatpush2.bf16.msra.mxu1 %v7805_v44  ;;  %4823 = vmatprep.subr.bf16.mxu0 %v7806_v45  ;;  %v7862_v30 = vld [vmem:[%s12115_s1 + $0x484] ss:$16 sps:$4 sm:$0xff]   ;;  %v7860_v32 = vld [vmem:[%s12115_s1 + $0x480] ss:$16 sps:$4 sm:$0xff]  }
  0x29   :  { %4864 = vmatprep.subr.bf16.mxu1 %v7808_v46  ;;  %v7865_v31 = vld [vmem:[%s12115_s1 + $0x684] ss:$16 sps:$4 sm:$0xff]   ;;  %v7863_v33 = vld [vmem:[%s12115_s1 + $0x680] ss:$16 sps:$4 sm:$0xff]  }
  0x2a   :  { %v7868_v34 = vld [vmem:[%s12115_s1 + $0x464] ss:$16 sps:$4 sm:$0xff]   ;;  %v7866_v36 = vld [vmem:[%s12115_s1 + $0x460] ss:$16 sps:$4 sm:$0xff]  }
  0x2b   :  { %4824 = vmatpush2.bf16.msra.mxu0 %v7810_v47  ;;  %v7871_v35 = vld [vmem:[%s12115_s1 + $0x664] ss:$16 sps:$4 sm:$0xff]   ;;  %v7869_v37 = vld [vmem:[%s12115_s1 + $0x660] ss:$16 sps:$4 sm:$0xff]  }
  0x2c   :  { %4865 = vmatpush2.bf16.msra.mxu1 %v7811_v48  ;;  %4825 = vmatprep.subr.bf16.mxu0 %v7812_v50  ;;  %v7874_v38 = vld [vmem:[%s12115_s1 + $0x444] ss:$16 sps:$4 sm:$0xff]   ;;  %v7872_v40 = vld [vmem:[%s12115_s1 + $0x440] ss:$16 sps:$4 sm:$0xff]  }
  0x2d   :  { %4866 = vmatprep.subr.bf16.mxu1 %v7814_v51  ;;  %v7877_v39 = vld [vmem:[%s12115_s1 + $0x644] ss:$16 sps:$4 sm:$0xff]   ;;  %v7875_v41 = vld [vmem:[%s12115_s1 + $0x640] ss:$16 sps:$4 sm:$0xff]  }
  0x2e   :  { %v7880_v42 = vld [vmem:[%s12115_s1 + $0x424] ss:$16 sps:$4 sm:$0xff]   ;;  %v7878_v45 = vld [vmem:[%s12115_s1 + $0x420] ss:$16 sps:$4 sm:$0xff]  }
  0x2f   :  { %4826 = vmatpush2.bf16.msra.mxu0 %v7816_v53  ;;  %v7883_v44 = vld [vmem:[%s12115_s1 + $0x624] ss:$16 sps:$4 sm:$0xff]   ;;  %v7881_v46 = vld [vmem:[%s12115_s1 + $0x620] ss:$16 sps:$4 sm:$0xff]  }
  0x30   :  { %4867 = vmatpush2.bf16.msra.mxu1 %v7817_v55  ;;  %4827 = vmatprep.subr.bf16.mxu0 %v7818_v56  ;;  %v7886_v47 = vld [vmem:[%s12115_s1 + $0x404] ss:$16 sps:$4 sm:$0xff]   ;;  %v7884_v50 = vld [vmem:[%s12115_s1 + $0x400] ss:$16 sps:$4 sm:$0xff]  }
  0x31   :  { %4868 = vmatprep.subr.bf16.mxu1 %v7820_v57  ;;  %v7889_v48 = vld [vmem:[%s12115_s1 + $0x604] ss:$16 sps:$4 sm:$0xff]   ;;  %v7887_v51 = vld [vmem:[%s12115_s1 + $0x600] ss:$16 sps:$4 sm:$0xff]  }
  0x32   :  { %v7892_v52 = vld [vmem:[%s12115_s1 + $0x5e4] ss:$16 sps:$4 sm:$0xff]   ;;  %v7890_v54 = vld [vmem:[%s12115_s1 + $0x5e0] ss:$16 sps:$4 sm:$0xff]  }
  0x33   :  { %4828 = vmatpush2.bf16.msra.mxu0 %v7822_v59  ;;  %v7895_v53 = vld [vmem:[%s12115_s1 + $0x7e4] ss:$16 sps:$4 sm:$0xff]   ;;  %v7893_v55 = vld [vmem:[%s12115_s1 + $0x7e0] ss:$16 sps:$4 sm:$0xff]  }
  0x34   :  { %4869 = vmatpush2.bf16.msra.mxu1 %v7823_v61  ;;  %4829 = vmatprep.subr.bf16.mxu0 %v7824_v62  ;;  %v7898_v56 = vld [vmem:[%s12115_s1 + $0x5c4] ss:$16 sps:$4 sm:$0xff]   ;;  %v7896_v58 = vld [vmem:[%s12115_s1 + $0x5c0] ss:$16 sps:$4 sm:$0xff]  }
  0x35   :  { %4870 = vmatprep.subr.bf16.mxu1 %v7826_v63  ;;  %v7901_v57 = vld [vmem:[%s12115_s1 + $0x7c4] ss:$16 sps:$4 sm:$0xff]   ;;  %v7899_v59 = vld [vmem:[%s12115_s1 + $0x7c0] ss:$16 sps:$4 sm:$0xff]  }
  0x36   :  { %v7904_v61 = vld [vmem:[%s12115_s1 + $0x5a4] ss:$16 sps:$4 sm:$0xff]   ;;  %v7902_v63 = vld [vmem:[%s12115_s1 + $0x5a0] ss:$16 sps:$4 sm:$0xff]  }
  0x37   :  { %4830 = vmatpush2.bf16.msra.mxu0 %v7828_v2  ;;  %v7907_v62 = vld [vmem:[%s12115_s1 + $0x7a4] ss:$16 sps:$4 sm:$0xff]   ;;  %v7905_v1 = vld [vmem:[%s12115_s1 + $0x7a0] ss:$16 sps:$4 sm:$0xff]  }
  0x38   :  { %4871 = vmatpush2.bf16.msra.mxu1 %v7829_v3  ;;  %4831 = vmatprep.subr.bf16.mxu0 %v7830_v4  ;;  %v7910_v2 = vld [vmem:[%s12115_s1 + $0x584] ss:$16 sps:$4 sm:$0xff]   ;;  %v7908_v4 = vld [vmem:[%s12115_s1 + $0x580] ss:$16 sps:$4 sm:$0xff]  }
  0x39   :  { %4872 = vmatprep.subr.bf16.mxu1 %v7832_v5  ;;  %v7913_v3 = vld [vmem:[%s12115_s1 + $0x784] ss:$16 sps:$4 sm:$0xff]   ;;  %v7911_v5 = vld [vmem:[%s12115_s1 + $0x780] ss:$16 sps:$4 sm:$0xff]  }
  0x3a   :  { %v7922_v11 = vld [vmem:[%s12115_s1 + $0x544] ss:$16 sps:$4 sm:$0xff]  }
  0x3b   :  { %4832 = vmatpush2.bf16.msra.mxu0 %v7834_v7  ;;  %v7916_v7 = vld [vmem:[%s12115_s1 + $0x564] ss:$16 sps:$4 sm:$0xff]  }
  0x3c   :  { %4873 = vmatpush2.bf16.msra.mxu1 %v7835_v8  ;;  %4833 = vmatprep.subr.bf16.mxu0 %v7836_v9  ;;  %v7919_v8 = vld [vmem:[%s12115_s1 + $0x764] ss:$16 sps:$4 sm:$0xff]   ;;  %v7914_v9 = vld [vmem:[%s12115_s1 + $0x560] ss:$16 sps:$4 sm:$0xff]  }
  0x3d   :  { %4874 = vmatprep.subr.bf16.mxu1 %v7838_v10  ;;  %v7917_v10 = vld [vmem:[%s12115_s1 + $0x760] ss:$16 sps:$4 sm:$0xff]  }
  0x3f   :  { %4834 = vmatpush2.bf16.msra.mxu0 %v7840_v12  ;;  %v7925_v12 = vld [vmem:[%s12115_s1 + $0x744] ss:$16 sps:$4 sm:$0xff]  }
  0x40   :  { %4875 = vmatpush2.bf16.msra.mxu1 %v7841_v14  ;;  %4885 = vmatprep.subr.bf16.mxu0 %v7844_v15  ;;  %v7920_v14 = vld [vmem:[%s12115_s1 + $0x540] ss:$16 sps:$4 sm:$0xff]  }
  0x41   :  { %4926 = vmatprep.subr.bf16.mxu1 %v7847_v16  ;;  %v7923_v15 = vld [vmem:[%s12115_s1 + $0x740] ss:$16 sps:$4 sm:$0xff]   ;;  %v7928_v16 = vld [vmem:[%s12115_s1 + $0x524] ss:$16 sps:$4 sm:$0xff]  }
  0x42   :  { %4836 = vmatmul.mubr.bf16.vlgmr.msra.gmra.mxu0 %v9359_v13 }
  0x43   :  { %4877 = vmatmul.mubr.bf16.vlgmr.msra.gmra.mxu1 %v9375_v18  ;;  %4886 = vmatpush1.bf16.msra.mxu0 %v7842_v19  ;;  %v7931_v19 = vld [vmem:[%s12115_s1 + $0x724] ss:$16 sps:$4 sm:$0xff]  }
  0x44   :  { %4927 = vmatpush1.bf16.msra.mxu1 %v7845_v20  ;;  %4887 = vmatprep.subr.bf16.mxu0 %v7850_v21  ;;  %v7926_v20 = vld [vmem:[%s12115_s1 + $0x520] ss:$16 sps:$4 sm:$0xff]  }
  0x45   :  { %4928 = vmatprep.subr.bf16.mxu1 %v7853_v22  ;;  %4917 = vmatprep.mubr.bf16.mxu0 %v9371_v17  ;;  %v7929_v21 = vld [vmem:[%s12115_s1 + $0x720] ss:$16 sps:$4 sm:$0xff]   ;;  %v7934_v22 = vld [vmem:[%s12115_s1 + $0x504] ss:$16 sps:$4 sm:$0xff]  }
  0x46   :  { %4958 = vmatprep.mubr.bf16.mxu1 %v9391_v23 }
  0x47   :  { %4888 = vmatpush1.bf16.msra.mxu0 %v7848_v24  ;;  %v7937_v24 = vld [vmem:[%s12115_s1 + $0x704] ss:$16 sps:$4 sm:$0xff]  }
  0x48   :  { %4929 = vmatpush1.bf16.msra.mxu1 %v7851_v25  ;;  %4889 = vmatprep.subr.bf16.mxu0 %v7856_v26  ;;  %v7932_v25 = vld [vmem:[%s12115_s1 + $0x500] ss:$16 sps:$4 sm:$0xff]   ;;  %v9570_v26 = vrot.slane %v9339_v6, %v9281_v49 }
  0x49   :  { %4930 = vmatprep.subr.bf16.mxu1 %v7859_v27  ;;  %v7935_v27 = vld [vmem:[%s12115_s1 + $0x700] ss:$16 sps:$4 sm:$0xff]  }
  0x4a   :  { %v9583_v6 = vcombine.high %v9570_v26, %v9570_v26 }
  0x4b   :  { %4890 = vmatpush1.bf16.msra.mxu0 %v7854_v28  ;;  %v7941_v28 = vld [vmem:[%s12115_s1 + $0x8e4] ss:$16 sps:$4 sm:$0xff]  }
  0x4c   :  { %4931 = vmatpush1.bf16.msra.mxu1 %v7857_v29  ;;  %4891 = vmatprep.subr.bf16.mxu0 %v7862_v30  ;;  %v7944_v29 = vld [vmem:[%s12115_s1 + $0xae4] ss:$16 sps:$4 sm:$0xff]   ;;  %v7939_v30 = vld [vmem:[%s12115_s1 + $0x8e0] ss:$16 sps:$4 sm:$0xff]  }
  0x4d   :  { %4932 = vmatprep.subr.bf16.mxu1 %v7865_v31  ;;  %v7942_v31 = vld [vmem:[%s12115_s1 + $0xae0] ss:$16 sps:$4 sm:$0xff]  }
  0x4f   :  { %4892 = vmatpush1.bf16.msra.mxu0 %v7860_v32  ;;  %v9594_v32 = vld [vmem:[%s12114_s0 + $0x8] sm:$0xff] }
  0x50   :  { %4933 = vmatpush1.bf16.msra.mxu1 %v7863_v33  ;;  %4893 = vmatprep.subr.bf16.mxu0 %v7868_v34  ;;  %v7947_v33 = vld [vmem:[%s12115_s1 + $0x8c4] ss:$16 sps:$4 sm:$0xff]  }
  0x51   :  { %4934 = vmatprep.subr.bf16.mxu1 %v7871_v35  ;;  %v7950_v34 = vld [vmem:[%s12115_s1 + $0xac4] ss:$16 sps:$4 sm:$0xff]   ;;  %v9604_v35 = vrot.slane %v9594_v32, %v9281_v49 }
  0x53   :  { %4894 = vmatpush1.bf16.msra.mxu0 %v7866_v36  ;;  %v856_v36 = vcombine.high %v9604_v35, %v9604_v35 }
  0x54   :  { %4935 = vmatpush1.bf16.msra.mxu1 %v7869_v37  ;;  %4895 = vmatprep.subr.bf16.mxu0 %v7874_v38  ;;  %v7945_v37 = vld [vmem:[%s12115_s1 + $0x8c0] ss:$16 sps:$4 sm:$0xff]  }
  0x55   :  { %4936 = vmatprep.subr.bf16.mxu1 %v7877_v39  ;;  %v7948_v38 = vld [vmem:[%s12115_s1 + $0xac0] ss:$16 sps:$4 sm:$0xff]   ;;  %v7953_v39 = vld [vmem:[%s12115_s1 + $0x8a4] ss:$16 sps:$4 sm:$0xff]  }
  0x57   :  { %4896 = vmatpush1.bf16.msra.mxu0 %v7872_v40  ;;  %v7956_v40 = vld [vmem:[%s12115_s1 + $0xaa4] ss:$16 sps:$4 sm:$0xff]  }
  0x58   :  { %4937 = vmatpush1.bf16.msra.mxu1 %v7875_v41  ;;  %4897 = vmatprep.subr.bf16.mxu0 %v7880_v42  ;;  %v9623_v41 = vrot.slane %v856_v36, %v9281_v49  ;;  %v8017_v36 = vld [vmem:[%s12115_s1 + $0x940] ss:$16 sps:$4 sm:$0xff]  }
  0x59   :  { %4938 = vmatprep.subr.bf16.mxu1 %v7883_v44  ;;  %v7951_v44 = vld [vmem:[%s12115_s1 + $0x8a0] ss:$16 sps:$4 sm:$0xff]  }
  0x5a   :  { %v9628_v42 = vcombine.high %v9623_v41, %v9623_v41 }
  0x5b   :  { %4898 = vmatpush1.bf16.msra.mxu0 %v7878_v45  ;;  %v7954_v45 = vld [vmem:[%s12115_s1 + $0xaa0] ss:$16 sps:$4 sm:$0xff]  }
  0x5c   :  { %4939 = vmatpush1.bf16.msra.mxu1 %v7881_v46  ;;  %4899 = vmatprep.subr.bf16.mxu0 %v7886_v47  ;;  %v7959_v46 = vld [vmem:[%s12115_s1 + $0x884] ss:$16 sps:$4 sm:$0xff]  }
  0x5d   :  { %4940 = vmatprep.subr.bf16.mxu1 %v7889_v48  ;;  %v7962_v47 = vld [vmem:[%s12115_s1 + $0xa84] ss:$16 sps:$4 sm:$0xff]   ;;  %v7957_v48 = vld [vmem:[%s12115_s1 + $0x880] ss:$16 sps:$4 sm:$0xff]  }
  0x5f   :  { %4900 = vmatpush1.bf16.msra.mxu0 %v7884_v50  ;;  %v7960_v50 = vld [vmem:[%s12115_s1 + $0xa80] ss:$16 sps:$4 sm:$0xff]  }
  0x60   :  { %4941 = vmatpush1.bf16.msra.mxu1 %v7887_v51  ;;  %4901 = vmatprep.subr.bf16.mxu0 %v7892_v52  ;;  %v7965_v51 = vld [vmem:[%s12115_s1 + $0x864] ss:$16 sps:$4 sm:$0xff]  }
  0x61   :  { %4942 = vmatprep.subr.bf16.mxu1 %v7895_v53  ;;  %v7968_v52 = vld [vmem:[%s12115_s1 + $0xa64] ss:$16 sps:$4 sm:$0xff]   ;;  %v7963_v53 = vld [vmem:[%s12115_s1 + $0x860] ss:$16 sps:$4 sm:$0xff]  }
  0x63   :  { %4902 = vmatpush2.bf16.msra.mxu0 %v7890_v54  ;;  %v7966_v54 = vld [vmem:[%s12115_s1 + $0xa60] ss:$16 sps:$4 sm:$0xff]  }
  0x64   :  { %4943 = vmatpush2.bf16.msra.mxu1 %v7893_v55  ;;  %4903 = vmatprep.subr.bf16.mxu0 %v7898_v56  ;;  %v7971_v55 = vld [vmem:[%s12115_s1 + $0x844] ss:$16 sps:$4 sm:$0xff]  }
  0x65   :  { %4944 = vmatprep.subr.bf16.mxu1 %v7901_v57  ;;  %v7974_v56 = vld [vmem:[%s12115_s1 + $0xa44] ss:$16 sps:$4 sm:$0xff]   ;;  %v7969_v57 = vld [vmem:[%s12115_s1 + $0x840] ss:$16 sps:$4 sm:$0xff]  }
  0x67   :  { %4904 = vmatpush2.bf16.msra.mxu0 %v7896_v58  ;;  %v7972_v58 = vld [vmem:[%s12115_s1 + $0xa40] ss:$16 sps:$4 sm:$0xff]  }
  0x68   :  { %4945 = vmatpush2.bf16.msra.mxu1 %v7899_v59  ;;  %4905 = vmatprep.subr.bf16.mxu0 %v7904_v61  ;;  %v7977_v59 = vld [vmem:[%s12115_s1 + $0x824] ss:$16 sps:$4 sm:$0xff]  }
  0x69   :  { %4946 = vmatprep.subr.bf16.mxu1 %v7907_v62  ;;  %v7980_v61 = vld [vmem:[%s12115_s1 + $0xa24] ss:$16 sps:$4 sm:$0xff]   ;;  %v7975_v62 = vld [vmem:[%s12115_s1 + $0x820] ss:$16 sps:$4 sm:$0xff]  }
  0x6b   :  { %4906 = vmatpush2.bf16.msra.mxu0 %v7902_v63  ;;  %v7978_v63 = vld [vmem:[%s12115_s1 + $0xa20] ss:$16 sps:$4 sm:$0xff]  }
  0x6c   :  { %4947 = vmatpush2.bf16.msra.mxu1 %v7905_v1  ;;  %4907 = vmatprep.subr.bf16.mxu0 %v7910_v2  ;;  %v7983_v1 = vld [vmem:[%s12115_s1 + $0x804] ss:$16 sps:$4 sm:$0xff]  }
  0x6d   :  { %4948 = vmatprep.subr.bf16.mxu1 %v7913_v3  ;;  %v7986_v2 = vld [vmem:[%s12115_s1 + $0xa04] ss:$16 sps:$4 sm:$0xff]   ;;  %v7981_v3 = vld [vmem:[%s12115_s1 + $0x800] ss:$16 sps:$4 sm:$0xff]  }
  0x6f   :  { %4908 = vmatpush2.bf16.msra.mxu0 %v7908_v4  ;;  %v7984_v4 = vld [vmem:[%s12115_s1 + $0xa00] ss:$16 sps:$4 sm:$0xff]  }
  0x70   :  { %4949 = vmatpush2.bf16.msra.mxu1 %v7911_v5  ;;  %4909 = vmatprep.subr.bf16.mxu0 %v7916_v7  ;;  %v7989_v5 = vld [vmem:[%s12115_s1 + $0x9e4] ss:$16 sps:$4 sm:$0xff]  }
  0x71   :  { %4950 = vmatprep.subr.bf16.mxu1 %v7919_v8  ;;  %v7992_v7 = vld [vmem:[%s12115_s1 + $0xbe4] ss:$16 sps:$4 sm:$0xff]   ;;  %v7987_v8 = vld [vmem:[%s12115_s1 + $0x9e0] ss:$16 sps:$4 sm:$0xff]  }
  0x73   :  { %4910 = vmatpush2.bf16.msra.mxu0 %v7914_v9  ;;  %v7990_v9 = vld [vmem:[%s12115_s1 + $0xbe0] ss:$16 sps:$4 sm:$0xff]  }
  0x74   :  { %4951 = vmatpush2.bf16.msra.mxu1 %v7917_v10  ;;  %4911 = vmatprep.subr.bf16.mxu0 %v7922_v11  ;;  %v7995_v10 = vld [vmem:[%s12115_s1 + $0x9c4] ss:$16 sps:$4 sm:$0xff]  }
  0x75   :  { %4952 = vmatprep.subr.bf16.mxu1 %v7925_v12  ;;  %v7998_v11 = vld [vmem:[%s12115_s1 + $0xbc4] ss:$16 sps:$4 sm:$0xff]   ;;  %v7993_v12 = vld [vmem:[%s12115_s1 + $0x9c0] ss:$16 sps:$4 sm:$0xff]  }
  0x77   :  { %4912 = vmatpush2.bf16.msra.mxu0 %v7920_v14  ;;  %v7996_v14 = vld [vmem:[%s12115_s1 + $0xbc0] ss:$16 sps:$4 sm:$0xff]  }
  0x78   :  { %4953 = vmatpush2.bf16.msra.mxu1 %v7923_v15  ;;  %4913 = vmatprep.subr.bf16.mxu0 %v7928_v16  ;;  %v8001_v15 = vld [vmem:[%s12115_s1 + $0x9a4] ss:$16 sps:$4 sm:$0xff]  }
  0x79   :  { %4954 = vmatprep.subr.bf16.mxu1 %v7931_v19  ;;  %v8004_v16 = vld [vmem:[%s12115_s1 + $0xba4] ss:$16 sps:$4 sm:$0xff]   ;;  %v7999_v19 = vld [vmem:[%s12115_s1 + $0x9a0] ss:$16 sps:$4 sm:$0xff]  }
  0x7b   :  { %4914 = vmatpush2.bf16.msra.mxu0 %v7926_v20  ;;  %v8002_v20 = vld [vmem:[%s12115_s1 + $0xba0] ss:$16 sps:$4 sm:$0xff]  }
  0x7c   :  { %4955 = vmatpush2.bf16.msra.mxu1 %v7929_v21  ;;  %4915 = vmatprep.subr.bf16.mxu0 %v7934_v22  ;;  %v8007_v21 = vld [vmem:[%s12115_s1 + $0x984] ss:$16 sps:$4 sm:$0xff]  }
  0x7d   :  { %4956 = vmatprep.subr.bf16.mxu1 %v7937_v24  ;;  %v8010_v22 = vld [vmem:[%s12115_s1 + $0xb84] ss:$16 sps:$4 sm:$0xff]   ;;  %v8005_v24 = vld [vmem:[%s12115_s1 + $0x980] ss:$16 sps:$4 sm:$0xff]  }
  0x7f   :  { %4916 = vmatpush2.bf16.msra.mxu0 %v7932_v25  ;;  %v8008_v25 = vld [vmem:[%s12115_s1 + $0xb80] ss:$16 sps:$4 sm:$0xff]  }
  0x80   :  { %4957 = vmatpush2.bf16.msra.mxu1 %v7935_v27  ;;  %4967 = vmatprep.subr.bf16.mxu0 %v7941_v28  ;;  %v8013_v27 = vld [vmem:[%s12115_s1 + $0x964] ss:$16 sps:$4 sm:$0xff]  }
  0x81   :  { %5008 = vmatprep.subr.bf16.mxu1 %v7944_v29  ;;  %v8016_v28 = vld [vmem:[%s12115_s1 + $0xb64] ss:$16 sps:$4 sm:$0xff]   ;;  %v8011_v29 = vld [vmem:[%s12115_s1 + $0x960] ss:$16 sps:$4 sm:$0xff]  }
  0x82   :  { %4918 = vmatmul.mubr.bf16.vlgmr.msra.gmra.mxu0 %v9570_v26 }
  0x83   :  { %4959 = vmatmul.mubr.bf16.vlgmr.msra.gmra.mxu1 %v9583_v6  ;;  %4968 = vmatpush1.bf16.msra.mxu0 %v7939_v30  ;;  %v8014_v30 = vld [vmem:[%s12115_s1 + $0xb60] ss:$16 sps:$4 sm:$0xff]  }
  0x84   :  { %5009 = vmatpush1.bf16.msra.mxu1 %v7942_v31  ;;  %4969 = vmatprep.subr.bf16.mxu0 %v7947_v33  ;;  %v8019_v31 = vld [vmem:[%s12115_s1 + $0x944] ss:$16 sps:$4 sm:$0xff]  }
  0x85   :  { %5010 = vmatprep.subr.bf16.mxu1 %v7950_v34  ;;  %4999 = vmatprep.mubr.bf16.mxu0 %v9623_v41  ;;  %v8022_v33 = vld [vmem:[%s12115_s1 + $0xb44] ss:$16 sps:$4 sm:$0xff]   ;;  %v841_v34 = vcombine.high %v9594_v32, %v9594_v32 }
  0x86   :  { %5040 = vmatprep.mubr.bf16.mxu1 %v9628_v42  ;;  %v8028_v32 = vld [vmem:[%s12115_s1 + $0xb24] ss:$16 sps:$4 sm:$0xff]  }
  0x87   :  { %4970 = vmatpush1.bf16.msra.mxu0 %v7945_v37  ;;  %v8020_v37 = vld [vmem:[%s12115_s1 + $0xb40] ss:$16 sps:$4 sm:$0xff]  }
  0x88   :  { %5011 = vmatpush1.bf16.msra.mxu1 %v7948_v38  ;;  %4971 = vmatprep.subr.bf16.mxu0 %v7953_v39  ;;  %v8025_v38 = vld [vmem:[%s12115_s1 + $0x924] ss:$16 sps:$4 sm:$0xff]   ;;  %v9778_v39 = vrot.slane %v841_v34, %v9281_v49  ;;  %v8086_v34 = vld [vmem:[%s12115_s1 + $0xfe0] ss:$16 sps:$4 sm:$0xff]  }
  0x89   :  { %5012 = vmatprep.subr.bf16.mxu1 %v7956_v40  ;;  %v8023_v40 = vld [vmem:[%s12115_s1 + $0x920] ss:$16 sps:$4 sm:$0xff]  }
  0x8b   :  { %4972 = vmatpush1.bf16.msra.mxu0 %v7951_v44  ;;  %v8026_v44 = vld [vmem:[%s12115_s1 + $0xb20] ss:$16 sps:$4 sm:$0xff]  }
  0x8c   :  { %5013 = vmatpush1.bf16.msra.mxu1 %v7954_v45  ;;  %4973 = vmatprep.subr.bf16.mxu0 %v7959_v46  ;;  %v8031_v45 = vld [vmem:[%s12115_s1 + $0x904] ss:$16 sps:$4 sm:$0xff]  }
  0x8d   :  { %5014 = vmatprep.subr.bf16.mxu1 %v7962_v47  ;;  %v8034_v46 = vld [vmem:[%s12115_s1 + $0xb04] ss:$16 sps:$4 sm:$0xff]   ;;  %v857_v47 = vcombine.high %v9778_v39, %v9778_v39 }
  0x8f   :  { %4974 = vmatpush1.bf16.msra.mxu0 %v7957_v48  ;;  %v9796_v48 = vrot.slane %v9604_v35, %v9281_v49  ;;  %v8040_v35 = vld [vmem:[%s12115_s1 + $0xee4] ss:$16 sps:$4 sm:$0xff]  }
  0x90   :  { %5015 = vmatpush1.bf16.msra.mxu1 %v7960_v50  ;;  %4975 = vmatprep.subr.bf16.mxu0 %v7965_v51  ;;  %v8029_v50 = vld [vmem:[%s12115_s1 + $0x900] ss:$16 sps:$4 sm:$0xff]  }
  0x91   :  { %5016 = vmatprep.subr.bf16.mxu1 %v7968_v52  ;;  %v8032_v51 = vld [vmem:[%s12115_s1 + $0xb00] ss:$16 sps:$4 sm:$0xff]   ;;  %v8037_v52 = vld [vmem:[%s12115_s1 + $0xce4] ss:$16 sps:$4 sm:$0xff]  }
  0x93   :  { %4976 = vmatpush1.bf16.msra.mxu0 %v7963_v53  ;;  %v9811_v53 = vrot.slane %v857_v47, %v9281_v49  ;;  %v8103_v47 = vld [vmem:[%s12115_s1 + $0xd84] ss:$16 sps:$4 sm:$0xff]  }
  0x94   :  { %5017 = vmatpush1.bf16.msra.mxu1 %v7966_v54  ;;  %4977 = vmatprep.subr.bf16.mxu0 %v7971_v55  ;;  %v9815_v54 = vcombine.high %v9796_v48, %v9796_v48  ;;  %v8035_v55 = vld [vmem:[%s12115_s1 + $0xce0] ss:$16 sps:$4 sm:$0xff]  }
  0x95   :  { %5018 = vmatprep.subr.bf16.mxu1 %v7974_v56  ;;  %v8038_v56 = vld [vmem:[%s12115_s1 + $0xee0] ss:$16 sps:$4 sm:$0xff]  }
  0x97   :  { %4978 = vmatpush1.bf16.msra.mxu0 %v7969_v57  ;;  %v8043_v57 = vld [vmem:[%s12115_s1 + $0xcc4] ss:$16 sps:$4 sm:$0xff]  }
  0x98   :  { %5019 = vmatpush1.bf16.msra.mxu1 %v7972_v58  ;;  %4979 = vmatprep.subr.bf16.mxu0 %v7977_v59  ;;  %v8046_v58 = vld [vmem:[%s12115_s1 + $0xec4] ss:$16 sps:$4 sm:$0xff]   ;;  %v9831_v59 = vcombine.high %v9811_v53, %v9811_v53 }
  0x99   :  { %5020 = vmatprep.subr.bf16.mxu1 %v7980_v61  ;;  %v8041_v61 = vld [vmem:[%s12115_s1 + $0xcc0] ss:$16 sps:$4 sm:$0xff]  }
  0x9b   :  { %4980 = vmatpush1.bf16.msra.mxu0 %v7975_v62  ;;  %v8044_v62 = vld [vmem:[%s12115_s1 + $0xec0] ss:$16 sps:$4 sm:$0xff]  }
  0x9c   :  { %5021 = vmatpush1.bf16.msra.mxu1 %v7978_v63  ;;  %4981 = vmatprep.subr.bf16.mxu0 %v7983_v1  ;;  %v8049_v63 = vld [vmem:[%s12115_s1 + $0xca4] ss:$16 sps:$4 sm:$0xff]  }
  0x9d   :  { %5022 = vmatprep.subr.bf16.mxu1 %v7986_v2  ;;  %v8052_v1 = vld [vmem:[%s12115_s1 + $0xea4] ss:$16 sps:$4 sm:$0xff]   ;;  %v8047_v2 = vld [vmem:[%s12115_s1 + $0xca0] ss:$16 sps:$4 sm:$0xff]  }
  0x9f   :  { %4982 = vmatpush1.bf16.msra.mxu0 %v7981_v3  ;;  %v8050_v3 = vld [vmem:[%s12115_s1 + $0xea0] ss:$16 sps:$4 sm:$0xff]  }
  0xa0   :  { %5023 = vmatpush1.bf16.msra.mxu1 %v7984_v4  ;;  %4983 = vmatprep.subr.bf16.mxu0 %v7989_v5  ;;  %v8055_v4 = vld [vmem:[%s12115_s1 + $0xc84] ss:$16 sps:$4 sm:$0xff]  }
  0xa1   :  { %5024 = vmatprep.subr.bf16.mxu1 %v7992_v7  ;;  %v8058_v5 = vld [vmem:[%s12115_s1 + $0xe84] ss:$16 sps:$4 sm:$0xff]   ;;  %v8053_v7 = vld [vmem:[%s12115_s1 + $0xc80] ss:$16 sps:$4 sm:$0xff]  }
  0xa3   :  { %4984 = vmatpush2.bf16.msra.mxu0 %v7987_v8  ;;  %v8056_v8 = vld [vmem:[%s12115_s1 + $0xe80] ss:$16 sps:$4 sm:$0xff]  }
  0xa4   :  { %5025 = vmatpush2.bf16.msra.mxu1 %v7990_v9  ;;  %4985 = vmatprep.subr.bf16.mxu0 %v7995_v10  ;;  %v8061_v9 = vld [vmem:[%s12115_s1 + $0xc64] ss:$16 sps:$4 sm:$0xff]  }
  0xa5   :  { %5026 = vmatprep.subr.bf16.mxu1 %v7998_v11  ;;  %v8064_v10 = vld [vmem:[%s12115_s1 + $0xe64] ss:$16 sps:$4 sm:$0xff]   ;;  %v8059_v11 = vld [vmem:[%s12115_s1 + $0xc60] ss:$16 sps:$4 sm:$0xff]  }
  0xa7   :  { %4986 = vmatpush2.bf16.msra.mxu0 %v7993_v12  ;;  %v8062_v12 = vld [vmem:[%s12115_s1 + $0xe60] ss:$16 sps:$4 sm:$0xff]  }
  0xa8   :  { %5027 = vmatpush2.bf16.msra.mxu1 %v7996_v14  ;;  %4987 = vmatprep.subr.bf16.mxu0 %v8001_v15  ;;  %v8067_v14 = vld [vmem:[%s12115_s1 + $0xc44] ss:$16 sps:$4 sm:$0xff]  }
  0xa9   :  { %5028 = vmatprep.subr.bf16.mxu1 %v8004_v16  ;;  %v8070_v15 = vld [vmem:[%s12115_s1 + $0xe44] ss:$16 sps:$4 sm:$0xff]   ;;  %v8065_v16 = vld [vmem:[%s12115_s1 + $0xc40] ss:$16 sps:$4 sm:$0xff]  }
  0xab   :  { %4988 = vmatpush2.bf16.msra.mxu0 %v7999_v19  ;;  %v8068_v19 = vld [vmem:[%s12115_s1 + $0xe40] ss:$16 sps:$4 sm:$0xff]  }
  0xac   :  { %5029 = vmatpush2.bf16.msra.mxu1 %v8002_v20  ;;  %4989 = vmatprep.subr.bf16.mxu0 %v8007_v21  ;;  %v8073_v20 = vld [vmem:[%s12115_s1 + $0xc24] ss:$16 sps:$4 sm:$0xff]  }
  0xad   :  { %5030 = vmatprep.subr.bf16.mxu1 %v8010_v22  ;;  %v8076_v21 = vld [vmem:[%s12115_s1 + $0xe24] ss:$16 sps:$4 sm:$0xff]   ;;  %v8071_v22 = vld [vmem:[%s12115_s1 + $0xc20] ss:$16 sps:$4 sm:$0xff]  }
  0xaf   :  { %4990 = vmatpush2.bf16.msra.mxu0 %v8005_v24  ;;  %v8074_v24 = vld [vmem:[%s12115_s1 + $0xe20] ss:$16 sps:$4 sm:$0xff]  }
  0xb0   :  { %5031 = vmatpush2.bf16.msra.mxu1 %v8008_v25  ;;  %4991 = vmatprep.subr.bf16.mxu0 %v8013_v27  ;;  %v8079_v25 = vld [vmem:[%s12115_s1 + $0xc04] ss:$16 sps:$4 sm:$0xff]  }
  0xb1   :  { %5032 = vmatprep.subr.bf16.mxu1 %v8016_v28  ;;  %v8082_v27 = vld [vmem:[%s12115_s1 + $0xe04] ss:$16 sps:$4 sm:$0xff]   ;;  %v8077_v28 = vld [vmem:[%s12115_s1 + $0xc00] ss:$16 sps:$4 sm:$0xff]  }
  0xb3   :  { %4992 = vmatpush2.bf16.msra.mxu0 %v8011_v29  ;;  %v8080_v29 = vld [vmem:[%s12115_s1 + $0xe00] ss:$16 sps:$4 sm:$0xff]  }
  0xb4   :  { %5033 = vmatpush2.bf16.msra.mxu1 %v8014_v30  ;;  %4993 = vmatprep.subr.bf16.mxu0 %v8019_v31  ;;  %v8085_v30 = vld [vmem:[%s12115_s1 + $0xde4] ss:$16 sps:$4 sm:$0xff]  }
  0xb5   :  { %5034 = vmatprep.subr.bf16.mxu1 %v8022_v33  ;;  %v8088_v31 = vld [vmem:[%s12115_s1 + $0xfe4] ss:$16 sps:$4 sm:$0xff]   ;;  %v8083_v33 = vld [vmem:[%s12115_s1 + $0xde0] ss:$16 sps:$4 sm:$0xff]  }
  0xb7   :  { %4994 = vmatpush2.bf16.msra.mxu0 %v8017_v36  ;;  %v8091_v36 = vld [vmem:[%s12115_s1 + $0xdc4] ss:$16 sps:$4 sm:$0xff]  }
  0xb8   :  { %5035 = vmatpush2.bf16.msra.mxu1 %v8020_v37  ;;  %4995 = vmatprep.subr.bf16.mxu0 %v8025_v38  ;;  %v8094_v37 = vld [vmem:[%s12115_s1 + $0xfc4] ss:$16 sps:$4 sm:$0xff]   ;;  %v8089_v38 = vld [vmem:[%s12115_s1 + $0xdc0] ss:$16 sps:$4 sm:$0xff]  }
  0xb9   :  { %5036 = vmatprep.subr.bf16.mxu1 %v8028_v32  ;;  %v8092_v32 = vld [vmem:[%s12115_s1 + $0xfc0] ss:$16 sps:$4 sm:$0xff]  }
  0xbb   :  { %4996 = vmatpush2.bf16.msra.mxu0 %v8023_v40  ;;  %v8097_v40 = vld [vmem:[%s12115_s1 + $0xda4] ss:$16 sps:$4 sm:$0xff]  }
  0xbc   :  { %5037 = vmatpush2.bf16.msra.mxu1 %v8026_v44  ;;  %4997 = vmatprep.subr.bf16.mxu0 %v8031_v45  ;;  %v8100_v44 = vld [vmem:[%s12115_s1 + $0xfa4] ss:$16 sps:$4 sm:$0xff]   ;;  %v8095_v45 = vld [vmem:[%s12115_s1 + $0xda0] ss:$16 sps:$4 sm:$0xff]  }
  0xbd   :  { %5038 = vmatprep.subr.bf16.mxu1 %v8034_v46  ;;  %v8098_v46 = vld [vmem:[%s12115_s1 + $0xfa0] ss:$16 sps:$4 sm:$0xff]  }
  0xbf   :  { %4998 = vmatpush2.bf16.msra.mxu0 %v8029_v50  ;;  %v8106_v50 = vld [vmem:[%s12115_s1 + $0xf84] ss:$16 sps:$4 sm:$0xff]  }
  0xc0   :  { %5039 = vmatpush2.bf16.msra.mxu1 %v8032_v51  ;;  %5049 = vmatprep.subr.bf16.mxu0 %v8037_v52  ;;  %v8101_v51 = vld [vmem:[%s12115_s1 + $0xd80] ss:$16 sps:$4 sm:$0xff]  }
  0xc1   :  { %5090 = vmatprep.subr.bf16.mxu1 %v8040_v35  ;;  %v8104_v52 = vld [vmem:[%s12115_s1 + $0xf80] ss:$16 sps:$4 sm:$0xff]   ;;  %v8109_v35 = vld [vmem:[%s12115_s1 + $0xd64] ss:$16 sps:$4 sm:$0xff]  }
  0xc2   :  { %5000 = vmatmul.mubr.bf16.vlgmr.msra.gmra.mxu0 %v9796_v48 }
  0xc3   :  { %5041 = vmatmul.mubr.bf16.vlgmr.msra.gmra.mxu1 %v9815_v54  ;;  %5050 = vmatpush1.bf16.msra.mxu0 %v8035_v55  ;;  %v8112_v55 = vld [vmem:[%s12115_s1 + $0xf64] ss:$16 sps:$4 sm:$0xff]  }
  0xc4   :  { %5091 = vmatpush1.bf16.msra.mxu1 %v8038_v56  ;;  %5051 = vmatprep.subr.bf16.mxu0 %v8043_v57  ;;  %v8107_v56 = vld [vmem:[%s12115_s1 + $0xd60] ss:$16 sps:$4 sm:$0xff]  }
  0xc5   :  { %5092 = vmatprep.subr.bf16.mxu1 %v8046_v58  ;;  %5081 = vmatprep.mubr.bf16.mxu0 %v9811_v53  ;;  %v8110_v57 = vld [vmem:[%s12115_s1 + $0xf60] ss:$16 sps:$4 sm:$0xff]   ;;  %v8115_v58 = vld [vmem:[%s12115_s1 + $0xd44] ss:$16 sps:$4 sm:$0xff]  }
  0xc6   :  { %5122 = vmatprep.mubr.bf16.mxu1 %v9831_v59 }
  0xc7   :  { %5052 = vmatpush1.bf16.msra.mxu0 %v8041_v61  ;;  %v8118_v61 = vld [vmem:[%s12115_s1 + $0xf44] ss:$16 sps:$4 sm:$0xff]  }
  0xc8   :  { %5093 = vmatpush1.bf16.msra.mxu1 %v8044_v62  ;;  %5053 = vmatprep.subr.bf16.mxu0 %v8049_v63  ;;  %v8113_v62 = vld [vmem:[%s12115_s1 + $0xd40] ss:$16 sps:$4 sm:$0xff]  }
  0xc9   :  { %5094 = vmatprep.subr.bf16.mxu1 %v8052_v1  ;;  %v9987_v63 = vld [vmem:[%s12114_s0 + $0x10] sm:$0xff] }
  0xca   :  { %v8116_v1 = vld [vmem:[%s12115_s1 + $0xf40] ss:$16 sps:$4 sm:$0xff]  }
  0xcb   :  { %5054 = vmatpush1.bf16.msra.mxu0 %v8047_v2  ;;  %v8121_v2 = vld [vmem:[%s12115_s1 + $0xd24] ss:$16 sps:$4 sm:$0xff]  }
  0xcc   :  { %5095 = vmatpush1.bf16.msra.mxu1 %v8050_v3  ;;  %5055 = vmatprep.subr.bf16.mxu0 %v8055_v4  ;;  %v8124_v3 = vld [vmem:[%s12115_s1 + $0xf24] ss:$16 sps:$4 sm:$0xff]   ;;  %v10000_v4 = vrot.slane %v9987_v63, %v9281_v49 }
  0xcd   :  { %5096 = vmatprep.subr.bf16.mxu1 %v8058_v5  ;;  %v8119_v5 = vld [vmem:[%s12115_s1 + $0xd20] ss:$16 sps:$4 sm:$0xff]  }
  0xcf   :  { %5056 = vmatpush1.bf16.msra.mxu0 %v8053_v7  ;;  %v8122_v7 = vld [vmem:[%s12115_s1 + $0xf20] ss:$16 sps:$4 sm:$0xff]  }
  0xd0   :  { %5097 = vmatpush1.bf16.msra.mxu1 %v8056_v8  ;;  %5057 = vmatprep.subr.bf16.mxu0 %v8061_v9  ;;  %v8127_v8 = vld [vmem:[%s12115_s1 + $0xd04] ss:$16 sps:$4 sm:$0xff]  }
  0xd1   :  { %5098 = vmatprep.subr.bf16.mxu1 %v8064_v10  ;;  %v8130_v9 = vld [vmem:[%s12115_s1 + $0xf04] ss:$16 sps:$4 sm:$0xff]   ;;  %v905_v10 = vcombine.high %v10000_v4, %v10000_v4 }
  0xd3   :  { %5058 = vmatpush1.bf16.msra.mxu0 %v8059_v11  ;;  %v8125_v11 = vld [vmem:[%s12115_s1 + $0xd00] ss:$16 sps:$4 sm:$0xff]  }
  0xd4   :  { %5099 = vmatpush1.bf16.msra.mxu1 %v8062_v12  ;;  %5059 = vmatprep.subr.bf16.mxu0 %v8067_v14  ;;  %v10021_v12 = vrot.slane %v9778_v39, %v9281_v49  ;;  %v8128_v14 = vld [vmem:[%s12115_s1 + $0xf00] ss:$16 sps:$4 sm:$0xff]  }
  0xd5   :  { %5100 = vmatprep.subr.bf16.mxu1 %v8070_v15  ;;  %v8134_v15 = vld [vmem:[%s12115_s1 + $0x10e4] ss:$16 sps:$4 sm:$0xff]  }
  0xd6   :  { %v10037_v39 = vcombine.high %v10021_v12, %v10021_v12 }
  0xd7   :  { %5060 = vmatpush1.bf16.msra.mxu0 %v8065_v16  ;;  %v8137_v16 = vld [vmem:[%s12115_s1 + $0x12e4] ss:$16 sps:$4 sm:$0xff]  }
  0xd8   :  { %5101 = vmatpush1.bf16.msra.mxu1 %v8068_v19  ;;  %5061 = vmatprep.subr.bf16.mxu0 %v8073_v20  ;;  %v10033_v19 = vrot.slane %v905_v10, %v9281_v49  ;;  %v8132_v20 = vld [vmem:[%s12115_s1 + $0x10e0] ss:$16 sps:$4 sm:$0xff]   ;;  %v8179_v10 = vld [vmem:[%s12115_s1 + $0x1204] ss:$16 sps:$4 sm:$0xff]  }
  0xd9   :  { %5102 = vmatprep.subr.bf16.mxu1 %v8076_v21  ;;  %v8135_v21 = vld [vmem:[%s12115_s1 + $0x12e0] ss:$16 sps:$4 sm:$0xff]  }
  0xdb   :  { %5062 = vmatpush1.bf16.msra.mxu0 %v8071_v22  ;;  %v8140_v22 = vld [vmem:[%s12115_s1 + $0x10c4] ss:$16 sps:$4 sm:$0xff]  }
  0xdc   :  { %5103 = vmatpush1.bf16.msra.mxu1 %v8074_v24  ;;  %5063 = vmatprep.subr.bf16.mxu0 %v8079_v25  ;;  %v8143_v24 = vld [vmem:[%s12115_s1 + $0x12c4] ss:$16 sps:$4 sm:$0xff]   ;;  %v10053_v25 = vcombine.high %v10033_v19, %v10033_v19 }
  0xdd   :  { %5104 = vmatprep.subr.bf16.mxu1 %v8082_v27 }
  0xdf   :  { %5064 = vmatpush1.bf16.msra.mxu0 %v8077_v28 }
  0xe0   :  { %5105 = vmatpush1.bf16.msra.mxu1 %v8080_v29  ;;  %5065 = vmatprep.subr.bf16.mxu0 %v8085_v30  ;;  %v8138_v29 = vld [vmem:[%s12115_s1 + $0x10c0] ss:$16 sps:$4 sm:$0xff]  }
  0xe1   :  { %5106 = vmatprep.subr.bf16.mxu1 %v8088_v31  ;;  %v8141_v30 = vld [vmem:[%s12115_s1 + $0x12c0] ss:$16 sps:$4 sm:$0xff]  }
  0xe3   :  { %5066 = vmatpush2.bf16.msra.mxu0 %v8083_v33 }
  0xe4   :  { %5107 = vmatpush2.bf16.msra.mxu1 %v8086_v34  ;;  %5067 = vmatprep.subr.bf16.mxu0 %v8091_v36  ;;  %v8146_v36 = vld [vmem:[%s12115_s1 + $0x10a4] ss:$16 sps:$4 sm:$0xff]  }
  0xe5   :  { %5108 = vmatprep.subr.bf16.mxu1 %v8094_v37  ;;  %v8149_v37 = vld [vmem:[%s12115_s1 + $0x12a4] ss:$16 sps:$4 sm:$0xff]  }
  0xe7   :  { %5068 = vmatpush2.bf16.msra.mxu0 %v8089_v38 }
  0xe8   :  { %5109 = vmatpush2.bf16.msra.mxu1 %v8092_v32  ;;  %5069 = vmatprep.subr.bf16.mxu0 %v8097_v40  ;;  %v8144_v32 = vld [vmem:[%s12115_s1 + $0x10a0] ss:$16 sps:$4 sm:$0xff]  }
  0xe9   :  { %5110 = vmatprep.subr.bf16.mxu1 %v8100_v44  ;;  %v8147_v40 = vld [vmem:[%s12115_s1 + $0x12a0] ss:$16 sps:$4 sm:$0xff]  }
  0xeb   :  { %5070 = vmatpush2.bf16.msra.mxu0 %v8095_v45 }
  0xec   :  { %5111 = vmatpush2.bf16.msra.mxu1 %v8098_v46  ;;  %5071 = vmatprep.subr.bf16.mxu0 %v8103_v47 }
  0xed   :  { %5112 = vmatprep.subr.bf16.mxu1 %v8106_v50  ;;  %v8152_v50 = vld [vmem:[%s12115_s1 + $0x1084] ss:$16 sps:$4 sm:$0xff]  }
  0xef   :  { %5072 = vmatpush2.bf16.msra.mxu0 %v8101_v51  ;;  %v8155_v51 = vld [vmem:[%s12115_s1 + $0x1284] ss:$16 sps:$4 sm:$0xff]  }
  0xf0   :  { %5113 = vmatpush2.bf16.msra.mxu1 %v8104_v52  ;;  %5073 = vmatprep.subr.bf16.mxu0 %v8109_v35  ;;  %v8150_v52 = vld [vmem:[%s12115_s1 + $0x1080] ss:$16 sps:$4 sm:$0xff]  }
  0xf1   :  { %5114 = vmatprep.subr.bf16.mxu1 %v8112_v55  ;;  %v8153_v35 = vld [vmem:[%s12115_s1 + $0x1280] ss:$16 sps:$4 sm:$0xff]   ;;  %v8158_v55 = vld [vmem:[%s12115_s1 + $0x1064] ss:$16 sps:$4 sm:$0xff]  }
  0xf3   :  { %5074 = vmatpush2.bf16.msra.mxu0 %v8107_v56  ;;  %v8161_v56 = vld [vmem:[%s12115_s1 + $0x1264] ss:$16 sps:$4 sm:$0xff]  }
  0xf4   :  { %5115 = vmatpush2.bf16.msra.mxu1 %v8110_v57  ;;  %5075 = vmatprep.subr.bf16.mxu0 %v8115_v58  ;;  %v8156_v57 = vld [vmem:[%s12115_s1 + $0x1060] ss:$16 sps:$4 sm:$0xff]  }
  0xf5   :  { %5116 = vmatprep.subr.bf16.mxu1 %v8118_v61  ;;  %v8159_v58 = vld [vmem:[%s12115_s1 + $0x1260] ss:$16 sps:$4 sm:$0xff]   ;;  %v8164_v61 = vld [vmem:[%s12115_s1 + $0x1044] ss:$16 sps:$4 sm:$0xff]  }
  0xf7   :  { %5076 = vmatpush2.bf16.msra.mxu0 %v8113_v62  ;;  %v8167_v62 = vld [vmem:[%s12115_s1 + $0x1244] ss:$16 sps:$4 sm:$0xff]  }
  0xf8   :  { %5117 = vmatpush2.bf16.msra.mxu1 %v8116_v1  ;;  %5077 = vmatprep.subr.bf16.mxu0 %v8121_v2  ;;  %v8162_v1 = vld [vmem:[%s12115_s1 + $0x1040] ss:$16 sps:$4 sm:$0xff]  }
  0xf9   :  { %5118 = vmatprep.subr.bf16.mxu1 %v8124_v3  ;;  %v8165_v2 = vld [vmem:[%s12115_s1 + $0x1240] ss:$16 sps:$4 sm:$0xff]   ;;  %v8170_v3 = vld [vmem:[%s12115_s1 + $0x1024] ss:$16 sps:$4 sm:$0xff]  }
  0xfb   :  { %5078 = vmatpush2.bf16.msra.mxu0 %v8119_v5  ;;  %v8173_v5 = vld [vmem:[%s12115_s1 + $0x1224] ss:$16 sps:$4 sm:$0xff]  }
  0xfc   :  { %5119 = vmatpush2.bf16.msra.mxu1 %v8122_v7  ;;  %5079 = vmatprep.subr.bf16.mxu0 %v8127_v8  ;;  %v8168_v7 = vld [vmem:[%s12115_s1 + $0x1020] ss:$16 sps:$4 sm:$0xff]  }
  0xfd   :  { %5120 = vmatprep.subr.bf16.mxu1 %v8130_v9  ;;  %v8171_v8 = vld [vmem:[%s12115_s1 + $0x1220] ss:$16 sps:$4 sm:$0xff]   ;;  %v8176_v9 = vld [vmem:[%s12115_s1 + $0x1004] ss:$16 sps:$4 sm:$0xff]  }
  0xff   :  { %5080 = vmatpush2.bf16.msra.mxu0 %v8125_v11  ;;  %v8174_v11 = vld [vmem:[%s12115_s1 + $0x1000] ss:$16 sps:$4 sm:$0xff]  }
 0x100   :  { %5121 = vmatpush2.bf16.msra.mxu1 %v8128_v14  ;;  %5131 = vmatprep.subr.bf16.mxu0 %v8134_v15  ;;  %v8177_v14 = vld [vmem:[%s12115_s1 + $0x1200] ss:$16 sps:$4 sm:$0xff]   ;;  %v8182_v15 = vld [vmem:[%s12115_s1 + $0x11e4] ss:$16 sps:$4 sm:$0xff]  }
 0x101   :  { %5172 = vmatprep.subr.bf16.mxu1 %v8137_v16  ;;  %v8185_v16 = vld [vmem:[%s12115_s1 + $0x13e4] ss:$16 sps:$4 sm:$0xff]  }
 0x102   :  { %v4837_v27 = vpop.f32.mrf.mxu0  ;;  %5082 = vmatmul.mubr.bf16.vlgmr.msra.gmra.mxu0 %v10021_v12 }
 0x103   :  { %v4878_v28 = vpop.f32.mrf.mxu1  ;;  %5123 = vmatmul.mubr.bf16.vlgmr.msra.gmra.mxu1 %v10037_v39  ;;  %5132 = vmatpush1.bf16.msra.mxu0 %v8132_v20  ;;  %v8180_v20 = vld [vmem:[%s12115_s1 + $0x11e0] ss:$16 sps:$4 sm:$0xff]  }
 0x104   :  { %v10063_v31 = vadd.f32 %v4878_v28, %v4837_v27  ;;  %5173 = vmatpush1.bf16.msra.mxu1 %v8135_v21  ;;  %v4839_v33 = vpop.f32.mrf.mxu0  ;;  %5133 = vmatprep.subr.bf16.mxu0 %v8140_v22  ;;  %v8183_v21 = vld [vmem:[%s12115_s1 + $0x13e0] ss:$16 sps:$4 sm:$0xff]   ;;  %v8188_v22 = vld [vmem:[%s12115_s1 + $0x11c4] ss:$16 sps:$4 sm:$0xff]  }
 0x105   :  { %v4880_v34 = vpop.f32.mrf.mxu1  ;;  %5174 = vmatprep.subr.bf16.mxu1 %v8143_v24  ;;  %5163 = vmatprep.mubr.bf16.mxu0 %v10033_v19  ;;  %v8191_v24 = vld [vmem:[%s12115_s1 + $0x13c4] ss:$16 sps:$4 sm:$0xff]   ;;  %v8186_v27 = vld [vmem:[%s12115_s1 + $0x11c0] ss:$16 sps:$4 sm:$0xff]  }
 0x106   :  { %v10071_v38 = vadd.f32 %v4880_v34, %v4839_v33  ;;  %5204 = vmatprep.mubr.bf16.mxu1 %v10053_v25  ;;  %v4841_v44 = vpop.f32.mrf.mxu0  ;;  %v8189_v28 = vld [vmem:[%s12115_s1 + $0x13c0] ss:$16 sps:$4 sm:$0xff]  }
 0x107   :  { %v4882_v45 = vpop.f32.mrf.mxu1  ;;  %5134 = vmatpush1.bf16.msra.mxu0 %v8138_v29  ;;  %v8194_v29 = vld [vmem:[%s12115_s1 + $0x11a4] ss:$16 sps:$4 sm:$0xff]   ;;  %v8192_v33 = vld [vmem:[%s12115_s1 + $0x11a0] ss:$16 sps:$4 sm:$0xff]  }
 0x108   :  { %5175 = vmatpush1.bf16.msra.mxu1 %v8141_v30  ;;  %v4842_v46 = vpop.f32.mrf.mxu0  ;;  %5135 = vmatprep.subr.bf16.mxu0 %v8146_v36  ;;  %v8197_v30 = vld [vmem:[%s12115_s1 + $0x13a4] ss:$16 sps:$4 sm:$0xff]   ;;  %v8195_v34 = vld [vmem:[%s12115_s1 + $0x13a0] ss:$16 sps:$4 sm:$0xff]  }
 0x109   :  { %v4883_v47 = vpop.f32.mrf.mxu1  ;;  %5176 = vmatprep.subr.bf16.mxu1 %v8149_v37  ;;  %v8200_v36 = vld [vmem:[%s12115_s1 + $0x1184] ss:$16 sps:$4 sm:$0xff]   ;;  %v8204_v46 = vld [vmem:[%s12115_s1 + $0x1160] ss:$16 sps:$4 sm:$0xff]  }
 0x10a   :  { %v8203_v37 = vld [vmem:[%s12115_s1 + $0x1384] ss:$16 sps:$4 sm:$0xff]   ;;  %v8207_v47 = vld [vmem:[%s12115_s1 + $0x1360] ss:$16 sps:$4 sm:$0xff]  }
 0x10b   :  { %5136 = vmatpush1.bf16.msra.mxu0 %v8144_v32  ;;  %v8198_v32 = vld [vmem:[%s12115_s1 + $0x1180] ss:$16 sps:$4 sm:$0xff]   ;;  %v8206_v44 = vld [vmem:[%s12115_s1 + $0x1164] ss:$16 sps:$4 sm:$0xff]  }
 0x10c   :  { %5177 = vmatpush1.bf16.msra.mxu1 %v8147_v40  ;;  %5137 = vmatprep.subr.bf16.mxu0 %v8152_v50  ;;  %v8201_v40 = vld [vmem:[%s12115_s1 + $0x1380] ss:$16 sps:$4 sm:$0xff]   ;;  %v8209_v45 = vld [vmem:[%s12115_s1 + $0x1364] ss:$16 sps:$4 sm:$0xff]  }
 0x10d   :  { %5178 = vmatprep.subr.bf16.mxu1 %v8155_v51  ;;  %v8212_v50 = vld [vmem:[%s12115_s1 + $0x1144] ss:$16 sps:$4 sm:$0xff]  }
 0x10e   :  { %v8215_v51 = vld [vmem:[%s12115_s1 + $0x1344] ss:$16 sps:$4 sm:$0xff]  }
 0x10f   :  { %5138 = vmatpush1.bf16.msra.mxu0 %v8150_v52  ;;  %v890_v52 = vcombine.high %v9987_v63, %v9987_v63  ;;  %v8221_v63 = vld [vmem:[%s12115_s1 + $0x1324] ss:$16 sps:$4 sm:$0xff]  }
 0x110   :  { %5179 = vmatpush1.bf16.msra.mxu1 %v8153_v35  ;;  %5139 = vmatprep.subr.bf16.mxu0 %v8158_v55  ;;  %v8210_v35 = vld [vmem:[%s12115_s1 + $0x1140] ss:$16 sps:$4 sm:$0xff]  }
 0x111   :  { %5180 = vmatprep.subr.bf16.mxu1 %v8161_v56  ;;  %v8213_v55 = vld [vmem:[%s12115_s1 + $0x1340] ss:$16 sps:$4 sm:$0xff]   ;;  %v8218_v56 = vld [vmem:[%s12115_s1 + $0x1124] ss:$16 sps:$4 sm:$0xff]  }
 0x113   :  { %5140 = vmatpush1.bf16.msra.mxu0 %v8156_v57  ;;  %v10222_v57 = vrot.slane %v890_v52, %v9281_v49  ;;  %v8249_v52 = vld [vmem:[%s12115_s1 + $0x1680] ss:$16 sps:$4 sm:$0xff]  }
 0x114   :  { %5181 = vmatpush1.bf16.msra.mxu1 %v8159_v58  ;;  %5141 = vmatprep.subr.bf16.mxu0 %v8164_v61  ;;  %v8216_v58 = vld [vmem:[%s12115_s1 + $0x1120] ss:$16 sps:$4 sm:$0xff]  }
 0x115   :  { %5182 = vmatprep.subr.bf16.mxu1 %v8167_v62  ;;  %v8219_v61 = vld [vmem:[%s12115_s1 + $0x1320] ss:$16 sps:$4 sm:$0xff]   ;;  %v8224_v62 = vld [vmem:[%s12115_s1 + $0x1104] ss:$16 sps:$4 sm:$0xff]  }
 0x117   :  { %5142 = vmatpush1.bf16.msra.mxu0 %v8162_v1  ;;  %v8227_v1 = vld [vmem:[%s12115_s1 + $0x1304] ss:$16 sps:$4 sm:$0xff]  }
 0x118   :  { %5183 = vmatpush1.bf16.msra.mxu1 %v8165_v2  ;;  %5143 = vmatprep.subr.bf16.mxu0 %v8170_v3  ;;  %v906_v2 = vcombine.high %v10222_v57, %v10222_v57  ;;  %v10240_v3 = vrot.slane %v10000_v4, %v9281_v49  ;;  %v8233_v4 = vld [vmem:[%s12115_s1 + $0x16e4] ss:$16 sps:$4 sm:$0xff]  }
 0x119   :  { %5184 = vmatprep.subr.bf16.mxu1 %v8173_v5  ;;  %v8222_v5 = vld [vmem:[%s12115_s1 + $0x1100] ss:$16 sps:$4 sm:$0xff]  }
 0x11b   :  { %5144 = vmatpush1.bf16.msra.mxu0 %v8168_v7  ;;  %v8225_v7 = vld [vmem:[%s12115_s1 + $0x1300] ss:$16 sps:$4 sm:$0xff]  }
 0x11c   :  { %5185 = vmatpush1.bf16.msra.mxu1 %v8171_v8  ;;  %5145 = vmatprep.subr.bf16.mxu0 %v8176_v9  ;;  %v8230_v8 = vld [vmem:[%s12115_s1 + $0x14e4] ss:$16 sps:$4 sm:$0xff]   ;;  %v8228_v9 = vld [vmem:[%s12115_s1 + $0x14e0] ss:$16 sps:$4 sm:$0xff]  }
 0x11d   :  { %5186 = vmatprep.subr.bf16.mxu1 %v8179_v10  ;;  %v8231_v10 = vld [vmem:[%s12115_s1 + $0x16e0] ss:$16 sps:$4 sm:$0xff]  }
 0x11f   :  { %5146 = vmatpush1.bf16.msra.mxu0 %v8174_v11  ;;  %v10261_v11 = vrot.slane %v906_v2, %v9281_v49  ;;  %v8266_v2 = vld [vmem:[%s12115_s1 + $0x1424] ss:$16 sps:$4 sm:$0xff]  }
 0x120   :  { %5187 = vmatpush1.bf16.msra.mxu1 %v8177_v14  ;;  %5147 = vmatprep.subr.bf16.mxu0 %v8182_v15  ;;  %v10265_v14 = vcombine.high %v10240_v3, %v10240_v3  ;;  %v8236_v15 = vld [vmem:[%s12115_s1 + $0x14c4] ss:$16 sps:$4 sm:$0xff]  }
 0x121   :  { %5188 = vmatprep.subr.bf16.mxu1 %v8185_v16  ;;  %v8239_v16 = vld [vmem:[%s12115_s1 + $0x16c4] ss:$16 sps:$4 sm:$0xff]  }
 0x123   :  { %5148 = vmatpush2.bf16.msra.mxu0 %v8180_v20  ;;  %v8234_v20 = vld [vmem:[%s12115_s1 + $0x14c0] ss:$16 sps:$4 sm:$0xff]  }
 0x124   :  { %5189 = vmatpush2.bf16.msra.mxu1 %v8183_v21  ;;  %5149 = vmatprep.subr.bf16.mxu0 %v8188_v22  ;;  %v8237_v21 = vld [vmem:[%s12115_s1 + $0x16c0] ss:$16 sps:$4 sm:$0xff]   ;;  %v10281_v22 = vcombine.high %v10261_v11, %v10261_v11 }
 0x125   :  { %5190 = vmatprep.subr.bf16.mxu1 %v8191_v24 }
 0x127   :  { %5150 = vmatpush2.bf16.msra.mxu0 %v8186_v27 }
 0x128   :  { %5191 = vmatpush2.bf16.msra.mxu1 %v8189_v28  ;;  %5151 = vmatprep.subr.bf16.mxu0 %v8194_v29 }
 0x129   :  { %5192 = vmatprep.subr.bf16.mxu1 %v8197_v30 }
 0x12b   :  { %5152 = vmatpush2.bf16.msra.mxu0 %v8192_v33  ;;  %v8242_v33 = vld [vmem:[%s12115_s1 + $0x14a4] ss:$16 sps:$4 sm:$0xff]  }
 0x12c   :  { %5193 = vmatpush2.bf16.msra.mxu1 %v8195_v34  ;;  %5153 = vmatprep.subr.bf16.mxu0 %v8200_v36  ;;  %v8245_v34 = vld [vmem:[%s12115_s1 + $0x16a4] ss:$16 sps:$4 sm:$0xff]  }
 0x12d   :  { %5194 = vmatprep.subr.bf16.mxu1 %v8203_v37 }
 0x12f   :  { %5154 = vmatpush2.bf16.msra.mxu0 %v8198_v32  ;;  %v8243_v32 = vld [vmem:[%s12115_s1 + $0x16a0] ss:$16 sps:$4 sm:$0xff]  }
 0x130   :  { %5195 = vmatpush2.bf16.msra.mxu1 %v8201_v40  ;;  %5155 = vmatprep.subr.bf16.mxu0 %v8206_v44 }
 0x131   :  { %5196 = vmatprep.subr.bf16.mxu1 %v8209_v45 }
 0x133   :  { %5156 = vmatpush2.bf16.msra.mxu0 %v8204_v46 }
 0x134   :  { %5197 = vmatpush2.bf16.msra.mxu1 %v8207_v47  ;;  %5157 = vmatprep.subr.bf16.mxu0 %v8212_v50  ;;  %v8248_v47 = vld [vmem:[%s12115_s1 + $0x1484] ss:$16 sps:$4 sm:$0xff]  }
 0x135   :  { %5198 = vmatprep.subr.bf16.mxu1 %v8215_v51  ;;  %v8251_v50 = vld [vmem:[%s12115_s1 + $0x1684] ss:$16 sps:$4 sm:$0xff]   ;;  %v8246_v51 = vld [vmem:[%s12115_s1 + $0x1480] ss:$16 sps:$4 sm:$0xff]  }
 0x137   :  { %5158 = vmatpush2.bf16.msra.mxu0 %v8210_v35  ;;  %v8254_v35 = vld [vmem:[%s12115_s1 + $0x1464] ss:$16 sps:$4 sm:$0xff]  }
 0x138   :  { %5199 = vmatpush2.bf16.msra.mxu1 %v8213_v55  ;;  %5159 = vmatprep.subr.bf16.mxu0 %v8218_v56  ;;  %v8257_v55 = vld [vmem:[%s12115_s1 + $0x1664] ss:$16 sps:$4 sm:$0xff]   ;;  %v8252_v56 = vld [vmem:[%s12115_s1 + $0x1460] ss:$16 sps:$4 sm:$0xff]  }
 0x139   :  { %5200 = vmatprep.subr.bf16.mxu1 %v8221_v63  ;;  %v8255_v63 = vld [vmem:[%s12115_s1 + $0x1660] ss:$16 sps:$4 sm:$0xff]  }
 0x13b   :  { %5160 = vmatpush2.bf16.msra.mxu0 %v8216_v58  ;;  %v8260_v58 = vld [vmem:[%s12115_s1 + $0x1444] ss:$16 sps:$4 sm:$0xff]  }
 0x13c   :  { %5201 = vmatpush2.bf16.msra.mxu1 %v8219_v61  ;;  %5161 = vmatprep.subr.bf16.mxu0 %v8224_v62  ;;  %v8263_v61 = vld [vmem:[%s12115_s1 + $0x1644] ss:$16 sps:$4 sm:$0xff]   ;;  %v8258_v62 = vld [vmem:[%s12115_s1 + $0x1440] ss:$16 sps:$4 sm:$0xff]  }
 0x13d   :  { %5202 = vmatprep.subr.bf16.mxu1 %v8227_v1  ;;  %v8261_v1 = vld [vmem:[%s12115_s1 + $0x1640] ss:$16 sps:$4 sm:$0xff]  }
 0x13f   :  { %5162 = vmatpush2.bf16.msra.mxu0 %v8222_v5  ;;  %v8269_v5 = vld [vmem:[%s12115_s1 + $0x1624] ss:$16 sps:$4 sm:$0xff]  }
 0x140   :  { %5203 = vmatpush2.bf16.msra.mxu1 %v8225_v7  ;;  %5213 = vmatprep.subr.bf16.mxu0 %v8230_v8  ;;  %v8264_v7 = vld [vmem:[%s12115_s1 + $0x1420] ss:$16 sps:$4 sm:$0xff]  }
 0x141   :  { %5254 = vmatprep.subr.bf16.mxu1 %v8233_v4  ;;  %v8267_v8 = vld [vmem:[%s12115_s1 + $0x1620] ss:$16 sps:$4 sm:$0xff]   ;;  %v8272_v4 = vld [vmem:[%s12115_s1 + $0x1404] ss:$16 sps:$4 sm:$0xff]  }
 0x142   :  { %v4919_v24 = vpop.f32.mrf.mxu0  ;;  %5164 = vmatmul.mubr.bf16.vlgmr.msra.gmra.mxu0 %v10240_v3 }
 0x143   :  { %v4960_v27 = vpop.f32.mrf.mxu1  ;;  %5205 = vmatmul.mubr.bf16.vlgmr.msra.gmra.mxu1 %v10265_v14  ;;  %v4920_v28 = vadd.f32 %v4919_v24, %v10063_v31  ;;  %5214 = vmatpush1.bf16.msra.mxu0 %v8228_v9  ;;  %v8240_v31 = vld [vmem:[%s12115_s1 + $0x14a0] ss:$16 sps:$4 sm:$0xff]   ;;  %v8275_v9 = vld [vmem:[%s12115_s1 + $0x1604] ss:$16 sps:$4 sm:$0xff]  }
 0x144   :  { %5255 = vmatpush1.bf16.msra.mxu1 %v8231_v10  ;;  %v4921_v29 = vpop.f32.mrf.mxu0  ;;  %5215 = vmatprep.subr.bf16.mxu0 %v8236_v15  ;;  %v8270_v10 = vld [vmem:[%s12115_s1 + $0x1400] ss:$16 sps:$4 sm:$0xff]  }
 0x145   :  { %v4962_v30 = vpop.f32.mrf.mxu1  ;;  %5256 = vmatprep.subr.bf16.mxu1 %v8239_v16  ;;  %v10292_v36 = vadd.f32 %v4960_v27, %v4920_v28  ;;  %v4922_v37 = vadd.f32 %v4921_v29, %v10071_v38  ;;  %5245 = vmatprep.mubr.bf16.mxu0 %v10261_v11  ;;  %v8273_v15 = vld [vmem:[%s12115_s1 + $0x1600] ss:$16 sps:$4 sm:$0xff]   ;;  %v8278_v16 = vld [vmem:[%s12115_s1 + $0x15e4] ss:$16 sps:$4 sm:$0xff]  }
 0x146   :  { %5286 = vmatprep.mubr.bf16.mxu1 %v10281_v22  ;;  %v4923_v40 = vpop.f32.mrf.mxu0  ;;  %v8279_v24 = vld [vmem:[%s12115_s1 + $0x17e0] ss:$16 sps:$4 sm:$0xff]   ;;  %v8284_v27 = vld [vmem:[%s12115_s1 + $0x15c4] ss:$16 sps:$4 sm:$0xff]  }
 0x147   :  { %v4964_v44 = vpop.f32.mrf.mxu1  ;;  %v10303_v45 = vadd.f32 %v4962_v30, %v4922_v37  ;;  %5216 = vmatpush1.bf16.msra.mxu0 %v8234_v20  ;;  %v8281_v20 = vld [vmem:[%s12115_s1 + $0x17e4] ss:$16 sps:$4 sm:$0xff]   ;;  %v8282_v29 = vld [vmem:[%s12115_s1 + $0x15c0] ss:$16 sps:$4 sm:$0xff]  }
 0x148   :  { %5257 = vmatpush1.bf16.msra.mxu1 %v8237_v21  ;;  %v4924_v46 = vpop.f32.mrf.mxu0  ;;  %5217 = vmatprep.subr.bf16.mxu0 %v8242_v33  ;;  %v8276_v21 = vld [vmem:[%s12115_s1 + $0x15e0] ss:$16 sps:$4 sm:$0xff]   ;;  %v8287_v28 = vld [vmem:[%s12115_s1 + $0x17c4] ss:$16 sps:$4 sm:$0xff]  }
 0x149   :  { %v4965_v38 = vpop.f32.mrf.mxu1  ;;  %5258 = vmatprep.subr.bf16.mxu1 %v8245_v34  ;;  %v8285_v30 = vld [vmem:[%s12115_s1 + $0x17c0] ss:$16 sps:$4 sm:$0xff]   ;;  %v8290_v33 = vld [vmem:[%s12115_s1 + $0x15a4] ss:$16 sps:$4 sm:$0xff]  }
 0x14a   :  { %v8293_v34 = vld [vmem:[%s12115_s1 + $0x17a4] ss:$16 sps:$4 sm:$0xff]   ;;  %v8288_v37 = vld [vmem:[%s12115_s1 + $0x15a0] ss:$16 sps:$4 sm:$0xff]  }
 0x14b   :  { %5218 = vmatpush1.bf16.msra.mxu0 %v8240_v31  ;;  %v8291_v31 = vld [vmem:[%s12115_s1 + $0x17a0] ss:$16 sps:$4 sm:$0xff]   ;;  %v8299_v40 = vld [vmem:[%s12115_s1 + $0x1784] ss:$16 sps:$4 sm:$0xff]  }
 0x14c   :  { %5259 = vmatpush1.bf16.msra.mxu1 %v8243_v32  ;;  %5219 = vmatprep.subr.bf16.mxu0 %v8248_v47  ;;  %v8296_v32 = vld [vmem:[%s12115_s1 + $0x1584] ss:$16 sps:$4 sm:$0xff]   ;;  %v8294_v44 = vld [vmem:[%s12115_s1 + $0x1580] ss:$16 sps:$4 sm:$0xff]  }
 0x14d   :  { %5260 = vmatprep.subr.bf16.mxu1 %v8251_v50  ;;  %v8297_v46 = vld [vmem:[%s12115_s1 + $0x1780] ss:$16 sps:$4 sm:$0xff]   ;;  %v8302_v38 = vld [vmem:[%s12115_s1 + $0x1564] ss:$16 sps:$4 sm:$0xff]  }
 0x14e   :  { %v8305_v47 = vld [vmem:[%s12115_s1 + $0x1764] ss:$16 sps:$4 sm:$0xff]   ;;  %v8300_v50 = vld [vmem:[%s12115_s1 + $0x1560] ss:$16 sps:$4 sm:$0xff]  }
 0x14f   :  { %5220 = vmatpush1.bf16.msra.mxu0 %v8246_v51  ;;  %v8303_v51 = vld [vmem:[%s12115_s1 + $0x1760] ss:$16 sps:$4 sm:$0xff]  }
 0x150   :  { %5261 = vmatpush1.bf16.msra.mxu1 %v8249_v52  ;;  %5221 = vmatprep.subr.bf16.mxu0 %v8254_v35  ;;  %v8308_v52 = vld [vmem:[%s12115_s1 + $0x1544] ss:$16 sps:$4 sm:$0xff]  }
 0x151   :  { %5262 = vmatprep.subr.bf16.mxu1 %v8257_v55  ;;  %v8311_v35 = vld [vmem:[%s12115_s1 + $0x1744] ss:$16 sps:$4 sm:$0xff]   ;;  %v8306_v55 = vld [vmem:[%s12115_s1 + $0x1540] ss:$16 sps:$4 sm:$0xff]  }
 0x153   :  { %5222 = vmatpush1.bf16.msra.mxu0 %v8252_v56  ;;  %v8309_v56 = vld [vmem:[%s12115_s1 + $0x1740] ss:$16 sps:$4 sm:$0xff]  }
 0x154   :  { %5263 = vmatpush1.bf16.msra.mxu1 %v8255_v63  ;;  %5223 = vmatprep.subr.bf16.mxu0 %v8260_v58  ;;  %v8314_v63 = vld [vmem:[%s12115_s1 + $0x1524] ss:$16 sps:$4 sm:$0xff]  }
 0x155   :  { %5264 = vmatprep.subr.bf16.mxu1 %v8263_v61  ;;  %v8317_v58 = vld [vmem:[%s12115_s1 + $0x1724] ss:$16 sps:$4 sm:$0xff]   ;;  %v8312_v61 = vld [vmem:[%s12115_s1 + $0x1520] ss:$16 sps:$4 sm:$0xff]  }
 0x157   :  { %5224 = vmatpush1.bf16.msra.mxu0 %v8258_v62  ;;  %v8315_v62 = vld [vmem:[%s12115_s1 + $0x1720] ss:$16 sps:$4 sm:$0xff]  }
 0x158   :  { %5265 = vmatpush1.bf16.msra.mxu1 %v8261_v1  ;;  %5225 = vmatprep.subr.bf16.mxu0 %v8266_v2  ;;  %v8320_v1 = vld [vmem:[%s12115_s1 + $0x1504] ss:$16 sps:$4 sm:$0xff]  }
 0x159   :  { %5266 = vmatprep.subr.bf16.mxu1 %v8269_v5  ;;  %v8323_v2 = vld [vmem:[%s12115_s1 + $0x1704] ss:$16 sps:$4 sm:$0xff]   ;;  %v10457_v5 = vrot.slane %v10222_v57, %v9281_v49  ;;  %v8330_v49 = vld [vmem:[%s12115_s1 + $0x2ec] ss:$16 sps:$4 sm:$0xff]   ;;  %v8325_v57 = vld [vmem:[%s12115_s1 + $0xe8] ss:$16 sps:$4 sm:$0xff]  }
 0x15b   :  { %5226 = vmatpush1.bf16.msra.mxu0 %v8264_v7  ;;  %v8318_v7 = vld [vmem:[%s12115_s1 + $0x1500] ss:$16 sps:$4 sm:$0xff]  }
 0x15c   :  { %5267 = vmatpush1.bf16.msra.mxu1 %v8267_v8  ;;  %5227 = vmatprep.subr.bf16.mxu0 %v8272_v4  ;;  %v8321_v8 = vld [vmem:[%s12115_s1 + $0x1700] ss:$16 sps:$4 sm:$0xff]   ;;  %v8327_v4 = vld [vmem:[%s12115_s1 + $0xec] ss:$16 sps:$4 sm:$0xff]  }
 0x15d   :  { %5268 = vmatprep.subr.bf16.mxu1 %v8275_v9  ;;  %v8328_v9 = vld [vmem:[%s12115_s1 + $0x2e8] ss:$16 sps:$4 sm:$0xff]  }
 0x15f   :  { %5228 = vmatpush1.bf16.msra.mxu0 %v8270_v10  ;;  %v10479_v10 = vcombine.high %v10457_v5, %v10457_v5 }
 0x160   :  { %5269 = vmatpush1.bf16.msra.mxu1 %v8273_v15  ;;  %5229 = vmatprep.subr.bf16.mxu0 %v8278_v16  ;;  %v8333_v15 = vld [vmem:[%s12115_s1 + $0xcc] ss:$16 sps:$4 sm:$0xff]  }
 0x161   :  { %5270 = vmatprep.subr.bf16.mxu1 %v8281_v20  ;;  %v8336_v16 = vld [vmem:[%s12115_s1 + $0x2cc] ss:$16 sps:$4 sm:$0xff]   ;;  %v8331_v20 = vld [vmem:[%s12115_s1 + $0xc8] ss:$16 sps:$4 sm:$0xff]  }
 0x163   :  { %5230 = vmatpush2.bf16.msra.mxu0 %v8276_v21  ;;  %v8334_v21 = vld [vmem:[%s12115_s1 + $0x2c8] ss:$16 sps:$4 sm:$0xff]  }
 0x164   :  { %5271 = vmatpush2.bf16.msra.mxu1 %v8279_v24  ;;  %5231 = vmatprep.subr.bf16.mxu0 %v8284_v27 }
 0x165   :  { %5272 = vmatprep.subr.bf16.mxu1 %v8287_v28 }
 0x167   :  { %5232 = vmatpush2.bf16.msra.mxu0 %v8282_v29 }
 0x168   :  { %5273 = vmatpush2.bf16.msra.mxu1 %v8285_v30  ;;  %5233 = vmatprep.subr.bf16.mxu0 %v8290_v33  ;;  %v8339_v33 = vld [vmem:[%s12115_s1 + $0xac] ss:$16 sps:$4 sm:$0xff]  }
 0x169   :  { %5274 = vmatprep.subr.bf16.mxu1 %v8293_v34  ;;  %v8342_v34 = vld [vmem:[%s12115_s1 + $0x2ac] ss:$16 sps:$4 sm:$0xff]  }
 0x16b   :  { %5234 = vmatpush2.bf16.msra.mxu0 %v8288_v37 }
 0x16c   :  { %5275 = vmatpush2.bf16.msra.mxu1 %v8291_v31  ;;  %5235 = vmatprep.subr.bf16.mxu0 %v8296_v32  ;;  %v8340_v32 = vld [vmem:[%s12115_s1 + $0x2a8] ss:$16 sps:$4 sm:$0xff]  }
 0x16d   :  { %5276 = vmatprep.subr.bf16.mxu1 %v8299_v40 }
 0x16f   :  { %5236 = vmatpush2.bf16.msra.mxu0 %v8294_v44 }
 0x170   :  { %5277 = vmatpush2.bf16.msra.mxu1 %v8297_v46  ;;  %5237 = vmatprep.subr.bf16.mxu0 %v8302_v38 }
 0x171   :  { %5278 = vmatprep.subr.bf16.mxu1 %v8305_v47  ;;  %v8345_v47 = vld [vmem:[%s12115_s1 + $0x8c] ss:$16 sps:$4 sm:$0xff]  }
 0x173   :  { %5238 = vmatpush2.bf16.msra.mxu0 %v8300_v50  ;;  %v8346_v50 = vld [vmem:[%s12115_s1 + $0x288] ss:$16 sps:$4 sm:$0xff]  }
 0x174   :  { %5279 = vmatpush2.bf16.msra.mxu1 %v8303_v51  ;;  %5239 = vmatprep.subr.bf16.mxu0 %v8308_v52  ;;  %v8351_v51 = vld [vmem:[%s12115_s1 + $0x6c] ss:$16 sps:$4 sm:$0xff]  }
 0x175   :  { %5280 = vmatprep.subr.bf16.mxu1 %v8311_v35  ;;  %v8354_v52 = vld [vmem:[%s12115_s1 + $0x26c] ss:$16 sps:$4 sm:$0xff]   ;;  %v8349_v35 = vld [vmem:[%s12115_s1 + $0x68] ss:$16 sps:$4 sm:$0xff]  }
 0x177   :  { %5240 = vmatpush2.bf16.msra.mxu0 %v8306_v55  ;;  %v8352_v55 = vld [vmem:[%s12115_s1 + $0x268] ss:$16 sps:$4 sm:$0xff]  }
 0x178   :  { %5281 = vmatpush2.bf16.msra.mxu1 %v8309_v56  ;;  %5241 = vmatprep.subr.bf16.mxu0 %v8314_v63  ;;  %v8357_v56 = vld [vmem:[%s12115_s1 + $0x4c] ss:$16 sps:$4 sm:$0xff]  }
 0x179   :  { %5282 = vmatprep.subr.bf16.mxu1 %v8317_v58  ;;  %v8360_v63 = vld [vmem:[%s12115_s1 + $0x24c] ss:$16 sps:$4 sm:$0xff]   ;;  %v8355_v58 = vld [vmem:[%s12115_s1 + $0x48] ss:$16 sps:$4 sm:$0xff]  }
 0x17b   :  { %5242 = vmatpush2.bf16.msra.mxu0 %v8312_v61  ;;  %v8358_v61 = vld [vmem:[%s12115_s1 + $0x248] ss:$16 sps:$4 sm:$0xff]  }
 0x17c   :  { %5283 = vmatpush2.bf16.msra.mxu1 %v8315_v62  ;;  %5243 = vmatprep.subr.bf16.mxu0 %v8320_v1  ;;  %v8363_v62 = vld [vmem:[%s12115_s1 + $0x2c] ss:$16 sps:$4 sm:$0xff]  }
 0x17d   :  { %5284 = vmatprep.subr.bf16.mxu1 %v8323_v2  ;;  %v8366_v1 = vld [vmem:[%s12115_s1 + $0x22c] ss:$16 sps:$4 sm:$0xff]   ;;  %v8361_v2 = vld [vmem:[%s12115_s1 + $0x28] ss:$16 sps:$4 sm:$0xff]  }
 0x17f   :  { %5244 = vmatpush2.bf16.msra.mxu0 %v8318_v7  ;;  %v8364_v7 = vld [vmem:[%s12115_s1 + $0x228] ss:$16 sps:$4 sm:$0xff]  }
 0x180   :  { %5285 = vmatpush2.bf16.msra.mxu1 %v8321_v8  ;;  %5295 = vmatprep.subr.bf16.mxu0 %v8327_v4  ;;  %v8369_v8 = vld [vmem:[%s12115_s1 + $0xc] ss:$16 sps:$4 sm:$0xff]  }
 0x181   :  { %5336 = vmatprep.subr.bf16.mxu1 %v8330_v49  ;;  %v8372_v4 = vld [vmem:[%s12115_s1 + $0x20c] ss:$16 sps:$4 sm:$0xff]   ;;  %v8367_v49 = vld [vmem:[%s12115_s1 + $0x8] ss:$16 sps:$4 sm:$0xff]  }
 0x182   :  { %v5001_v24 = vpop.f32.mrf.mxu0  ;;  %5246 = vmatmul.mubr.bf16.vlgmr.msra.gmra.mxu0 %v10457_v5 }
 0x183   :  { %v5042_v27 = vpop.f32.mrf.mxu1  ;;  %5287 = vmatmul.mubr.bf16.vlgmr.msra.gmra.mxu1 %v10479_v10  ;;  %v5002_v28 = vadd.f32 %v5001_v24, %v10292_v36  ;;  %5296 = vmatpush1.bf16.msra.mxu0 %v8325_v57  ;;  %v8337_v36 = vld [vmem:[%s12115_s1 + $0xa8] ss:$16 sps:$4 sm:$0xff]   ;;  %v8384_v24 = vld [vmem:[%s12115_s1 + $0x3cc] ss:$16 sps:$4 sm:$0xff]  }
 0x184   :  { %5337 = vmatpush1.bf16.msra.mxu1 %v8328_v9  ;;  %v5003_v29 = vpop.f32.mrf.mxu0  ;;  %5297 = vmatprep.subr.bf16.mxu0 %v8333_v15  ;;  %v8370_v57 = vld [vmem:[%s12115_s1 + $0x208] ss:$16 sps:$4 sm:$0xff]   ;;  %v8375_v9 = vld [vmem:[%s12115_s1 + $0x1ec] ss:$16 sps:$4 sm:$0xff]  }
 0x185   :  { %v5044_v30 = vpop.f32.mrf.mxu1  ;;  %5338 = vmatprep.subr.bf16.mxu1 %v8336_v16  ;;  %v10502_v37 = vadd.f32 %v5042_v27, %v5002_v28  ;;  %v5004_v31 = vadd.f32 %v5003_v29, %v10303_v45  ;;  %5327 = vmatprep.mubr.bf16.mxu0 %v9309_v60  ;;  %v8348_v60 = vld [vmem:[%s12115_s1 + $0x28c] ss:$16 sps:$4 sm:$0xff]   ;;  %v8373_v16 = vld [vmem:[%s12115_s1 + $0x1e8] ss:$16 sps:$4 sm:$0xff]  }
 0x186   :  { %5368 = vmatprep.mubr.bf16.mxu1 %v9322_v0  ;;  %v5005_v40 = vpop.f32.mrf.mxu0  ;;  %v8343_v0 = vld [vmem:[%s12115_s1 + $0x88] ss:$16 sps:$4 sm:$0xff]   ;;  %v8378_v15 = vld [vmem:[%s12115_s1 + $0x3ec] ss:$16 sps:$4 sm:$0xff]  }
 0x187   :  { %v5046_v44 = vpop.f32.mrf.mxu1  ;;  %v10513_v46 = vadd.f32 %v5044_v30, %v5004_v31  ;;  %5298 = vmatpush1.bf16.msra.mxu0 %v8331_v20  ;;  %v8376_v20 = vld [vmem:[%s12115_s1 + $0x3e8] ss:$16 sps:$4 sm:$0xff]   ;;  %v8387_v29 = vld [vmem:[%s12115_s1 + $0x1ac] ss:$16 sps:$4 sm:$0xff]  }
 0x188   :  { %5339 = vmatpush1.bf16.msra.mxu1 %v8334_v21  ;;  %v5006_v38 = vpop.f32.mrf.mxu0  ;;  %5299 = vmatprep.subr.bf16.mxu0 %v8339_v33  ;;  %v8381_v21 = vld [vmem:[%s12115_s1 + $0x1cc] ss:$16 sps:$4 sm:$0xff]   ;;  %v8379_v27 = vld [vmem:[%s12115_s1 + $0x1c8] ss:$16 sps:$4 sm:$0xff]  }
 0x189   :  { %v5047_v45 = vpop.f32.mrf.mxu1  ;;  %5340 = vmatprep.subr.bf16.mxu1 %v8342_v34  ;;  %v8382_v28 = vld [vmem:[%s12115_s1 + $0x3c8] ss:$16 sps:$4 sm:$0xff]   ;;  %v8390_v30 = vld [vmem:[%s12115_s1 + $0x3ac] ss:$16 sps:$4 sm:$0xff]  }
 0x18a   :  { %v8385_v33 = vld [vmem:[%s12115_s1 + $0x1a8] ss:$16 sps:$4 sm:$0xff]   ;;  %v8393_v31 = vld [vmem:[%s12115_s1 + $0x18c] ss:$16 sps:$4 sm:$0xff]  }
 0x18b   :  { %5300 = vmatpush1.bf16.msra.mxu0 %v8337_v36  ;;  %v8388_v34 = vld [vmem:[%s12115_s1 + $0x3a8] ss:$16 sps:$4 sm:$0xff]   ;;  %v8396_v36 = vld [vmem:[%s12115_s1 + $0x38c] ss:$16 sps:$4 sm:$0xff]  }
 0x18c   :  { %5341 = vmatpush1.bf16.msra.mxu1 %v8340_v32  ;;  %5301 = vmatprep.subr.bf16.mxu0 %v8345_v47  ;;  %v8391_v32 = vld [vmem:[%s12115_s1 + $0x188] ss:$16 sps:$4 sm:$0xff]   ;;  %v8399_v44 = vld [vmem:[%s12115_s1 + $0x16c] ss:$16 sps:$4 sm:$0xff]  }
 0x18d   :  { %5342 = vmatprep.subr.bf16.mxu1 %v8348_v60  ;;  %v8394_v40 = vld [vmem:[%s12115_s1 + $0x388] ss:$16 sps:$4 sm:$0xff]   ;;  %v8402_v38 = vld [vmem:[%s12115_s1 + $0x36c] ss:$16 sps:$4 sm:$0xff]  }
 0x18e   :  { %v8397_v45 = vld [vmem:[%s12115_s1 + $0x168] ss:$16 sps:$4 sm:$0xff]   ;;  %v8405_v60 = vld [vmem:[%s12115_s1 + $0x14c] ss:$16 sps:$4 sm:$0xff]  }
 0x18f   :  { %5302 = vmatpush1.bf16.msra.mxu0 %v8343_v0  ;;  %v8400_v47 = vld [vmem:[%s12115_s1 + $0x368] ss:$16 sps:$4 sm:$0xff]   ;;  %v8408_v0 = vld [vmem:[%s12115_s1 + $0x34c] ss:$16 sps:$4 sm:$0xff]  }
 0x190   :  { %5343 = vmatpush1.bf16.msra.mxu1 %v8346_v50  ;;  %5303 = vmatprep.subr.bf16.mxu0 %v8351_v51  ;;  %v8403_v50 = vld [vmem:[%s12115_s1 + $0x148] ss:$16 sps:$4 sm:$0xff]  }
 0x191   :  { %5344 = vmatprep.subr.bf16.mxu1 %v8354_v52  ;;  %v8406_v51 = vld [vmem:[%s12115_s1 + $0x348] ss:$16 sps:$4 sm:$0xff]   ;;  %v8411_v52 = vld [vmem:[%s12115_s1 + $0x12c] ss:$16 sps:$4 sm:$0xff]  }
 0x193   :  { %5304 = vmatpush1.bf16.msra.mxu0 %v8349_v35  ;;  %v8414_v35 = vld [vmem:[%s12115_s1 + $0x32c] ss:$16 sps:$4 sm:$0xff]  }
 0x194   :  { %5345 = vmatpush1.bf16.msra.mxu1 %v8352_v55  ;;  %5305 = vmatprep.subr.bf16.mxu0 %v8357_v56  ;;  %v8409_v55 = vld [vmem:[%s12115_s1 + $0x128] ss:$16 sps:$4 sm:$0xff]  }
 0x195   :  { %5346 = vmatprep.subr.bf16.mxu1 %v8360_v63  ;;  %v8412_v56 = vld [vmem:[%s12115_s1 + $0x328] ss:$16 sps:$4 sm:$0xff]   ;;  %v8417_v63 = vld [vmem:[%s12115_s1 + $0x10c] ss:$16 sps:$4 sm:$0xff]  }
 0x197   :  { %5306 = vmatpush1.bf16.msra.mxu0 %v8355_v58  ;;  %v8420_v58 = vld [vmem:[%s12115_s1 + $0x30c] ss:$16 sps:$4 sm:$0xff]  }
 0x198   :  { %5347 = vmatpush1.bf16.msra.mxu1 %v8358_v61  ;;  %5307 = vmatprep.subr.bf16.mxu0 %v8363_v62  ;;  %v8415_v61 = vld [vmem:[%s12115_s1 + $0x108] ss:$16 sps:$4 sm:$0xff]  }
 0x199   :  { %5348 = vmatprep.subr.bf16.mxu1 %v8366_v1  ;;  %v8418_v62 = vld [vmem:[%s12115_s1 + $0x308] ss:$16 sps:$4 sm:$0xff]   ;;  %v8423_v1 = vld [vmem:[%s12115_s1 + $0x4ec] ss:$16 sps:$4 sm:$0xff]  }
 0x19b   :  { %5308 = vmatpush1.bf16.msra.mxu0 %v8361_v2  ;;  %v8426_v2 = vld [vmem:[%s12115_s1 + $0x6ec] ss:$16 sps:$4 sm:$0xff]  }
 0x19c   :  { %5349 = vmatpush1.bf16.msra.mxu1 %v8364_v7  ;;  %5309 = vmatprep.subr.bf16.mxu0 %v8369_v8  ;;  %v8421_v7 = vld [vmem:[%s12115_s1 + $0x4e8] ss:$16 sps:$4 sm:$0xff]  }
 0x19d   :  { %5350 = vmatprep.subr.bf16.mxu1 %v8372_v4  ;;  %v8424_v8 = vld [vmem:[%s12115_s1 + $0x6e8] ss:$16 sps:$4 sm:$0xff]   ;;  %v8429_v4 = vld [vmem:[%s12115_s1 + $0x4cc] ss:$16 sps:$4 sm:$0xff]  }
 0x19f   :  { %5310 = vmatpush1.bf16.msra.mxu0 %v8367_v49  ;;  %v8432_v49 = vld [vmem:[%s12115_s1 + $0x6cc] ss:$16 sps:$4 sm:$0xff]  }
 0x1a0   :  { %5351 = vmatpush1.bf16.msra.mxu1 %v8370_v57  ;;  %5311 = vmatprep.subr.bf16.mxu0 %v8375_v9  ;;  %v8427_v57 = vld [vmem:[%s12115_s1 + $0x4c8] ss:$16 sps:$4 sm:$0xff]  }
 0x1a1   :  { %5352 = vmatprep.subr.bf16.mxu1 %v8378_v15  ;;  %v8430_v9 = vld [vmem:[%s12115_s1 + $0x6c8] ss:$16 sps:$4 sm:$0xff]  }
 0x1a3   :  { %5312 = vmatpush2.bf16.msra.mxu0 %v8373_v16 }
 0x1a4   :  { %5353 = vmatpush2.bf16.msra.mxu1 %v8376_v20  ;;  %5313 = vmatprep.subr.bf16.mxu0 %v8381_v21 }
 0x1a5   :  { %5354 = vmatprep.subr.bf16.mxu1 %v8384_v24 }
 0x1a7   :  { %5314 = vmatpush2.bf16.msra.mxu0 %v8379_v27  ;;  %v8435_v27 = vld [vmem:[%s12115_s1 + $0x4ac] ss:$16 sps:$4 sm:$0xff]  }
 0x1a8   :  { %5355 = vmatpush2.bf16.msra.mxu1 %v8382_v28  ;;  %5315 = vmatprep.subr.bf16.mxu0 %v8387_v29  ;;  %v8438_v28 = vld [vmem:[%s12115_s1 + $0x6ac] ss:$16 sps:$4 sm:$0xff]  }
 0x1a9   :  { %5356 = vmatprep.subr.bf16.mxu1 %v8390_v30 }
 0x1ab   :  { %5316 = vmatpush2.bf16.msra.mxu0 %v8385_v33 }
 0x1ac   :  { %5357 = vmatpush2.bf16.msra.mxu1 %v8388_v34  ;;  %5317 = vmatprep.subr.bf16.mxu0 %v8393_v31 }
 0x1ad   :  { %5358 = vmatprep.subr.bf16.mxu1 %v8396_v36  ;;  %v8441_v36 = vld [vmem:[%s12115_s1 + $0x48c] ss:$16 sps:$4 sm:$0xff]  }
 0x1af   :  { %5318 = vmatpush2.bf16.msra.mxu0 %v8391_v32  ;;  %v8442_v32 = vld [vmem:[%s12115_s1 + $0x688] ss:$16 sps:$4 sm:$0xff]  }
 0x1b0   :  { %5359 = vmatpush2.bf16.msra.mxu1 %v8394_v40  ;;  %5319 = vmatprep.subr.bf16.mxu0 %v8399_v44  ;;  %v8447_v40 = vld [vmem:[%s12115_s1 + $0x46c] ss:$16 sps:$4 sm:$0xff]  }
 0x1b1   :  { %5360 = vmatprep.subr.bf16.mxu1 %v8402_v38  ;;  %v8450_v44 = vld [vmem:[%s12115_s1 + $0x66c] ss:$16 sps:$4 sm:$0xff]   ;;  %v8445_v38 = vld [vmem:[%s12115_s1 + $0x468] ss:$16 sps:$4 sm:$0xff]  }
 0x1b3   :  { %5320 = vmatpush2.bf16.msra.mxu0 %v8397_v45  ;;  %v8448_v45 = vld [vmem:[%s12115_s1 + $0x668] ss:$16 sps:$4 sm:$0xff]  }
 0x1b4   :  { %5361 = vmatpush2.bf16.msra.mxu1 %v8400_v47  ;;  %5321 = vmatprep.subr.bf16.mxu0 %v8405_v60  ;;  %v8453_v47 = vld [vmem:[%s12115_s1 + $0x44c] ss:$16 sps:$4 sm:$0xff]  }
 0x1b5   :  { %5362 = vmatprep.subr.bf16.mxu1 %v8408_v0  ;;  %v8456_v60 = vld [vmem:[%s12115_s1 + $0x64c] ss:$16 sps:$4 sm:$0xff]   ;;  %v8451_v0 = vld [vmem:[%s12115_s1 + $0x448] ss:$16 sps:$4 sm:$0xff]  }
 0x1b7   :  { %5322 = vmatpush2.bf16.msra.mxu0 %v8403_v50  ;;  %v8454_v50 = vld [vmem:[%s12115_s1 + $0x648] ss:$16 sps:$4 sm:$0xff]  }
 0x1b8   :  { %5363 = vmatpush2.bf16.msra.mxu1 %v8406_v51  ;;  %5323 = vmatprep.subr.bf16.mxu0 %v8411_v52  ;;  %v8459_v51 = vld [vmem:[%s12115_s1 + $0x42c] ss:$16 sps:$4 sm:$0xff]  }
 0x1b9   :  { %5364 = vmatprep.subr.bf16.mxu1 %v8414_v35  ;;  %v8462_v52 = vld [vmem:[%s12115_s1 + $0x62c] ss:$16 sps:$4 sm:$0xff]   ;;  %v8457_v35 = vld [vmem:[%s12115_s1 + $0x428] ss:$16 sps:$4 sm:$0xff]  }
 0x1bb   :  { %5324 = vmatpush2.bf16.msra.mxu0 %v8409_v55  ;;  %v8460_v55 = vld [vmem:[%s12115_s1 + $0x628] ss:$16 sps:$4 sm:$0xff]  }
 0x1bc   :  { %5365 = vmatpush2.bf16.msra.mxu1 %v8412_v56  ;;  %5325 = vmatprep.subr.bf16.mxu0 %v8417_v63  ;;  %v8465_v56 = vld [vmem:[%s12115_s1 + $0x40c] ss:$16 sps:$4 sm:$0xff]  }
 0x1bd   :  { %5366 = vmatprep.subr.bf16.mxu1 %v8420_v58  ;;  %v8468_v63 = vld [vmem:[%s12115_s1 + $0x60c] ss:$16 sps:$4 sm:$0xff]   ;;  %v8463_v58 = vld [vmem:[%s12115_s1 + $0x408] ss:$16 sps:$4 sm:$0xff]  }
 0x1bf   :  { %5326 = vmatpush2.bf16.msra.mxu0 %v8415_v61  ;;  %v8466_v61 = vld [vmem:[%s12115_s1 + $0x608] ss:$16 sps:$4 sm:$0xff]  }
 0x1c0   :  { %5367 = vmatpush2.bf16.msra.mxu1 %v8418_v62  ;;  %5377 = vmatprep.subr.bf16.mxu0 %v8423_v1  ;;  %v8471_v62 = vld [vmem:[%s12115_s1 + $0x5ec] ss:$16 sps:$4 sm:$0xff]  }
 0x1c1   :  { %5418 = vmatprep.subr.bf16.mxu1 %v8426_v2  ;;  %v8474_v1 = vld [vmem:[%s12115_s1 + $0x7ec] ss:$16 sps:$4 sm:$0xff]   ;;  %v8469_v2 = vld [vmem:[%s12115_s1 + $0x5e8] ss:$16 sps:$4 sm:$0xff]  }
 0x1c2   :  { %v5083_v15 = vpop.f32.mrf.mxu0  ;;  %5328 = vmatmul.mubr.bf16.vlgmr.msra.gmra.mxu0 %v9359_v13 }
 0x1c3   :  { %v5124_v16 = vpop.f32.mrf.mxu1  ;;  %5369 = vmatmul.mubr.bf16.vlgmr.msra.gmra.mxu1 %v9375_v18  ;;  %v5084_v20 = vadd.f32 %v5083_v15, %v10502_v37  ;;  %5378 = vmatpush1.bf16.msra.mxu0 %v8421_v7  ;;  %v8433_v18 = vld [vmem:[%s12115_s1 + $0x4a8] ss:$16 sps:$4 sm:$0xff]   ;;  %v8486_v15 = vld [vmem:[%s12115_s1 + $0x7ac] ss:$16 sps:$4 sm:$0xff]  }
 0x1c4   :  { %5419 = vmatpush1.bf16.msra.mxu1 %v8424_v8  ;;  %v5085_v21 = vpop.f32.mrf.mxu0  ;;  %5379 = vmatprep.subr.bf16.mxu0 %v8429_v4  ;;  %v8436_v37 = vld [vmem:[%s12115_s1 + $0x6a8] ss:$16 sps:$4 sm:$0xff]   ;;  %v8477_v8 = vld [vmem:[%s12115_s1 + $0x5cc] ss:$16 sps:$4 sm:$0xff]  }
 0x1c5   :  { %v5126_v24 = vpop.f32.mrf.mxu1  ;;  %5420 = vmatprep.subr.bf16.mxu1 %v8432_v49  ;;  %v10704_v29 = vadd.f32 %v5124_v16, %v5084_v20  ;;  %v5086_v13 = vadd.f32 %v5085_v21, %v10513_v46  ;;  %5409 = vmatprep.mubr.bf16.mxu0 %v9371_v17  ;;  %v8444_v17 = vld [vmem:[%s12115_s1 + $0x68c] ss:$16 sps:$4 sm:$0xff]   ;;  %v8472_v7 = vld [vmem:[%s12115_s1 + $0x7e8] ss:$16 sps:$4 sm:$0xff]  }
 0x1c6   :  { %5450 = vmatprep.mubr.bf16.mxu1 %v9391_v23  ;;  %v5087_v30 = vpop.f32.mrf.mxu0  ;;  %v8439_v23 = vld [vmem:[%s12115_s1 + $0x488] ss:$16 sps:$4 sm:$0xff]   ;;  %v8480_v4 = vld [vmem:[%s12115_s1 + $0x7cc] ss:$16 sps:$4 sm:$0xff]  }
 0x1c7   :  { %v5128_v33 = vpop.f32.mrf.mxu1  ;;  %v10715_v34 = vadd.f32 %v5126_v24, %v5086_v13  ;;  %5380 = vmatpush1.bf16.msra.mxu0 %v8427_v57  ;;  %v8475_v49 = vld [vmem:[%s12115_s1 + $0x5c8] ss:$16 sps:$4 sm:$0xff]   ;;  %v8489_v21 = vld [vmem:[%s12115_s1 + $0x58c] ss:$16 sps:$4 sm:$0xff]  }
 0x1c8   :  { %5421 = vmatpush1.bf16.msra.mxu1 %v8430_v9  ;;  %v5088_v31 = vpop.f32.mrf.mxu0  ;;  %5381 = vmatprep.subr.bf16.mxu0 %v8435_v27  ;;  %v8478_v57 = vld [vmem:[%s12115_s1 + $0x7c8] ss:$16 sps:$4 sm:$0xff]   ;;  %v8483_v9 = vld [vmem:[%s12115_s1 + $0x5ac] ss:$16 sps:$4 sm:$0xff]  }
 0x1c9   :  { %v5129_v46 = vpop.f32.mrf.mxu1  ;;  %5422 = vmatprep.subr.bf16.mxu1 %v8438_v28  ;;  %v8481_v16 = vld [vmem:[%s12115_s1 + $0x5a8] ss:$16 sps:$4 sm:$0xff]   ;;  %v8492_v24 = vld [vmem:[%s12115_s1 + $0x78c] ss:$16 sps:$4 sm:$0xff]  }
 0x1ca   :  { %v8484_v20 = vld [vmem:[%s12115_s1 + $0x7a8] ss:$16 sps:$4 sm:$0xff]   ;;  %v8495_v13 = vld [vmem:[%s12115_s1 + $0x56c] ss:$16 sps:$4 sm:$0xff]  }
 0x1cb   :  { %5382 = vmatpush1.bf16.msra.mxu0 %v8433_v18  ;;  %v8487_v27 = vld [vmem:[%s12115_s1 + $0x588] ss:$16 sps:$4 sm:$0xff]   ;;  %v8498_v18 = vld [vmem:[%s12115_s1 + $0x76c] ss:$16 sps:$4 sm:$0xff]  }
 0x1cc   :  { %5423 = vmatpush1.bf16.msra.mxu1 %v8436_v37  ;;  %5383 = vmatprep.subr.bf16.mxu0 %v8441_v36  ;;  %v8490_v28 = vld [vmem:[%s12115_s1 + $0x788] ss:$16 sps:$4 sm:$0xff]   ;;  %v8501_v33 = vld [vmem:[%s12115_s1 + $0x54c] ss:$16 sps:$4 sm:$0xff]  }
 0x1cd   :  { %5424 = vmatprep.subr.bf16.mxu1 %v8444_v17  ;;  %v8493_v37 = vld [vmem:[%s12115_s1 + $0x568] ss:$16 sps:$4 sm:$0xff]   ;;  %v8504_v31 = vld [vmem:[%s12115_s1 + $0x74c] ss:$16 sps:$4 sm:$0xff]  }
 0x1ce   :  { %v8496_v30 = vld [vmem:[%s12115_s1 + $0x768] ss:$16 sps:$4 sm:$0xff]   ;;  %v8507_v17 = vld [vmem:[%s12115_s1 + $0x52c] ss:$16 sps:$4 sm:$0xff]  }
 0x1cf   :  { %5384 = vmatpush1.bf16.msra.mxu0 %v8439_v23  ;;  %v8499_v46 = vld [vmem:[%s12115_s1 + $0x548] ss:$16 sps:$4 sm:$0xff]   ;;  %v8510_v23 = vld [vmem:[%s12115_s1 + $0x72c] ss:$16 sps:$4 sm:$0xff]  }
 0x1d0   :  { %5425 = vmatpush1.bf16.msra.mxu1 %v8442_v32  ;;  %5385 = vmatprep.subr.bf16.mxu0 %v8447_v40  ;;  %v8502_v36 = vld [vmem:[%s12115_s1 + $0x748] ss:$16 sps:$4 sm:$0xff]  }
 0x1d1   :  { %5426 = vmatprep.subr.bf16.mxu1 %v8450_v44  ;;  %v8505_v32 = vld [vmem:[%s12115_s1 + $0x528] ss:$16 sps:$4 sm:$0xff]   ;;  %v8513_v44 = vld [vmem:[%s12115_s1 + $0x50c] ss:$16 sps:$4 sm:$0xff]  }
 0x1d2   :  { %v8508_v40 = vld [vmem:[%s12115_s1 + $0x728] ss:$16 sps:$4 sm:$0xff]  }
 0x1d3   :  { %5386 = vmatpush1.bf16.msra.mxu0 %v8445_v38  ;;  %v8516_v38 = vld [vmem:[%s12115_s1 + $0x70c] ss:$16 sps:$4 sm:$0xff]  }
 0x1d4   :  { %5427 = vmatpush1.bf16.msra.mxu1 %v8448_v45  ;;  %5387 = vmatprep.subr.bf16.mxu0 %v8453_v47  ;;  %v8511_v45 = vld [vmem:[%s12115_s1 + $0x508] ss:$16 sps:$4 sm:$0xff]  }
 0x1d5   :  { %5428 = vmatprep.subr.bf16.mxu1 %v8456_v60  ;;  %v8514_v47 = vld [vmem:[%s12115_s1 + $0x708] ss:$16 sps:$4 sm:$0xff]   ;;  %v8519_v60 = vld [vmem:[%s12115_s1 + $0x8ec] ss:$16 sps:$4 sm:$0xff]  }
 0x1d7   :  { %5388 = vmatpush1.bf16.msra.mxu0 %v8451_v0  ;;  %v8522_v0 = vld [vmem:[%s12115_s1 + $0xaec] ss:$16 sps:$4 sm:$0xff]  }
 0x1d8   :  { %5429 = vmatpush1.bf16.msra.mxu1 %v8454_v50  ;;  %5389 = vmatprep.subr.bf16.mxu0 %v8459_v51  ;;  %v8517_v50 = vld [vmem:[%s12115_s1 + $0x8e8] ss:$16 sps:$4 sm:$0xff]  }
 0x1d9   :  { %5430 = vmatprep.subr.bf16.mxu1 %v8462_v52  ;;  %v8520_v51 = vld [vmem:[%s12115_s1 + $0xae8] ss:$16 sps:$4 sm:$0xff]   ;;  %v8525_v52 = vld [vmem:[%s12115_s1 + $0x8cc] ss:$16 sps:$4 sm:$0xff]  }
 0x1db   :  { %5390 = vmatpush1.bf16.msra.mxu0 %v8457_v35  ;;  %v8528_v35 = vld [vmem:[%s12115_s1 + $0xacc] ss:$16 sps:$4 sm:$0xff]  }
 0x1dc   :  { %5431 = vmatpush1.bf16.msra.mxu1 %v8460_v55  ;;  %5391 = vmatprep.subr.bf16.mxu0 %v8465_v56 }
 0x1dd   :  { %5432 = vmatprep.subr.bf16.mxu1 %v8468_v63 }
 0x1df   :  { %5392 = vmatpush1.bf16.msra.mxu0 %v8463_v58 }
 0x1e0   :  { %5433 = vmatpush1.bf16.msra.mxu1 %v8466_v61  ;;  %5393 = vmatprep.subr.bf16.mxu0 %v8471_v62 }
 0x1e1   :  { %5434 = vmatprep.subr.bf16.mxu1 %v8474_v1 }
 0x1e3   :  { %5394 = vmatpush2.bf16.msra.mxu0 %v8469_v2 }
 0x1e4   :  { %5435 = vmatpush2.bf16.msra.mxu1 %v8472_v7  ;;  %5395 = vmatprep.subr.bf16.mxu0 %v8477_v8 }
 0x1e5   :  { %5436 = vmatprep.subr.bf16.mxu1 %v8480_v4 }
 0x1e7   :  { %5396 = vmatpush2.bf16.msra.mxu0 %v8475_v49 }
 0x1e8   :  { %5437 = vmatpush2.bf16.msra.mxu1 %v8478_v57  ;;  %5397 = vmatprep.subr.bf16.mxu0 %v8483_v9 }
 0x1e9   :  { %5438 = vmatprep.subr.bf16.mxu1 %v8486_v15 }
 0x1eb   :  { %5398 = vmatpush2.bf16.msra.mxu0 %v8481_v16 }
 0x1ec   :  { %5439 = vmatpush2.bf16.msra.mxu1 %v8484_v20  ;;  %5399 = vmatprep.subr.bf16.mxu0 %v8489_v21 }
 0x1ed   :  { %5440 = vmatprep.subr.bf16.mxu1 %v8492_v24 }
 0x1ef   :  { %5400 = vmatpush2.bf16.msra.mxu0 %v8487_v27 }
 0x1f0   :  { %5441 = vmatpush2.bf16.msra.mxu1 %v8490_v28  ;;  %5401 = vmatprep.subr.bf16.mxu0 %v8495_v13 }
 0x1f1   :  { %5442 = vmatprep.subr.bf16.mxu1 %v8498_v18 }
 0x1f3   :  { %5402 = vmatpush2.bf16.msra.mxu0 %v8493_v37 }
 0x1f4   :  { %5443 = vmatpush2.bf16.msra.mxu1 %v8496_v30  ;;  %5403 = vmatprep.subr.bf16.mxu0 %v8501_v33 }
 0x1f5   :  { %5444 = vmatprep.subr.bf16.mxu1 %v8504_v31 }
 0x1f7   :  { %5404 = vmatpush2.bf16.msra.mxu0 %v8499_v46 }
 0x1f8   :  { %5445 = vmatpush2.bf16.msra.mxu1 %v8502_v36  ;;  %5405 = vmatprep.subr.bf16.mxu0 %v8507_v17 }
 0x1f9   :  { %5446 = vmatprep.subr.bf16.mxu1 %v8510_v23 }
 0x1fb   :  { %5406 = vmatpush2.bf16.msra.mxu0 %v8505_v32 }
 0x1fc   :  { %5447 = vmatpush2.bf16.msra.mxu1 %v8508_v40  ;;  %5407 = vmatprep.subr.bf16.mxu0 %v8513_v44 }
 0x1fd   :  { %5448 = vmatprep.subr.bf16.mxu1 %v8516_v38 }
 0x1ff   :  { %5408 = vmatpush2.bf16.msra.mxu0 %v8511_v45 }
 0x200   :  { %5449 = vmatpush2.bf16.msra.mxu1 %v8514_v47  ;;  %5459 = vmatprep.subr.bf16.mxu0 %v8519_v60 }
 0x201   :  { %5500 = vmatprep.subr.bf16.mxu1 %v8522_v0 }
 0x202   :  { %9 = vsyncpa [#allocation3], 0  ;;  %v5165_v55 = vpop.f32.mrf.mxu0  ;;  %5410 = vmatmul.mubr.bf16.vlgmr.msra.gmra.mxu0 %v9570_v26  ;;  %v8523_v58 = vld [vmem:[%s12115_s1 + $0x8c8] ss:$16 sps:$4 sm:$0xff]   ;;  %v8531_v26 = vld [vmem:[%s12115_s1 + $0x8ac] ss:$16 sps:$4 sm:$0xff]  }
 0x203   :  { %v5206_v56 = vpop.f32.mrf.mxu1  ;;  %5451 = vmatmul.mubr.bf16.vlgmr.msra.gmra.mxu1 %v9583_v6  ;;  %v5166_v63 = vadd.f32 %v5165_v55, %v10704_v29  ;;  %5460 = vmatpush1.bf16.msra.mxu0 %v8517_v50  ;;  %v8526_v61 = vld [vmem:[%s12115_s1 + $0xac8] ss:$16 sps:$4 sm:$0xff]   ;;  %v8534_v6 = vld [vmem:[%s12115_s1 + $0xaac] ss:$16 sps:$4 sm:$0xff]   ;;  %vm6750_vm0 = vcmask 1041408   ;;  %vm6812_vm2 = vcmask 1024  }
 0x204   :  { %5501 = vmatpush1.bf16.msra.mxu1 %v8520_v51  ;;  %v5167_v62 = vpop.f32.mrf.mxu0  ;;  %5461 = vmatprep.subr.bf16.mxu0 %v8525_v52  ;;  %v8529_v49 = vld [vmem:[%s12115_s1 + $0x8a8] ss:$16 sps:$4 sm:$0xff]   ;;  %v8543_v20 = vld [vmem:[%s12115_s1 + $0x86c] ss:$16 sps:$4 sm:$0xff]   ;;  %vm6828_vm3 = vcmask 0  }
 0x205   :  { %v5208_v1 = vpop.f32.mrf.mxu1  ;;  %5502 = vmatprep.subr.bf16.mxu1 %v8528_v35  ;;  %v10906_v29 = vadd.f32 %v5206_v56, %v5166_v63  ;;  %v5168_v2 = vadd.f32 %v5167_v62, %v10715_v34  ;;  %5491 = vmatprep.mubr.bf16.mxu0 %v9623_v41  ;;  %v8532_v57 = vld [vmem:[%s12115_s1 + $0xaa8] ss:$16 sps:$4 sm:$0xff]   ;;  %v8537_v41 = vld [vmem:[%s12115_s1 + $0x88c] ss:$16 sps:$4 sm:$0xff]  }
 0x206   :  { %5532 = vmatprep.mubr.bf16.mxu1 %v9628_v42  ;;  %v5169_v7 = vpop.f32.mrf.mxu0  ;;  %v8540_v42 = vld [vmem:[%s12115_s1 + $0xa8c] ss:$16 sps:$4 sm:$0xff]   ;;  %v8535_v15 = vld [vmem:[%s12115_s1 + $0x888] ss:$16 sps:$4 sm:$0xff]  }
 0x207   :  { %v5210_v8 = vpop.f32.mrf.mxu1  ;;  %v10911_v4 = vadd.f32 %v5208_v1, %v5168_v2  ;;  %5462 = vmatpush1.bf16.msra.mxu0 %v8523_v58  ;;  %v8538_v16 = vld [vmem:[%s12115_s1 + $0xa88] ss:$16 sps:$4 sm:$0xff]   ;;  %v8546_v21 = vld [vmem:[%s12115_s1 + $0xa6c] ss:$16 sps:$4 sm:$0xff]  }
 0x208   :  { %5503 = vmatpush1.bf16.msra.mxu1 %v8526_v61  ;;  %v5170_v9 = vpop.f32.mrf.mxu0  ;;  %5463 = vmatprep.subr.bf16.mxu0 %v8531_v26  ;;  %v8541_v24 = vld [vmem:[%s12115_s1 + $0x868] ss:$16 sps:$4 sm:$0xff]   ;;  %v8549_v28 = vld [vmem:[%s12115_s1 + $0x84c] ss:$16 sps:$4 sm:$0xff]  }
 0x209   :  { %v5211_v34 = vpop.f32.mrf.mxu1  ;;  %5504 = vmatprep.subr.bf16.mxu1 %v8534_v6  ;;  %v8544_v27 = vld [vmem:[%s12115_s1 + $0xa68] ss:$16 sps:$4 sm:$0xff]   ;;  %v8552_v13 = vld [vmem:[%s12115_s1 + $0xa4c] ss:$16 sps:$4 sm:$0xff]  }
 0x20a   :  { %v8547_v18 = vld [vmem:[%s12115_s1 + $0x848] ss:$16 sps:$4 sm:$0xff]   ;;  %v8555_v30 = vld [vmem:[%s12115_s1 + $0x82c] ss:$16 sps:$4 sm:$0xff]  }
 0x20b   :  { %5464 = vmatpush1.bf16.msra.mxu0 %v8529_v49  ;;  %v8550_v37 = vld [vmem:[%s12115_s1 + $0xa48] ss:$16 sps:$4 sm:$0xff]   ;;  %v8558_v33 = vld [vmem:[%s12115_s1 + $0xa2c] ss:$16 sps:$4 sm:$0xff]  }
 0x20c   :  { %5505 = vmatpush1.bf16.msra.mxu1 %v8532_v57  ;;  %5465 = vmatprep.subr.bf16.mxu0 %v8537_v41  ;;  %v8553_v31 = vld [vmem:[%s12115_s1 + $0x828] ss:$16 sps:$4 sm:$0xff]   ;;  %v8561_v36 = vld [vmem:[%s12115_s1 + $0x80c] ss:$16 sps:$4 sm:$0xff]  }
 0x20d   :  { %5506 = vmatprep.subr.bf16.mxu1 %v8540_v42  ;;  %v8556_v46 = vld [vmem:[%s12115_s1 + $0xa28] ss:$16 sps:$4 sm:$0xff]   ;;  %v8564_v17 = vld [vmem:[%s12115_s1 + $0xa0c] ss:$16 sps:$4 sm:$0xff]  }
 0x20e   :  { %v8559_v23 = vld [vmem:[%s12115_s1 + $0x808] ss:$16 sps:$4 sm:$0xff]   ;;  %v8567_v40 = vld [vmem:[%s12115_s1 + $0x9ec] ss:$16 sps:$4 sm:$0xff]  }
 0x20f   :  { %5466 = vmatpush1.bf16.msra.mxu0 %v8535_v15  ;;  %v8562_v32 = vld [vmem:[%s12115_s1 + $0xa08] ss:$16 sps:$4 sm:$0xff]   ;;  %v8570_v44 = vld [vmem:[%s12115_s1 + $0xbec] ss:$16 sps:$4 sm:$0xff]  }
 0x210   :  { %5507 = vmatpush1.bf16.msra.mxu1 %v8538_v16  ;;  %5467 = vmatprep.subr.bf16.mxu0 %v8543_v20  ;;  %v8565_v38 = vld [vmem:[%s12115_s1 + $0x9e8] ss:$16 sps:$4 sm:$0xff]   ;;  %v8573_v47 = vld [vmem:[%s12115_s1 + $0x9cc] ss:$16 sps:$4 sm:$0xff]  }
 0x211   :  { %5508 = vmatprep.subr.bf16.mxu1 %v8546_v21  ;;  %v8568_v45 = vld [vmem:[%s12115_s1 + $0xbe8] ss:$16 sps:$4 sm:$0xff]   ;;  %v8576_v60 = vld [vmem:[%s12115_s1 + $0xbcc] ss:$16 sps:$4 sm:$0xff]  }
 0x212   :  { %v8571_v0 = vld [vmem:[%s12115_s1 + $0x9c8] ss:$16 sps:$4 sm:$0xff]   ;;  %v8579_v51 = vld [vmem:[%s12115_s1 + $0x9ac] ss:$16 sps:$4 sm:$0xff]  }
 0x213   :  { %5468 = vmatpush1.bf16.msra.mxu0 %v8541_v24  ;;  %v8574_v50 = vld [vmem:[%s12115_s1 + $0xbc8] ss:$16 sps:$4 sm:$0xff]   ;;  %v8582_v52 = vld [vmem:[%s12115_s1 + $0xbac] ss:$16 sps:$4 sm:$0xff]  }
 0x214   :  { %5509 = vmatpush1.bf16.msra.mxu1 %v8544_v27  ;;  %5469 = vmatprep.subr.bf16.mxu0 %v8549_v28  ;;  %v8577_v35 = vld [vmem:[%s12115_s1 + $0x9a8] ss:$16 sps:$4 sm:$0xff]   ;;  %v8585_v56 = vld [vmem:[%s12115_s1 + $0x98c] ss:$16 sps:$4 sm:$0xff]  }
 0x215   :  { %5510 = vmatprep.subr.bf16.mxu1 %v8552_v13  ;;  %v8580_v55 = vld [vmem:[%s12115_s1 + $0xba8] ss:$16 sps:$4 sm:$0xff]   ;;  %v8588_v63 = vld [vmem:[%s12115_s1 + $0xb8c] ss:$16 sps:$4 sm:$0xff]  }
 0x216   :  { %v8583_v58 = vld [vmem:[%s12115_s1 + $0x988] ss:$16 sps:$4 sm:$0xff]   ;;  %v8591_v62 = vld [vmem:[%s12115_s1 + $0x96c] ss:$16 sps:$4 sm:$0xff]  }
 0x217   :  { %5470 = vmatpush1.bf16.msra.mxu0 %v8547_v18  ;;  %v8586_v61 = vld [vmem:[%s12115_s1 + $0xb88] ss:$16 sps:$4 sm:$0xff]   ;;  %v8594_v1 = vld [vmem:[%s12115_s1 + $0xb6c] ss:$16 sps:$4 sm:$0xff]  }
 0x218   :  { %5511 = vmatpush1.bf16.msra.mxu1 %v8550_v37  ;;  %5471 = vmatprep.subr.bf16.mxu0 %v8555_v30  ;;  %v8589_v26 = vld [vmem:[%s12115_s1 + $0x968] ss:$16 sps:$4 sm:$0xff]   ;;  %v8597_v2 = vld [vmem:[%s12115_s1 + $0x94c] ss:$16 sps:$4 sm:$0xff]  }
 0x219   :  { %5512 = vmatprep.subr.bf16.mxu1 %v8558_v33  ;;  %v8592_v6 = vld [vmem:[%s12115_s1 + $0xb68] ss:$16 sps:$4 sm:$0xff]   ;;  %v8600_v7 = vld [vmem:[%s12115_s1 + $0xb4c] ss:$16 sps:$4 sm:$0xff]  }
 0x21a   :  { %v8595_v8 = vld [vmem:[%s12115_s1 + $0x948] ss:$16 sps:$4 sm:$0xff]   ;;  %v8603_v57 = vld [vmem:[%s12115_s1 + $0x92c] ss:$16 sps:$4 sm:$0xff]  }
 0x21b   :  { %5472 = vmatpush1.bf16.msra.mxu0 %v8553_v31  ;;  %v8598_v49 = vld [vmem:[%s12115_s1 + $0xb48] ss:$16 sps:$4 sm:$0xff]   ;;  %v8606_v9 = vld [vmem:[%s12115_s1 + $0xb2c] ss:$16 sps:$4 sm:$0xff]  }
 0x21c   :  { %5513 = vmatpush1.bf16.msra.mxu1 %v8556_v46  ;;  %5473 = vmatprep.subr.bf16.mxu0 %v8561_v36  ;;  %v8601_v34 = vld [vmem:[%s12115_s1 + $0x928] ss:$16 sps:$4 sm:$0xff]   ;;  %v8609_v42 = vld [vmem:[%s12115_s1 + $0x90c] ss:$16 sps:$4 sm:$0xff]  }
 0x21d   :  { %5514 = vmatprep.subr.bf16.mxu1 %v8564_v17  ;;  %v8604_v41 = vld [vmem:[%s12115_s1 + $0xb28] ss:$16 sps:$4 sm:$0xff]   ;;  %v8612_v15 = vld [vmem:[%s12115_s1 + $0xb0c] ss:$16 sps:$4 sm:$0xff]  }
 0x21e   :  { %v8607_v16 = vld [vmem:[%s12115_s1 + $0x908] ss:$16 sps:$4 sm:$0xff]   ;;  %v8615_v21 = vld [vmem:[%s12115_s1 + $0xcec] ss:$16 sps:$4 sm:$0xff]  }
 0x21f   :  { %5474 = vmatpush1.bf16.msra.mxu0 %v8559_v23  ;;  %v8610_v20 = vld [vmem:[%s12115_s1 + $0xb08] ss:$16 sps:$4 sm:$0xff]   ;;  %v8618_v24 = vld [vmem:[%s12115_s1 + $0xeec] ss:$16 sps:$4 sm:$0xff]  }
 0x220   :  { %5515 = vmatpush1.bf16.msra.mxu1 %v8562_v32  ;;  %5475 = vmatprep.subr.bf16.mxu0 %v8567_v40  ;;  %v8613_v27 = vld [vmem:[%s12115_s1 + $0xce8] ss:$16 sps:$4 sm:$0xff]   ;;  %v8621_v13 = vld [vmem:[%s12115_s1 + $0xccc] ss:$16 sps:$4 sm:$0xff]  }
 0x221   :  { %5516 = vmatprep.subr.bf16.mxu1 %v8570_v44  ;;  %v8616_v28 = vld [vmem:[%s12115_s1 + $0xee8] ss:$16 sps:$4 sm:$0xff]   ;;  %v8624_v18 = vld [vmem:[%s12115_s1 + $0xecc] ss:$16 sps:$4 sm:$0xff]  }
 0x222   :  { %v8619_v31 = vld [vmem:[%s12115_s1 + $0xcc8] ss:$16 sps:$4 sm:$0xff]  }
 0x223   :  { %5476 = vmatpush2.bf16.msra.mxu0 %v8565_v38  ;;  %v8622_v46 = vld [vmem:[%s12115_s1 + $0xec8] ss:$16 sps:$4 sm:$0xff]  }
 0x224   :  { %5517 = vmatpush2.bf16.msra.mxu1 %v8568_v45  ;;  %5477 = vmatprep.subr.bf16.mxu0 %v8573_v47  ;;  %v8625_v38 = vld [vmem:[%s12115_s1 + $0xca8] ss:$16 sps:$4 sm:$0xff]  }
 0x225   :  { %5518 = vmatprep.subr.bf16.mxu1 %v8576_v60  ;;  %v8628_v45 = vld [vmem:[%s12115_s1 + $0xea8] ss:$16 sps:$4 sm:$0xff]  }
 0x226   :  { %v8631_v60 = vld [vmem:[%s12115_s1 + $0xc88] ss:$16 sps:$4 sm:$0xff]  }
 0x227   :  { %5478 = vmatpush2.bf16.msra.mxu0 %v8571_v0  ;;  %v8634_v0 = vld [vmem:[%s12115_s1 + $0xe88] ss:$16 sps:$4 sm:$0xff]  }
 0x228   :  { %5519 = vmatpush2.bf16.msra.mxu1 %v8574_v50  ;;  %5479 = vmatprep.subr.bf16.mxu0 %v8579_v51  ;;  %v8639_v50 = vld [vmem:[%s12115_s1 + $0xc6c] ss:$16 sps:$4 sm:$0xff]  }
 0x229   :  { %5520 = vmatprep.subr.bf16.mxu1 %v8582_v52  ;;  %v8642_v51 = vld [vmem:[%s12115_s1 + $0xe6c] ss:$16 sps:$4 sm:$0xff]   ;;  %v8637_v52 = vld [vmem:[%s12115_s1 + $0xc68] ss:$16 sps:$4 sm:$0xff]  }
 0x22b   :  { %5480 = vmatpush2.bf16.msra.mxu0 %v8577_v35  ;;  %v8640_v35 = vld [vmem:[%s12115_s1 + $0xe68] ss:$16 sps:$4 sm:$0xff]  }
 0x22c   :  { %5521 = vmatpush2.bf16.msra.mxu1 %v8580_v55  ;;  %5481 = vmatprep.subr.bf16.mxu0 %v8585_v56  ;;  %v8645_v55 = vld [vmem:[%s12115_s1 + $0xc4c] ss:$16 sps:$4 sm:$0xff]  }
 0x22d   :  { %5522 = vmatprep.subr.bf16.mxu1 %v8588_v63  ;;  %v8648_v56 = vld [vmem:[%s12115_s1 + $0xe4c] ss:$16 sps:$4 sm:$0xff]   ;;  %v8643_v63 = vld [vmem:[%s12115_s1 + $0xc48] ss:$16 sps:$4 sm:$0xff]  }
 0x22f   :  { %5482 = vmatpush2.bf16.msra.mxu0 %v8583_v58  ;;  %v8646_v58 = vld [vmem:[%s12115_s1 + $0xe48] ss:$16 sps:$4 sm:$0xff]  }
 0x230   :  { %5523 = vmatpush2.bf16.msra.mxu1 %v8586_v61  ;;  %5483 = vmatprep.subr.bf16.mxu0 %v8591_v62  ;;  %v8651_v61 = vld [vmem:[%s12115_s1 + $0xc2c] ss:$16 sps:$4 sm:$0xff]  }
 0x231   :  { %5524 = vmatprep.subr.bf16.mxu1 %v8594_v1  ;;  %v8654_v62 = vld [vmem:[%s12115_s1 + $0xe2c] ss:$16 sps:$4 sm:$0xff]   ;;  %v8649_v1 = vld [vmem:[%s12115_s1 + $0xc28] ss:$16 sps:$4 sm:$0xff]  }
 0x233   :  { %5484 = vmatpush2.bf16.msra.mxu0 %v8589_v26  ;;  %v8652_v26 = vld [vmem:[%s12115_s1 + $0xe28] ss:$16 sps:$4 sm:$0xff]  }
 0x234   :  { %5525 = vmatpush2.bf16.msra.mxu1 %v8592_v6  ;;  %5485 = vmatprep.subr.bf16.mxu0 %v8597_v2  ;;  %v8657_v6 = vld [vmem:[%s12115_s1 + $0xc0c] ss:$16 sps:$4 sm:$0xff]  }
 0x235   :  { %5526 = vmatprep.subr.bf16.mxu1 %v8600_v7  ;;  %v8660_v2 = vld [vmem:[%s12115_s1 + $0xe0c] ss:$16 sps:$4 sm:$0xff]   ;;  %v8655_v7 = vld [vmem:[%s12115_s1 + $0xc08] ss:$16 sps:$4 sm:$0xff]  }
 0x237   :  { %5486 = vmatpush2.bf16.msra.mxu0 %v8595_v8  ;;  %v8658_v8 = vld [vmem:[%s12115_s1 + $0xe08] ss:$16 sps:$4 sm:$0xff]  }
 0x238   :  { %5527 = vmatpush2.bf16.msra.mxu1 %v8598_v49  ;;  %5487 = vmatprep.subr.bf16.mxu0 %v8603_v57  ;;  %v8663_v49 = vld [vmem:[%s12115_s1 + $0xdec] ss:$16 sps:$4 sm:$0xff]  }
 0x239   :  { %5528 = vmatprep.subr.bf16.mxu1 %v8606_v9  ;;  %v8666_v57 = vld [vmem:[%s12115_s1 + $0xfec] ss:$16 sps:$4 sm:$0xff]   ;;  %v8661_v9 = vld [vmem:[%s12115_s1 + $0xde8] ss:$16 sps:$4 sm:$0xff]  }
 0x23b   :  { %5488 = vmatpush2.bf16.msra.mxu0 %v8601_v34  ;;  %v8664_v34 = vld [vmem:[%s12115_s1 + $0xfe8] ss:$16 sps:$4 sm:$0xff]  }
 0x23c   :  { %5529 = vmatpush2.bf16.msra.mxu1 %v8604_v41  ;;  %5489 = vmatprep.subr.bf16.mxu0 %v8609_v42  ;;  %v8669_v41 = vld [vmem:[%s12115_s1 + $0xdcc] ss:$16 sps:$4 sm:$0xff]  }
 0x23d   :  { %5530 = vmatprep.subr.bf16.mxu1 %v8612_v15  ;;  %v8672_v42 = vld [vmem:[%s12115_s1 + $0xfcc] ss:$16 sps:$4 sm:$0xff]   ;;  %v8667_v15 = vld [vmem:[%s12115_s1 + $0xdc8] ss:$16 sps:$4 sm:$0xff]  }
 0x23f   :  { %5490 = vmatpush2.bf16.msra.mxu0 %v8607_v16  ;;  %v8670_v16 = vld [vmem:[%s12115_s1 + $0xfc8] ss:$16 sps:$4 sm:$0xff]  }
 0x240   :  { %5531 = vmatpush2.bf16.msra.mxu1 %v8610_v20  ;;  %5541 = vmatprep.subr.bf16.mxu0 %v8615_v21  ;;  %v8675_v20 = vld [vmem:[%s12115_s1 + $0xdac] ss:$16 sps:$4 sm:$0xff]  }
 0x241   :  { %5582 = vmatprep.subr.bf16.mxu1 %v8618_v24  ;;  %v8678_v21 = vld [vmem:[%s12115_s1 + $0xfac] ss:$16 sps:$4 sm:$0xff]   ;;  %v8673_v24 = vld [vmem:[%s12115_s1 + $0xda8] ss:$16 sps:$4 sm:$0xff]  }
 0x242   :  { %v5247_v37 = vpop.f32.mrf.mxu0  ;;  %5492 = vmatmul.mubr.bf16.vlgmr.msra.gmra.mxu0 %v9796_v48  ;;  %v8627_v48 = vld [vmem:[%s12115_s1 + $0xcac] ss:$16 sps:$4 sm:$0xff]  }
 0x243   :  { %v5288_v30 = vpop.f32.mrf.mxu1  ;;  %5533 = vmatmul.mubr.bf16.vlgmr.msra.gmra.mxu1 %v9815_v54  ;;  %v5248_v33 = vadd.f32 %v5247_v37, %v10906_v29  ;;  %5542 = vmatpush1.bf16.msra.mxu0 %v8613_v27  ;;  %v8630_v54 = vld [vmem:[%s12115_s1 + $0xeac] ss:$16 sps:$4 sm:$0xff]   ;;  %v8676_v27 = vld [vmem:[%s12115_s1 + $0xfa8] ss:$16 sps:$4 sm:$0xff]  }
 0x244   :  { %5583 = vmatpush1.bf16.msra.mxu1 %v8616_v28  ;;  %v5249_v36 = vpop.f32.mrf.mxu0  ;;  %5543 = vmatprep.subr.bf16.mxu0 %v8621_v13  ;;  %v8681_v28 = vld [vmem:[%s12115_s1 + $0xd8c] ss:$16 sps:$4 sm:$0xff]   ;;  %v8682_v37 = vld [vmem:[%s12115_s1 + $0xf88] ss:$16 sps:$4 sm:$0xff]  }
 0x245   :  { %v5290_v17 = vpop.f32.mrf.mxu1  ;;  %5584 = vmatprep.subr.bf16.mxu1 %v8624_v18  ;;  %v11108_v29 = vadd.f32 %v5288_v30, %v5248_v33  ;;  %v5250_v23 = vadd.f32 %v5249_v36, %v10911_v4  ;;  %5573 = vmatprep.mubr.bf16.mxu0 %v9811_v53  ;;  %v8633_v53 = vld [vmem:[%s12115_s1 + $0xc8c] ss:$16 sps:$4 sm:$0xff]   ;;  %v8679_v18 = vld [vmem:[%s12115_s1 + $0xd88] ss:$16 sps:$4 sm:$0xff]  }
 0x246   :  { %5614 = vmatprep.mubr.bf16.mxu1 %v9831_v59  ;;  %v5251_v32 = vpop.f32.mrf.mxu0  ;;  %v8636_v59 = vld [vmem:[%s12115_s1 + $0xe8c] ss:$16 sps:$4 sm:$0xff]  }
 0x247   :  { %v5292_v40 = vpop.f32.mrf.mxu1  ;;  %v11113_v44 = vadd.f32 %v5290_v17, %v5250_v23  ;;  %5544 = vmatpush1.bf16.msra.mxu0 %v8619_v31  ;;  %v8684_v13 = vld [vmem:[%s12115_s1 + $0xf8c] ss:$16 sps:$4 sm:$0xff]   ;;  %v8685_v31 = vld [vmem:[%s12115_s1 + $0xd68] ss:$16 sps:$4 sm:$0xff]  }
 0x248   :  { %5585 = vmatpush1.bf16.msra.mxu1 %v8622_v46  ;;  %v5252_v47 = vpop.f32.mrf.mxu0  ;;  %5545 = vmatprep.subr.bf16.mxu0 %v8627_v48  ;;  %v8687_v30 = vld [vmem:[%s12115_s1 + $0xd6c] ss:$16 sps:$4 sm:$0xff]   ;;  %v8688_v46 = vld [vmem:[%s12115_s1 + $0xf68] ss:$16 sps:$4 sm:$0xff]  }
 0x249   :  { %v5293_v4 = vpop.f32.mrf.mxu1  ;;  %5586 = vmatprep.subr.bf16.mxu1 %v8630_v54  ;;  %v8690_v33 = vld [vmem:[%s12115_s1 + $0xf6c] ss:$16 sps:$4 sm:$0xff]   ;;  %v8691_v48 = vld [vmem:[%s12115_s1 + $0xd48] ss:$16 sps:$4 sm:$0xff]  }
 0x24a   :  { %v8693_v36 = vld [vmem:[%s12115_s1 + $0xd4c] ss:$16 sps:$4 sm:$0xff]   ;;  %v8694_v54 = vld [vmem:[%s12115_s1 + $0xf48] ss:$16 sps:$4 sm:$0xff]  }
 0x24b   :  { %5546 = vmatpush1.bf16.msra.mxu0 %v8625_v38  ;;  %v8696_v17 = vld [vmem:[%s12115_s1 + $0xf4c] ss:$16 sps:$4 sm:$0xff]   ;;  %v8697_v40 = vld [vmem:[%s12115_s1 + $0xd28] ss:$16 sps:$4 sm:$0xff]  }
 0x24c   :  { %5587 = vmatpush1.bf16.msra.mxu1 %v8628_v45  ;;  %5547 = vmatprep.subr.bf16.mxu0 %v8633_v53  ;;  %v8699_v23 = vld [vmem:[%s12115_s1 + $0xd2c] ss:$16 sps:$4 sm:$0xff]   ;;  %v8700_v38 = vld [vmem:[%s12115_s1 + $0xf28] ss:$16 sps:$4 sm:$0xff]  }
 0x24d   :  { %5588 = vmatprep.subr.bf16.mxu1 %v8636_v59  ;;  %v8702_v32 = vld [vmem:[%s12115_s1 + $0xf2c] ss:$16 sps:$4 sm:$0xff]   ;;  %v8703_v4 = vld [vmem:[%s12115_s1 + $0xd08] ss:$16 sps:$4 sm:$0xff]  }
 0x24e   :  { %v8705_v45 = vld [vmem:[%s12115_s1 + $0xd0c] ss:$16 sps:$4 sm:$0xff]   ;;  %v8706_v53 = vld [vmem:[%s12115_s1 + $0xf08] ss:$16 sps:$4 sm:$0xff]  }
 0x24f   :  { %5548 = vmatpush1.bf16.msra.mxu0 %v8631_v60  ;;  %v8708_v47 = vld [vmem:[%s12115_s1 + $0xf0c] ss:$16 sps:$4 sm:$0xff]  }
 0x250   :  { %5589 = vmatpush1.bf16.msra.mxu1 %v8634_v0  ;;  %5549 = vmatprep.subr.bf16.mxu0 %v8639_v50  ;;  %v8711_v59 = vld [vmem:[%s12115_s1 + $0x10ec] ss:$16 sps:$4 sm:$0xff]   ;;  %v8709_v0 = vld [vmem:[%s12115_s1 + $0x10e8] ss:$16 sps:$4 sm:$0xff]  }
 0x251   :  { %5590 = vmatprep.subr.bf16.mxu1 %v8642_v51  ;;  %v8714_v60 = vld [vmem:[%s12115_s1 + $0x12ec] ss:$16 sps:$4 sm:$0xff]   ;;  %v8712_v50 = vld [vmem:[%s12115_s1 + $0x12e8] ss:$16 sps:$4 sm:$0xff]  }
 0x252   :  { %v8717_v51 = vld [vmem:[%s12115_s1 + $0x10cc] ss:$16 sps:$4 sm:$0xff]  }
 0x253   :  { %5550 = vmatpush1.bf16.msra.mxu0 %v8637_v52  ;;  %v8720_v52 = vld [vmem:[%s12115_s1 + $0x12cc] ss:$16 sps:$4 sm:$0xff]  }
 0x254   :  { %5591 = vmatpush1.bf16.msra.mxu1 %v8640_v35  ;;  %5551 = vmatprep.subr.bf16.mxu0 %v8645_v55 }
 0x255   :  { %5592 = vmatprep.subr.bf16.mxu1 %v8648_v56 }
 0x257   :  { %5552 = vmatpush1.bf16.msra.mxu0 %v8643_v63  ;;  %v8715_v63 = vld [vmem:[%s12115_s1 + $0x10c8] ss:$16 sps:$4 sm:$0xff]  }
 0x258   :  { %5593 = vmatpush1.bf16.msra.mxu1 %v8646_v58  ;;  %5553 = vmatprep.subr.bf16.mxu0 %v8651_v61  ;;  %v8718_v58 = vld [vmem:[%s12115_s1 + $0x12c8] ss:$16 sps:$4 sm:$0xff]  }
 0x259   :  { %5594 = vmatprep.subr.bf16.mxu1 %v8654_v62 }
 0x25b   :  { %5554 = vmatpush1.bf16.msra.mxu0 %v8649_v1 }
 0x25c   :  { %5595 = vmatpush1.bf16.msra.mxu1 %v8652_v26  ;;  %5555 = vmatprep.subr.bf16.mxu0 %v8657_v6 }
 0x25d   :  { %5596 = vmatprep.subr.bf16.mxu1 %v8660_v2  ;;  %v8721_v2 = vld [vmem:[%s12115_s1 + $0x10a8] ss:$16 sps:$4 sm:$0xff]  }
 0x25f   :  { %5556 = vmatpush1.bf16.msra.mxu0 %v8655_v7  ;;  %v8724_v7 = vld [vmem:[%s12115_s1 + $0x12a8] ss:$16 sps:$4 sm:$0xff]  }
 0x260   :  { %5597 = vmatpush1.bf16.msra.mxu1 %v8658_v8  ;;  %5557 = vmatprep.subr.bf16.mxu0 %v8663_v49 }
 0x261   :  { %5598 = vmatprep.subr.bf16.mxu1 %v8666_v57  ;;  %v8727_v57 = vld [vmem:[%s12115_s1 + $0x1088] ss:$16 sps:$4 sm:$0xff]  }
 0x263   :  { %5558 = vmatpush2.bf16.msra.mxu0 %v8661_v9  ;;  %v8730_v9 = vld [vmem:[%s12115_s1 + $0x1288] ss:$16 sps:$4 sm:$0xff]  }
 0x264   :  { %5599 = vmatpush2.bf16.msra.mxu1 %v8664_v34  ;;  %5559 = vmatprep.subr.bf16.mxu0 %v8669_v41  ;;  %v8735_v34 = vld [vmem:[%s12115_s1 + $0x106c] ss:$16 sps:$4 sm:$0xff]  }
 0x265   :  { %5600 = vmatprep.subr.bf16.mxu1 %v8672_v42  ;;  %v8738_v41 = vld [vmem:[%s12115_s1 + $0x126c] ss:$16 sps:$4 sm:$0xff]   ;;  %v8733_v42 = vld [vmem:[%s12115_s1 + $0x1068] ss:$16 sps:$4 sm:$0xff]  }
 0x267   :  { %5560 = vmatpush2.bf16.msra.mxu0 %v8667_v15  ;;  %v8736_v15 = vld [vmem:[%s12115_s1 + $0x1268] ss:$16 sps:$4 sm:$0xff]  }
 0x268   :  { %5601 = vmatpush2.bf16.msra.mxu1 %v8670_v16  ;;  %5561 = vmatprep.subr.bf16.mxu0 %v8675_v20  ;;  %v8741_v16 = vld [vmem:[%s12115_s1 + $0x104c] ss:$16 sps:$4 sm:$0xff]  }
 0x269   :  { %5602 = vmatprep.subr.bf16.mxu1 %v8678_v21  ;;  %v8744_v20 = vld [vmem:[%s12115_s1 + $0x124c] ss:$16 sps:$4 sm:$0xff]   ;;  %v8739_v21 = vld [vmem:[%s12115_s1 + $0x1048] ss:$16 sps:$4 sm:$0xff]  }
 0x26b   :  { %5562 = vmatpush2.bf16.msra.mxu0 %v8673_v24  ;;  %v8742_v24 = vld [vmem:[%s12115_s1 + $0x1248] ss:$16 sps:$4 sm:$0xff]  }
 0x26c   :  { %5603 = vmatpush2.bf16.msra.mxu1 %v8676_v27  ;;  %5563 = vmatprep.subr.bf16.mxu0 %v8681_v28  ;;  %v8747_v27 = vld [vmem:[%s12115_s1 + $0x102c] ss:$16 sps:$4 sm:$0xff]  }
 0x26d   :  { %5604 = vmatprep.subr.bf16.mxu1 %v8684_v13  ;;  %v8750_v28 = vld [vmem:[%s12115_s1 + $0x122c] ss:$16 sps:$4 sm:$0xff]   ;;  %v8745_v13 = vld [vmem:[%s12115_s1 + $0x1028] ss:$16 sps:$4 sm:$0xff]  }
 0x26f   :  { %5564 = vmatpush2.bf16.msra.mxu0 %v8679_v18  ;;  %v8748_v18 = vld [vmem:[%s12115_s1 + $0x1228] ss:$16 sps:$4 sm:$0xff]  }
 0x270   :  { %5605 = vmatpush2.bf16.msra.mxu1 %v8682_v37  ;;  %5565 = vmatprep.subr.bf16.mxu0 %v8687_v30  ;;  %v8753_v37 = vld [vmem:[%s12115_s1 + $0x100c] ss:$16 sps:$4 sm:$0xff]  }
 0x271   :  { %5606 = vmatprep.subr.bf16.mxu1 %v8690_v33  ;;  %v8756_v30 = vld [vmem:[%s12115_s1 + $0x120c] ss:$16 sps:$4 sm:$0xff]   ;;  %v8751_v33 = vld [vmem:[%s12115_s1 + $0x1008] ss:$16 sps:$4 sm:$0xff]  }
 0x273   :  { %5566 = vmatpush2.bf16.msra.mxu0 %v8685_v31  ;;  %v8754_v31 = vld [vmem:[%s12115_s1 + $0x1208] ss:$16 sps:$4 sm:$0xff]  }
 0x274   :  { %5607 = vmatpush2.bf16.msra.mxu1 %v8688_v46  ;;  %5567 = vmatprep.subr.bf16.mxu0 %v8693_v36  ;;  %v8759_v46 = vld [vmem:[%s12115_s1 + $0x11ec] ss:$16 sps:$4 sm:$0xff]  }
 0x275   :  { %5608 = vmatprep.subr.bf16.mxu1 %v8696_v17  ;;  %v8762_v36 = vld [vmem:[%s12115_s1 + $0x13ec] ss:$16 sps:$4 sm:$0xff]   ;;  %v8757_v17 = vld [vmem:[%s12115_s1 + $0x11e8] ss:$16 sps:$4 sm:$0xff]  }
 0x277   :  { %5568 = vmatpush2.bf16.msra.mxu0 %v8691_v48  ;;  %v8760_v48 = vld [vmem:[%s12115_s1 + $0x13e8] ss:$16 sps:$4 sm:$0xff]  }
 0x278   :  { %5609 = vmatpush2.bf16.msra.mxu1 %v8694_v54  ;;  %5569 = vmatprep.subr.bf16.mxu0 %v8699_v23  ;;  %v8765_v54 = vld [vmem:[%s12115_s1 + $0x11cc] ss:$16 sps:$4 sm:$0xff]  }
 0x279   :  { %5610 = vmatprep.subr.bf16.mxu1 %v8702_v32  ;;  %v8768_v23 = vld [vmem:[%s12115_s1 + $0x13cc] ss:$16 sps:$4 sm:$0xff]   ;;  %v8763_v32 = vld [vmem:[%s12115_s1 + $0x11c8] ss:$16 sps:$4 sm:$0xff]  }
 0x27b   :  { %5570 = vmatpush2.bf16.msra.mxu0 %v8697_v40  ;;  %v8766_v40 = vld [vmem:[%s12115_s1 + $0x13c8] ss:$16 sps:$4 sm:$0xff]  }
 0x27c   :  { %5611 = vmatpush2.bf16.msra.mxu1 %v8700_v38  ;;  %5571 = vmatprep.subr.bf16.mxu0 %v8705_v45  ;;  %v8771_v38 = vld [vmem:[%s12115_s1 + $0x11ac] ss:$16 sps:$4 sm:$0xff]  }
 0x27d   :  { %5612 = vmatprep.subr.bf16.mxu1 %v8708_v47  ;;  %v8774_v45 = vld [vmem:[%s12115_s1 + $0x13ac] ss:$16 sps:$4 sm:$0xff]   ;;  %v8769_v47 = vld [vmem:[%s12115_s1 + $0x11a8] ss:$16 sps:$4 sm:$0xff]  }
 0x27f   :  { %5572 = vmatpush2.bf16.msra.mxu0 %v8703_v4  ;;  %v8772_v4 = vld [vmem:[%s12115_s1 + $0x13a8] ss:$16 sps:$4 sm:$0xff]  }
 0x280   :  { %5613 = vmatpush2.bf16.msra.mxu1 %v8706_v53  ;;  %5623 = vmatprep.subr.bf16.mxu0 %v8711_v59  ;;  %v8777_v53 = vld [vmem:[%s12115_s1 + $0x118c] ss:$16 sps:$4 sm:$0xff]  }
 0x281   :  { %5664 = vmatprep.subr.bf16.mxu1 %v8714_v60  ;;  %v8780_v59 = vld [vmem:[%s12115_s1 + $0x138c] ss:$16 sps:$4 sm:$0xff]   ;;  %v8775_v60 = vld [vmem:[%s12115_s1 + $0x1188] ss:$16 sps:$4 sm:$0xff]  }
 0x282   :  { %v5329_v35 = vpop.f32.mrf.mxu0  ;;  %5574 = vmatmul.mubr.bf16.vlgmr.msra.gmra.mxu0 %v10021_v12  ;;  %v8723_v12 = vld [vmem:[%s12115_s1 + $0x10ac] ss:$16 sps:$4 sm:$0xff]  }
 0x283   :  { %v5370_v55 = vpop.f32.mrf.mxu1  ;;  %5615 = vmatmul.mubr.bf16.vlgmr.msra.gmra.mxu1 %v10037_v39  ;;  %5624 = vmatpush1.bf16.msra.mxu0 %v8709_v0  ;;  %v8726_v39 = vld [vmem:[%s12115_s1 + $0x12ac] ss:$16 sps:$4 sm:$0xff]   ;;  %v8778_v0 = vld [vmem:[%s12115_s1 + $0x1388] ss:$16 sps:$4 sm:$0xff]  }
 0x284   :  { %v11297_v56 = vadd.f32 %v5370_v55, %v5329_v35  ;;  %5665 = vmatpush1.bf16.msra.mxu1 %v8712_v50  ;;  %v5331_v61 = vpop.f32.mrf.mxu0  ;;  %5625 = vmatprep.subr.bf16.mxu0 %v8717_v51  ;;  %v8783_v50 = vld [vmem:[%s12115_s1 + $0x116c] ss:$16 sps:$4 sm:$0xff]   ;;  %v8784_v35 = vld [vmem:[%s12115_s1 + $0x1368] ss:$16 sps:$4 sm:$0xff]  }
 0x285   :  { %v5372_v62 = vpop.f32.mrf.mxu1  ;;  %5666 = vmatprep.subr.bf16.mxu1 %v8720_v52  ;;  %5655 = vmatprep.mubr.bf16.mxu0 %v10033_v19  ;;  %v8729_v19 = vld [vmem:[%s12115_s1 + $0x108c] ss:$16 sps:$4 sm:$0xff]   ;;  %v8781_v52 = vld [vmem:[%s12115_s1 + $0x1168] ss:$16 sps:$4 sm:$0xff]  }
 0x286   :  { %v11311_v1 = vadd.f32 %v5372_v62, %v5331_v61  ;;  %5696 = vmatprep.mubr.bf16.mxu1 %v10053_v25  ;;  %v5333_v26 = vpop.f32.mrf.mxu0  ;;  %v8732_v25 = vld [vmem:[%s12115_s1 + $0x128c] ss:$16 sps:$4 sm:$0xff]   ;;  %v8790_v61 = vld [vmem:[%s12115_s1 + $0x1348] ss:$16 sps:$4 sm:$0xff]  }
 0x287   :  { %v5374_v6 = vpop.f32.mrf.mxu1  ;;  %5626 = vmatpush1.bf16.msra.mxu0 %v8715_v63  ;;  %v8786_v51 = vld [vmem:[%s12115_s1 + $0x136c] ss:$16 sps:$4 sm:$0xff]   ;;  %v8796_v26 = vld [vmem:[%s12115_s1 + $0x1328] ss:$16 sps:$4 sm:$0xff]  }
 0x288   :  { %5667 = vmatpush1.bf16.msra.mxu1 %v8718_v58  ;;  %v5334_v8 = vpop.f32.mrf.mxu0  ;;  %5627 = vmatprep.subr.bf16.mxu0 %v8723_v12  ;;  %v8789_v55 = vld [vmem:[%s12115_s1 + $0x114c] ss:$16 sps:$4 sm:$0xff]   ;;  %v8787_v58 = vld [vmem:[%s12115_s1 + $0x1148] ss:$16 sps:$4 sm:$0xff]  }
 0x289   :  { %v5375_v49 = vpop.f32.mrf.mxu1  ;;  %5668 = vmatprep.subr.bf16.mxu1 %v8726_v39  ;;  %v8792_v63 = vld [vmem:[%s12115_s1 + $0x134c] ss:$16 sps:$4 sm:$0xff]   ;;  %v8793_v39 = vld [vmem:[%s12115_s1 + $0x1128] ss:$16 sps:$4 sm:$0xff]  }
 0x28a   :  { %v8795_v62 = vld [vmem:[%s12115_s1 + $0x112c] ss:$16 sps:$4 sm:$0xff]   ;;  %v8802_v8 = vld [vmem:[%s12115_s1 + $0x1308] ss:$16 sps:$4 sm:$0xff]  }
 0x28b   :  { %5628 = vmatpush1.bf16.msra.mxu0 %v8721_v2  ;;  %v8798_v12 = vld [vmem:[%s12115_s1 + $0x132c] ss:$16 sps:$4 sm:$0xff]  }
 0x28c   :  { %5669 = vmatpush1.bf16.msra.mxu1 %v8724_v7  ;;  %5629 = vmatprep.subr.bf16.mxu0 %v8729_v19  ;;  %v8801_v6 = vld [vmem:[%s12115_s1 + $0x110c] ss:$16 sps:$4 sm:$0xff]   ;;  %v8799_v7 = vld [vmem:[%s12115_s1 + $0x1108] ss:$16 sps:$4 sm:$0xff]  }
 0x28d   :  { %5670 = vmatprep.subr.bf16.mxu1 %v8732_v25  ;;  %v8804_v2 = vld [vmem:[%s12115_s1 + $0x130c] ss:$16 sps:$4 sm:$0xff]   ;;  %v8805_v25 = vld [vmem:[%s12115_s1 + $0x14e8] ss:$16 sps:$4 sm:$0xff]  }
 0x28e   :  { %v8807_v49 = vld [vmem:[%s12115_s1 + $0x14ec] ss:$16 sps:$4 sm:$0xff]  }
 0x28f   :  { %5630 = vmatpush1.bf16.msra.mxu0 %v8727_v57  ;;  %v8810_v19 = vld [vmem:[%s12115_s1 + $0x16ec] ss:$16 sps:$4 sm:$0xff]   ;;  %v8808_v57 = vld [vmem:[%s12115_s1 + $0x16e8] ss:$16 sps:$4 sm:$0xff]  }
 0x290   :  { %5671 = vmatpush1.bf16.msra.mxu1 %v8730_v9  ;;  %5631 = vmatprep.subr.bf16.mxu0 %v8735_v34  ;;  %v8813_v9 = vld [vmem:[%s12115_s1 + $0x14cc] ss:$16 sps:$4 sm:$0xff]  }
 0x291   :  { %5672 = vmatprep.subr.bf16.mxu1 %v8738_v41  ;;  %v8816_v34 = vld [vmem:[%s12115_s1 + $0x16cc] ss:$16 sps:$4 sm:$0xff]  }
 0x293   :  { %5632 = vmatpush1.bf16.msra.mxu0 %v8733_v42 }
 0x294   :  { %5673 = vmatpush1.bf16.msra.mxu1 %v8736_v15  ;;  %5633 = vmatprep.subr.bf16.mxu0 %v8741_v16  ;;  %v8811_v16 = vld [vmem:[%s12115_s1 + $0x14c8] ss:$16 sps:$4 sm:$0xff]  }
 0x295   :  { %5674 = vmatprep.subr.bf16.mxu1 %v8744_v20  ;;  %v8814_v20 = vld [vmem:[%s12115_s1 + $0x16c8] ss:$16 sps:$4 sm:$0xff]  }
 0x297   :  { %5634 = vmatpush1.bf16.msra.mxu0 %v8739_v21 }
 0x298   :  { %5675 = vmatpush1.bf16.msra.mxu1 %v8742_v24  ;;  %5635 = vmatprep.subr.bf16.mxu0 %v8747_v27 }
 0x299   :  { %5676 = vmatprep.subr.bf16.mxu1 %v8750_v28 }
 0x29b   :  { %5636 = vmatpush1.bf16.msra.mxu0 %v8745_v13 }
 0x29c   :  { %5677 = vmatpush1.bf16.msra.mxu1 %v8748_v18  ;;  %5637 = vmatprep.subr.bf16.mxu0 %v8753_v37  ;;  %v8817_v37 = vld [vmem:[%s12115_s1 + $0x14a8] ss:$16 sps:$4 sm:$0xff]  }
 0x29d   :  { %5678 = vmatprep.subr.bf16.mxu1 %v8756_v30  ;;  %v8820_v30 = vld [vmem:[%s12115_s1 + $0x16a8] ss:$16 sps:$4 sm:$0xff]  }
 0x29f   :  { %5638 = vmatpush1.bf16.msra.mxu0 %v8751_v33 }
 0x2a0   :  { %5679 = vmatpush1.bf16.msra.mxu1 %v8754_v31  ;;  %5639 = vmatprep.subr.bf16.mxu0 %v8759_v46  ;;  %v8823_v31 = vld [vmem:[%s12115_s1 + $0x1488] ss:$16 sps:$4 sm:$0xff]  }
 0x2a1   :  { %5680 = vmatprep.subr.bf16.mxu1 %v8762_v36  ;;  %v8826_v46 = vld [vmem:[%s12115_s1 + $0x1688] ss:$16 sps:$4 sm:$0xff]   ;;  %v8831_v36 = vld [vmem:[%s12115_s1 + $0x146c] ss:$16 sps:$4 sm:$0xff]  }
 0x2a3   :  { %5640 = vmatpush2.bf16.msra.mxu0 %v8757_v17  ;;  %v8834_v17 = vld [vmem:[%s12115_s1 + $0x166c] ss:$16 sps:$4 sm:$0xff]  }
 0x2a4   :  { %5681 = vmatpush2.bf16.msra.mxu1 %v8760_v48  ;;  %5641 = vmatprep.subr.bf16.mxu0 %v8765_v54  ;;  %v8829_v48 = vld [vmem:[%s12115_s1 + $0x1468] ss:$16 sps:$4 sm:$0xff]  }
 0x2a5   :  { %5682 = vmatprep.subr.bf16.mxu1 %v8768_v23  ;;  %v8832_v54 = vld [vmem:[%s12115_s1 + $0x1668] ss:$16 sps:$4 sm:$0xff]   ;;  %v8837_v23 = vld [vmem:[%s12115_s1 + $0x144c] ss:$16 sps:$4 sm:$0xff]  }
 0x2a7   :  { %5642 = vmatpush2.bf16.msra.mxu0 %v8763_v32  ;;  %v8840_v32 = vld [vmem:[%s12115_s1 + $0x164c] ss:$16 sps:$4 sm:$0xff]  }
 0x2a8   :  { %5683 = vmatpush2.bf16.msra.mxu1 %v8766_v40  ;;  %5643 = vmatprep.subr.bf16.mxu0 %v8771_v38  ;;  %v8835_v40 = vld [vmem:[%s12115_s1 + $0x1448] ss:$16 sps:$4 sm:$0xff]  }
 0x2a9   :  { %5684 = vmatprep.subr.bf16.mxu1 %v8774_v45  ;;  %v8838_v38 = vld [vmem:[%s12115_s1 + $0x1648] ss:$16 sps:$4 sm:$0xff]   ;;  %v8843_v45 = vld [vmem:[%s12115_s1 + $0x142c] ss:$16 sps:$4 sm:$0xff]  }
 0x2ab   :  { %5644 = vmatpush2.bf16.msra.mxu0 %v8769_v47  ;;  %v8846_v47 = vld [vmem:[%s12115_s1 + $0x162c] ss:$16 sps:$4 sm:$0xff]  }
 0x2ac   :  { %5685 = vmatpush2.bf16.msra.mxu1 %v8772_v4  ;;  %5645 = vmatprep.subr.bf16.mxu0 %v8777_v53  ;;  %v8841_v4 = vld [vmem:[%s12115_s1 + $0x1428] ss:$16 sps:$4 sm:$0xff]  }
 0x2ad   :  { %5686 = vmatprep.subr.bf16.mxu1 %v8780_v59  ;;  %v8844_v53 = vld [vmem:[%s12115_s1 + $0x1628] ss:$16 sps:$4 sm:$0xff]   ;;  %v8849_v59 = vld [vmem:[%s12115_s1 + $0x140c] ss:$16 sps:$4 sm:$0xff]  }
 0x2af   :  { %5646 = vmatpush2.bf16.msra.mxu0 %v8775_v60  ;;  %v8852_v60 = vld [vmem:[%s12115_s1 + $0x160c] ss:$16 sps:$4 sm:$0xff]  }
 0x2b0   :  { %5687 = vmatpush2.bf16.msra.mxu1 %v8778_v0  ;;  %5647 = vmatprep.subr.bf16.mxu0 %v8783_v50  ;;  %v8847_v0 = vld [vmem:[%s12115_s1 + $0x1408] ss:$16 sps:$4 sm:$0xff]  }
 0x2b1   :  { %5688 = vmatprep.subr.bf16.mxu1 %v8786_v51  ;;  %v8850_v50 = vld [vmem:[%s12115_s1 + $0x1608] ss:$16 sps:$4 sm:$0xff]   ;;  %v8855_v51 = vld [vmem:[%s12115_s1 + $0x15ec] ss:$16 sps:$4 sm:$0xff]  }
 0x2b3   :  { %5648 = vmatpush2.bf16.msra.mxu0 %v8781_v52  ;;  %v8858_v52 = vld [vmem:[%s12115_s1 + $0x17ec] ss:$16 sps:$4 sm:$0xff]  }
 0x2b4   :  { %5689 = vmatpush2.bf16.msra.mxu1 %v8784_v35  ;;  %5649 = vmatprep.subr.bf16.mxu0 %v8789_v55  ;;  %v8853_v35 = vld [vmem:[%s12115_s1 + $0x15e8] ss:$16 sps:$4 sm:$0xff]  }
 0x2b5   :  { %5690 = vmatprep.subr.bf16.mxu1 %v8792_v63  ;;  %v8856_v55 = vld [vmem:[%s12115_s1 + $0x17e8] ss:$16 sps:$4 sm:$0xff]   ;;  %v8861_v63 = vld [vmem:[%s12115_s1 + $0x15cc] ss:$16 sps:$4 sm:$0xff]  }
 0x2b7   :  { %5650 = vmatpush2.bf16.msra.mxu0 %v8787_v58  ;;  %v8864_v58 = vld [vmem:[%s12115_s1 + $0x17cc] ss:$16 sps:$4 sm:$0xff]  }
 0x2b8   :  { %5691 = vmatpush2.bf16.msra.mxu1 %v8790_v61  ;;  %5651 = vmatprep.subr.bf16.mxu0 %v8795_v62  ;;  %v8859_v61 = vld [vmem:[%s12115_s1 + $0x15c8] ss:$16 sps:$4 sm:$0xff]  }
 0x2b9   :  { %5692 = vmatprep.subr.bf16.mxu1 %v8798_v12  ;;  %v8862_v62 = vld [vmem:[%s12115_s1 + $0x17c8] ss:$16 sps:$4 sm:$0xff]   ;;  %v8867_v12 = vld [vmem:[%s12115_s1 + $0x15ac] ss:$16 sps:$4 sm:$0xff]  }
 0x2bb   :  { %5652 = vmatpush2.bf16.msra.mxu0 %v8793_v39  ;;  %v8870_v39 = vld [vmem:[%s12115_s1 + $0x17ac] ss:$16 sps:$4 sm:$0xff]  }
 0x2bc   :  { %5693 = vmatpush2.bf16.msra.mxu1 %v8796_v26  ;;  %5653 = vmatprep.subr.bf16.mxu0 %v8801_v6  ;;  %v8865_v26 = vld [vmem:[%s12115_s1 + $0x15a8] ss:$16 sps:$4 sm:$0xff]  }
 0x2bd   :  { %5694 = vmatprep.subr.bf16.mxu1 %v8804_v2  ;;  %v8868_v6 = vld [vmem:[%s12115_s1 + $0x17a8] ss:$16 sps:$4 sm:$0xff]   ;;  %v8873_v2 = vld [vmem:[%s12115_s1 + $0x158c] ss:$16 sps:$4 sm:$0xff]  }
 0x2bf   :  { %5654 = vmatpush2.bf16.msra.mxu0 %v8799_v7  ;;  %v8876_v7 = vld [vmem:[%s12115_s1 + $0x178c] ss:$16 sps:$4 sm:$0xff]  }
 0x2c0   :  { %5695 = vmatpush2.bf16.msra.mxu1 %v8802_v8  ;;  %5705 = vmatprep.subr.bf16.mxu0 %v8807_v49  ;;  %v8871_v8 = vld [vmem:[%s12115_s1 + $0x1588] ss:$16 sps:$4 sm:$0xff]  }
 0x2c1   :  { %5746 = vmatprep.subr.bf16.mxu1 %v8810_v19  ;;  %v8874_v49 = vld [vmem:[%s12115_s1 + $0x1788] ss:$16 sps:$4 sm:$0xff]   ;;  %v8879_v19 = vld [vmem:[%s12115_s1 + $0x156c] ss:$16 sps:$4 sm:$0xff]  }
 0x2c2   :  { %v5411_v41 = vpop.f32.mrf.mxu0  ;;  %5656 = vmatmul.mubr.bf16.vlgmr.msra.gmra.mxu0 %v10240_v3  ;;  %v8819_v3 = vld [vmem:[%s12115_s1 + $0x14ac] ss:$16 sps:$4 sm:$0xff]  }
 0x2c3   :  { %v5452_v42 = vpop.f32.mrf.mxu1  ;;  %5697 = vmatmul.mubr.bf16.vlgmr.msra.gmra.mxu1 %v10265_v14  ;;  %v5412_v15 = vadd.f32 %v5411_v41, %v11297_v56  ;;  %5706 = vmatpush1.bf16.msra.mxu0 %v8805_v25  ;;  %v8822_v14 = vld [vmem:[%s12115_s1 + $0x16ac] ss:$16 sps:$4 sm:$0xff]  }
 0x2c4   :  { %5747 = vmatpush1.bf16.msra.mxu1 %v8808_v57  ;;  %v5413_v21 = vpop.f32.mrf.mxu0  ;;  %5707 = vmatprep.subr.bf16.mxu0 %v8813_v9  ;;  %v8882_v25 = vld [vmem:[%s12115_s1 + $0x176c] ss:$16 sps:$4 sm:$0xff]   ;;  %v8877_v57 = vld [vmem:[%s12115_s1 + $0x1568] ss:$16 sps:$4 sm:$0xff]  }
 0x2c5   :  { %v5454_v24 = vpop.f32.mrf.mxu1  ;;  %5748 = vmatprep.subr.bf16.mxu1 %v8816_v34  ;;  %v11510_v56 = vadd.f32 %v5452_v42, %v5412_v15  ;;  %v5414_v27 = vadd.f32 %v5413_v21, %v11311_v1  ;;  %5737 = vmatprep.mubr.bf16.mxu0 %v10261_v11  ;;  %v8825_v11 = vld [vmem:[%s12115_s1 + $0x148c] ss:$16 sps:$4 sm:$0xff]   ;;  %v8880_v9 = vld [vmem:[%s12115_s1 + $0x1768] ss:$16 sps:$4 sm:$0xff]  }
 0x2c6   :  { %5778 = vmatprep.mubr.bf16.mxu1 %v10281_v22  ;;  %v5415_v28 = vpop.f32.mrf.mxu0  ;;  %v8828_v22 = vld [vmem:[%s12115_s1 + $0x168c] ss:$16 sps:$4 sm:$0xff]   ;;  %v8883_v42 = vld [vmem:[%s12115_s1 + $0x1548] ss:$16 sps:$4 sm:$0xff]  }
 0x2c7   :  { %v5456_v13 = vpop.f32.mrf.mxu1  ;;  %v11515_v18 = vadd.f32 %v5454_v24, %v5414_v27  ;;  %5708 = vmatpush1.bf16.msra.mxu0 %v8811_v16  ;;  %v8885_v34 = vld [vmem:[%s12115_s1 + $0x154c] ss:$16 sps:$4 sm:$0xff]   ;;  %v8886_v15 = vld [vmem:[%s12115_s1 + $0x1748] ss:$16 sps:$4 sm:$0xff]  }
 0x2c8   :  { %5749 = vmatpush1.bf16.msra.mxu1 %v8814_v20  ;;  %v5416_v33 = vpop.f32.mrf.mxu0  ;;  %5709 = vmatprep.subr.bf16.mxu0 %v8819_v3  ;;  %v8888_v41 = vld [vmem:[%s12115_s1 + $0x174c] ss:$16 sps:$4 sm:$0xff]   ;;  %v8889_v21 = vld [vmem:[%s12115_s1 + $0x1528] ss:$16 sps:$4 sm:$0xff]   ;;  %v8903_v13 = vld [vmem:[%s12116_s2 + $0xe4] ss:$16 sps:$4 sm:$0xff]  }
 0x2c9   :  { %v5457_v1 = vpop.f32.mrf.mxu1  ;;  %5750 = vmatprep.subr.bf16.mxu1 %v8822_v14  ;;  %v8891_v16 = vld [vmem:[%s12115_s1 + $0x152c] ss:$16 sps:$4 sm:$0xff]   ;;  %v8892_v24 = vld [vmem:[%s12115_s1 + $0x1728] ss:$16 sps:$4 sm:$0xff]   ;;  %v11690_v33 = vpack.c.bf16 %v11113_v44, %v11113_v44  ;;  %v8909_v44 = vld [vmem:[%s12116_s2 + $0xa4] ss:$16 sps:$4 sm:$0xff]  }
 0x2ca   :  { %v8894_v20 = vld [vmem:[%s12115_s1 + $0x172c] ss:$16 sps:$4 sm:$0xff]   ;;  %v8895_v27 = vld [vmem:[%s12115_s1 + $0x1508] ss:$16 sps:$4 sm:$0xff]  }
 0x2cb   :  { %5710 = vmatpush1.bf16.msra.mxu0 %v8817_v37  ;;  %v8897_v3 = vld [vmem:[%s12115_s1 + $0x150c] ss:$16 sps:$4 sm:$0xff]   ;;  %v8898_v28 = vld [vmem:[%s12115_s1 + $0x1708] ss:$16 sps:$4 sm:$0xff]   ;;  %v8901_v37 = vld [vmem:[%s12116_s2 + $0xe0] ss:$16 sps:$4 sm:$0xff]  }
 0x2cc   :  { %5751 = vmatpush1.bf16.msra.mxu1 %v8820_v30  ;;  %5711 = vmatprep.subr.bf16.mxu0 %v8825_v11  ;;  %v8900_v14 = vld [vmem:[%s12115_s1 + $0x170c] ss:$16 sps:$4 sm:$0xff]   ;;  %v8906_v30 = vld [vmem:[%s12116_s2 + $0xc4] ss:$16 sps:$4 sm:$0xff]   ;;  %s9120_s1 = smov [#allocation2]  }
 0x2cd   :  { %5752 = vmatprep.subr.bf16.mxu1 %v8828_v22  ;;  %s6836_s16 = sshll.u32 %s9120_s1, 4  ;;  %s6837_s16 = int_to_ptr.vmem [resolvable:$true] %s6836_s16 }
 0x2ce   :  { %s9096_s18 = scalar_lea.vmem %s6837_s16, 16  ;;  %s9100_s19 = scalar_lea.vmem %s6837_s16, 32 }
 0x2cf   :  { %5712 = vmatpush1.bf16.msra.mxu0 %v8823_v31  ;;  %v8904_v31 = vld [vmem:[%s12116_s2 + $0xc0] ss:$16 sps:$4 sm:$0xff]   ;;  %p9097_p0 = scmp.ne.s32.totalorder %s6837_s16, %s9096_s18  ;;  %p9101_p1 = scmp.lt.s32.totalorder %s6837_s16, %s6837_s16 }
 0x2d0   :  { %5753 = vmatpush1.bf16.msra.mxu1 %v8826_v46  ;;  %5713 = vmatprep.subr.bf16.mxu0 %v8831_v36  ;;  %p9102_p2 = scmp.lt.s32.totalorder %s9100_s19, %s9096_s18 }
 0x2d1   :  { %5754 = vmatprep.subr.bf16.mxu1 %v8834_v17 }
 0x2d2   :  { %p9103_p3 = por %p9102_p2, %p9101_p1 }
 0x2d3   :  { %5714 = vmatpush1.bf16.msra.mxu0 %v8829_v48 }
 0x2d4   :  { %5755 = vmatpush1.bf16.msra.mxu1 %v8832_v54  ;;  %5715 = vmatprep.subr.bf16.mxu0 %v8837_v23  ;;  %v8907_v54 = vld [vmem:[%s12116_s2 + $0xa0] ss:$16 sps:$4 sm:$0xff]   ;;  %p9104_p4 = pnand %p9103_p3, %p9097_p0 }
 0x2d5   :  { %5756 = vmatprep.subr.bf16.mxu1 %v8840_v32 }
 0x2d7   :  { %5716 = vmatpush1.bf16.msra.mxu0 %v8835_v40  ;;  %v8912_v40 = vld [vmem:[%s12116_s2 + $0x84] ss:$16 sps:$4 sm:$0xff]  }
 0x2d8   :  { %5757 = vmatpush1.bf16.msra.mxu1 %v8838_v38  ;;  %5717 = vmatprep.subr.bf16.mxu0 %v8843_v45  ;;  %v8999_v38 = vld [vmem:[%s12116_s2 + $0x2e4] ss:$16 sps:$4 sm:$0xff]  }
 0x2d9   :  { %5758 = vmatprep.subr.bf16.mxu1 %v8846_v47  ;;  %v9002_v45 = vld [vmem:[%s12116_s2 + $0x2c4] ss:$16 sps:$4 sm:$0xff]   ;;  %v8910_v47 = vld [vmem:[%s12116_s2 + $0x80] ss:$16 sps:$4 sm:$0xff]  }
 0x2db   :  { %5718 = vmatpush1.bf16.msra.mxu0 %v8841_v4  ;;  %v9000_v4 = vld [vmem:[%s12116_s2 + $0x2c0] ss:$16 sps:$4 sm:$0xff]  }
 0x2dc   :  { %5759 = vmatpush1.bf16.msra.mxu1 %v8844_v53  ;;  %5719 = vmatprep.subr.bf16.mxu0 %v8849_v59  ;;  %v8915_v53 = vld [vmem:[%s12116_s2 + $0x64] ss:$16 sps:$4 sm:$0xff]  }
 0x2dd   :  { %5760 = vmatprep.subr.bf16.mxu1 %v8852_v60  ;;  %v9005_v59 = vld [vmem:[%s12116_s2 + $0x2a4] ss:$16 sps:$4 sm:$0xff]   ;;  %v8913_v60 = vld [vmem:[%s12116_s2 + $0x60] ss:$16 sps:$4 sm:$0xff]  }
 0x2df   :  { %5720 = vmatpush1.bf16.msra.mxu0 %v8847_v0  ;;  %v9003_v0 = vld [vmem:[%s12116_s2 + $0x2a0] ss:$16 sps:$4 sm:$0xff]  }
 0x2e0   :  { %5761 = vmatpush1.bf16.msra.mxu1 %v8850_v50  ;;  %5721 = vmatprep.subr.bf16.mxu0 %v8855_v51  ;;  %v8918_v50 = vld [vmem:[%s12116_s2 + $0x44] ss:$16 sps:$4 sm:$0xff]  }
 0x2e1   :  { %5762 = vmatprep.subr.bf16.mxu1 %v8858_v52  ;;  %v9008_v51 = vld [vmem:[%s12116_s2 + $0x284] ss:$16 sps:$4 sm:$0xff]   ;;  %v8916_v52 = vld [vmem:[%s12116_s2 + $0x40] ss:$16 sps:$4 sm:$0xff]  }
 0x2e3   :  { %5722 = vmatpush2.bf16.msra.mxu0 %v8853_v35  ;;  %v9006_v35 = vld [vmem:[%s12116_s2 + $0x280] ss:$16 sps:$4 sm:$0xff]  }
 0x2e4   :  { %5763 = vmatpush2.bf16.msra.mxu1 %v8856_v55  ;;  %5723 = vmatprep.subr.bf16.mxu0 %v8861_v63  ;;  %v8921_v55 = vld [vmem:[%s12116_s2 + $0x24] ss:$16 sps:$4 sm:$0xff]  }
 0x2e5   :  { %5764 = vmatprep.subr.bf16.mxu1 %v8864_v58  ;;  %v9011_v63 = vld [vmem:[%s12116_s2 + $0x264] ss:$16 sps:$4 sm:$0xff]   ;;  %v8919_v58 = vld [vmem:[%s12116_s2 + $0x20] ss:$16 sps:$4 sm:$0xff]  }
 0x2e7   :  { %5724 = vmatpush2.bf16.msra.mxu0 %v8859_v61  ;;  %v9009_v61 = vld [vmem:[%s12116_s2 + $0x260] ss:$16 sps:$4 sm:$0xff]  }
 0x2e8   :  { %5765 = vmatpush2.bf16.msra.mxu1 %v8862_v62  ;;  %5725 = vmatprep.subr.bf16.mxu0 %v8867_v12  ;;  %v8924_v62 = vld [vmem:[%s12116_s2 + $0x4] ss:$16 sps:$4 sm:$0xff]  }
 0x2e9   :  { %5766 = vmatprep.subr.bf16.mxu1 %v8870_v39  ;;  %v9014_v12 = vld [vmem:[%s12116_s2 + $0x244] ss:$16 sps:$4 sm:$0xff]   ;;  %v8922_v39 = vld [vmem:[%s12116_s2] ss:$16 sps:$4 sm:$0xff]  }
 0x2eb   :  { %5726 = vmatpush2.bf16.msra.mxu0 %v8865_v26  ;;  %v9012_v26 = vld [vmem:[%s12116_s2 + $0x240] ss:$16 sps:$4 sm:$0xff]  }
 0x2ec   :  { %5767 = vmatpush2.bf16.msra.mxu1 %v8868_v6  ;;  %5727 = vmatprep.subr.bf16.mxu0 %v8873_v2  ;;  %v8927_v6 = vld [vmem:[%s12116_s2 + $0x1e4] ss:$16 sps:$4 sm:$0xff]  }
 0x2ed   :  { %5768 = vmatprep.subr.bf16.mxu1 %v8876_v7  ;;  %v9017_v2 = vld [vmem:[%s12116_s2 + $0x224] ss:$16 sps:$4 sm:$0xff]   ;;  %v8925_v7 = vld [vmem:[%s12116_s2 + $0x1e0] ss:$16 sps:$4 sm:$0xff]  }
 0x2ef   :  { %5728 = vmatpush2.bf16.msra.mxu0 %v8871_v8  ;;  %v9015_v8 = vld [vmem:[%s12116_s2 + $0x220] ss:$16 sps:$4 sm:$0xff]  }
 0x2f0   :  { %5769 = vmatpush2.bf16.msra.mxu1 %v8874_v49  ;;  %5729 = vmatprep.subr.bf16.mxu0 %v8879_v19  ;;  %v8930_v49 = vld [vmem:[%s12116_s2 + $0x1c4] ss:$16 sps:$4 sm:$0xff]  }
 0x2f1   :  { %5770 = vmatprep.subr.bf16.mxu1 %v8882_v25  ;;  %v9020_v19 = vld [vmem:[%s12116_s2 + $0x204] ss:$16 sps:$4 sm:$0xff]   ;;  %v8928_v25 = vld [vmem:[%s12116_s2 + $0x1c0] ss:$16 sps:$4 sm:$0xff]  }
 0x2f3   :  { %5730 = vmatpush2.bf16.msra.mxu0 %v8877_v57  ;;  %v9018_v57 = vld [vmem:[%s12116_s2 + $0x200] ss:$16 sps:$4 sm:$0xff]  }
 0x2f4   :  { %5771 = vmatpush2.bf16.msra.mxu1 %v8880_v9  ;;  %5731 = vmatprep.subr.bf16.mxu0 %v8885_v34  ;;  %v8933_v9 = vld [vmem:[%s12116_s2 + $0x1a4] ss:$16 sps:$4 sm:$0xff]  }
 0x2f5   :  { %5772 = vmatprep.subr.bf16.mxu1 %v8888_v41  ;;  %v9023_v34 = vld [vmem:[%s12116_s2 + $0x3e4] ss:$16 sps:$4 sm:$0xff]   ;;  %v8931_v41 = vld [vmem:[%s12116_s2 + $0x1a0] ss:$16 sps:$4 sm:$0xff]  }
 0x2f7   :  { %5732 = vmatpush2.bf16.msra.mxu0 %v8883_v42  ;;  %v9021_v42 = vld [vmem:[%s12116_s2 + $0x3e0] ss:$16 sps:$4 sm:$0xff]  }
 0x2f8   :  { %5773 = vmatpush2.bf16.msra.mxu1 %v8886_v15  ;;  %5733 = vmatprep.subr.bf16.mxu0 %v8891_v16  ;;  %v8936_v15 = vld [vmem:[%s12116_s2 + $0x184] ss:$16 sps:$4 sm:$0xff]  }
 0x2f9   :  { %5774 = vmatprep.subr.bf16.mxu1 %v8894_v20  ;;  %v9026_v16 = vld [vmem:[%s12116_s2 + $0x3c4] ss:$16 sps:$4 sm:$0xff]   ;;  %v8934_v20 = vld [vmem:[%s12116_s2 + $0x180] ss:$16 sps:$4 sm:$0xff]  }
 0x2fb   :  { %5734 = vmatpush2.bf16.msra.mxu0 %v8889_v21  ;;  %v9024_v21 = vld [vmem:[%s12116_s2 + $0x3c0] ss:$16 sps:$4 sm:$0xff]  }
 0x2fc   :  { %5775 = vmatpush2.bf16.msra.mxu1 %v8892_v24  ;;  %5735 = vmatprep.subr.bf16.mxu0 %v8897_v3  ;;  %v8939_v24 = vld [vmem:[%s12116_s2 + $0x164] ss:$16 sps:$4 sm:$0xff]  }
 0x2fd   :  { %5776 = vmatprep.subr.bf16.mxu1 %v8900_v14  ;;  %v9029_v3 = vld [vmem:[%s12116_s2 + $0x3a4] ss:$16 sps:$4 sm:$0xff]   ;;  %v8937_v14 = vld [vmem:[%s12116_s2 + $0x160] ss:$16 sps:$4 sm:$0xff]  }
 0x2ff   :  { %5736 = vmatpush2.bf16.msra.mxu0 %v8895_v27  ;;  %v9027_v27 = vld [vmem:[%s12116_s2 + $0x3a0] ss:$16 sps:$4 sm:$0xff]  }
 0x300   :  { %5777 = vmatpush2.bf16.msra.mxu1 %v8898_v28  ;;  %6559 = vmatprep.subr.bf16.mxu0 %v8903_v13  ;;  %v8942_v28 = vld [vmem:[%s12116_s2 + $0x144] ss:$16 sps:$4 sm:$0xff]  }
 0x301   :  { %6600 = vmatprep.subr.bf16.mxu1 %v8999_v38  ;;  %v9032_v13 = vld [vmem:[%s12116_s2 + $0x384] ss:$16 sps:$4 sm:$0xff]   ;;  %v9039_v38 = vld [vmem:[%s12116_s2 + $0x320] ss:$16 sps:$4 sm:$0xff]  }
 0x302   :  { %v5493_v1 = vpop.f32.mrf.mxu0  ;;  %5738 = vmatmul.mubr.bf16.vlgmr.msra.gmra.mxu0 %v10457_v5 }
 0x303   :  { %v5534_v11 = vpop.f32.mrf.mxu1  ;;  %5779 = vmatmul.mubr.bf16.vlgmr.msra.gmra.mxu1 %v10479_v10  ;;  %v5494_v22 = vadd.f32 %v5493_v1, %v11510_v56  ;;  %6560 = vmatpush1.bf16.msra.mxu0 %v8901_v37  ;;  %v8940_v37 = vld [vmem:[%s12116_s2 + $0x140] ss:$16 sps:$4 sm:$0xff]   ;;  %v8945_v1 = vld [vmem:[%s12116_s2 + $0x124] ss:$16 sps:$4 sm:$0xff]  }
 0x304   :  { %6591 = vmatprep.mubr.bf16.mxu0 %v11690_v33  ;;  %v5495_v46 = vpop.f32.mrf.mxu0  ;;  %6561 = vmatprep.subr.bf16.mxu0 %v8906_v30  ;;  %v9030_v30 = vld [vmem:[%s12116_s2 + $0x380] ss:$16 sps:$4 sm:$0xff]  }
 0x305   :  { %v5536_v36 = vpop.f32.mrf.mxu1  ;;  %v11702_v17 = vadd.f32 %v5534_v11, %v5494_v22  ;;  %v5496_v5 = vadd.f32 %v5495_v46, %v11515_v18  ;;  %v8997_v18 = vld [vmem:[%s12116_s2 + $0x2e0] ss:$16 sps:$4 sm:$0xff]   ;;  %v9035_v11 = vld [vmem:[%s12116_s2 + $0x364] ss:$16 sps:$4 sm:$0xff]  }
 0x306   :  { %v5497_v10 = vpop.f32.mrf.mxu0  ;;  %6601 = vmatpush1.bf16.msra.mxu1 %v8997_v18  ;;  %v8943_v22 = vld [vmem:[%s12116_s2 + $0x120] ss:$16 sps:$4 sm:$0xff]   ;;  %v8948_v46 = vld [vmem:[%s12116_s2 + $0x104] ss:$16 sps:$4 sm:$0xff]  }
 0x307   :  { %v5538_v56 = vpop.f32.mrf.mxu1  ;;  %v11705_v48 = vadd.f32 %v5536_v36, %v5496_v5  ;;  %6562 = vmatpush1.bf16.msra.mxu0 %v8904_v31  ;;  %6602 = vmatprep.subr.bf16.mxu1 %v9002_v45  ;;  %v9033_v31 = vld [vmem:[%s12116_s2 + $0x360] ss:$16 sps:$4 sm:$0xff]   ;;  %v9038_v36 = vld [vmem:[%s12116_s2 + $0x344] ss:$16 sps:$4 sm:$0xff]   ;;  %v8951_v10 = vld [vmem:[%s12116_s2 + $0xec] ss:$16 sps:$4 sm:$0xff]  }
 0x308   :  { %v5498_v23 = vpop.f32.mrf.mxu0  ;;  %6563 = vmatprep.subr.bf16.mxu0 %v8909_v44  ;;  %v8946_v44 = vld [vmem:[%s12116_s2 + $0x100] ss:$16 sps:$4 sm:$0xff]   ;;  %v8949_v56 = vld [vmem:[%s12116_s2 + $0xe8] ss:$16 sps:$4 sm:$0xff]  }
 0x309   :  { %v5539_v32 = vpop.f32.mrf.mxu1  ;;  %v9036_v5 = vld [vmem:[%s12116_s2 + $0x340] ss:$16 sps:$4 sm:$0xff]   ;;  %v8954_v23 = vld [vmem:[%s12116_s2 + $0xcc] ss:$16 sps:$4 sm:$0xff]   ;;  %v8952_v45 = vld [vmem:[%s12116_s2 + $0xc8] ss:$16 sps:$4 sm:$0xff]  }
 0x30a   :  { %6603 = vmatpush1.bf16.msra.mxu1 %v9000_v4  ;;  %v9041_v32 = vld [vmem:[%s12116_s2 + $0x324] ss:$16 sps:$4 sm:$0xff]  }
 0x30b   :  { %6564 = vmatpush1.bf16.msra.mxu0 %v8907_v54  ;;  %6604 = vmatprep.subr.bf16.mxu1 %v9005_v59  ;;  %v11880_v54 = vpack.c.bf16 %v11108_v29, %v11108_v29 }
 0x30c   :  { %6565 = vmatprep.subr.bf16.mxu0 %v8912_v40 }
 0x30e   :  { %6605 = vmatpush1.bf16.msra.mxu1 %v9003_v0 }
 0x30f   :  { %6566 = vmatpush1.bf16.msra.mxu0 %v8910_v47  ;;  %6606 = vmatprep.subr.bf16.mxu1 %v9008_v51 }
 0x310   :  { %6567 = vmatprep.subr.bf16.mxu0 %v8915_v53  ;;  %v8957_v53 = vld [vmem:[%s12116_s2 + $0xac] ss:$16 sps:$4 sm:$0xff]  }
 0x312   :  { %6607 = vmatpush1.bf16.msra.mxu1 %v9006_v35 }
 0x313   :  { %6568 = vmatpush1.bf16.msra.mxu0 %v8913_v60  ;;  %6608 = vmatprep.subr.bf16.mxu1 %v9011_v63  ;;  %v9047_v63 = vld [vmem:[%s12116_s2 + $0x2ec] ss:$16 sps:$4 sm:$0xff]  }
 0x314   :  { %6569 = vmatprep.subr.bf16.mxu0 %v8918_v50  ;;  %v9042_v50 = vld [vmem:[%s12116_s2 + $0x300] ss:$16 sps:$4 sm:$0xff]  }
 0x316   :  { %6609 = vmatpush1.bf16.msra.mxu1 %v9009_v61  ;;  %v8963_v61 = vld [vmem:[%s12116_s2 + $0x6c] ss:$16 sps:$4 sm:$0xff]  }
 0x317   :  { %6570 = vmatpush1.bf16.msra.mxu0 %v8916_v52  ;;  %6610 = vmatprep.subr.bf16.mxu1 %v9014_v12  ;;  %v8955_v52 = vld [vmem:[%s12116_s2 + $0xa8] ss:$16 sps:$4 sm:$0xff]   ;;  %v8966_v12 = vld [vmem:[%s12116_s2 + $0x4c] ss:$16 sps:$4 sm:$0xff]  }
 0x318   :  { %6571 = vmatprep.subr.bf16.mxu0 %v8921_v55  ;;  %v8960_v55 = vld [vmem:[%s12116_s2 + $0x8c] ss:$16 sps:$4 sm:$0xff]  }
 0x31a   :  { %6611 = vmatpush1.bf16.msra.mxu1 %v9012_v26  ;;  %v8969_v26 = vld [vmem:[%s12116_s2 + $0x2c] ss:$16 sps:$4 sm:$0xff]  }
 0x31b   :  { %6572 = vmatpush1.bf16.msra.mxu0 %v8919_v58  ;;  %6612 = vmatprep.subr.bf16.mxu1 %v9017_v2  ;;  %v8958_v58 = vld [vmem:[%s12116_s2 + $0x88] ss:$16 sps:$4 sm:$0xff]   ;;  %v8972_v2 = vld [vmem:[%s12116_s2 + $0xc] ss:$16 sps:$4 sm:$0xff]  }
 0x31c   :  { %6573 = vmatprep.subr.bf16.mxu0 %v8924_v62  ;;  %v8961_v62 = vld [vmem:[%s12116_s2 + $0x68] ss:$16 sps:$4 sm:$0xff]  }
 0x31e   :  { %6613 = vmatpush1.bf16.msra.mxu1 %v9015_v8  ;;  %v8975_v8 = vld [vmem:[%s12116_s2 + $0x1ec] ss:$16 sps:$4 sm:$0xff]  }
 0x31f   :  { %6574 = vmatpush1.bf16.msra.mxu0 %v8922_v39  ;;  %6614 = vmatprep.subr.bf16.mxu1 %v9020_v19  ;;  %v8964_v39 = vld [vmem:[%s12116_s2 + $0x48] ss:$16 sps:$4 sm:$0xff]   ;;  %v8978_v19 = vld [vmem:[%s12116_s2 + $0x1cc] ss:$16 sps:$4 sm:$0xff]  }
 0x320   :  { %6575 = vmatprep.subr.bf16.mxu0 %v8927_v6  ;;  %v8967_v6 = vld [vmem:[%s12116_s2 + $0x28] ss:$16 sps:$4 sm:$0xff]  }
 0x322   :  { %6615 = vmatpush1.bf16.msra.mxu1 %v9018_v57  ;;  %v8981_v57 = vld [vmem:[%s12116_s2 + $0x1ac] ss:$16 sps:$4 sm:$0xff]  }
 0x323   :  { %6576 = vmatpush2.bf16.msra.mxu0 %v8925_v7  ;;  %6616 = vmatprep.subr.bf16.mxu1 %v9023_v34  ;;  %v8970_v7 = vld [vmem:[%s12116_s2 + $0x8] ss:$16 sps:$4 sm:$0xff]   ;;  %v8984_v34 = vld [vmem:[%s12116_s2 + $0x18c] ss:$16 sps:$4 sm:$0xff]  }
 0x324   :  { %6577 = vmatprep.subr.bf16.mxu0 %v8930_v49  ;;  %v8973_v49 = vld [vmem:[%s12116_s2 + $0x1e8] ss:$16 sps:$4 sm:$0xff]  }
 0x326   :  { %6617 = vmatpush2.bf16.msra.mxu1 %v9021_v42  ;;  %v8987_v42 = vld [vmem:[%s12116_s2 + $0x16c] ss:$16 sps:$4 sm:$0xff]  }
 0x327   :  { %6578 = vmatpush2.bf16.msra.mxu0 %v8928_v25  ;;  %6618 = vmatprep.subr.bf16.mxu1 %v9026_v16  ;;  %v8976_v25 = vld [vmem:[%s12116_s2 + $0x1c8] ss:$16 sps:$4 sm:$0xff]   ;;  %v8990_v16 = vld [vmem:[%s12116_s2 + $0x14c] ss:$16 sps:$4 sm:$0xff]  }
 0x328   :  { %6579 = vmatprep.subr.bf16.mxu0 %v8933_v9  ;;  %v8979_v9 = vld [vmem:[%s12116_s2 + $0x1a8] ss:$16 sps:$4 sm:$0xff]  }
 0x32a   :  { %6619 = vmatpush2.bf16.msra.mxu1 %v9024_v21  ;;  %v8993_v21 = vld [vmem:[%s12116_s2 + $0x12c] ss:$16 sps:$4 sm:$0xff]  }
 0x32b   :  { %6580 = vmatpush2.bf16.msra.mxu0 %v8931_v41  ;;  %6620 = vmatprep.subr.bf16.mxu1 %v9029_v3  ;;  %v8982_v41 = vld [vmem:[%s12116_s2 + $0x188] ss:$16 sps:$4 sm:$0xff]   ;;  %v8996_v3 = vld [vmem:[%s12116_s2 + $0x10c] ss:$16 sps:$4 sm:$0xff]  }
 0x32c   :  { %6581 = vmatprep.subr.bf16.mxu0 %v8936_v15  ;;  %v8985_v15 = vld [vmem:[%s12116_s2 + $0x168] ss:$16 sps:$4 sm:$0xff]  }
 0x32e   :  { %6621 = vmatpush2.bf16.msra.mxu1 %v9027_v27 }
 0x32f   :  { %6582 = vmatpush2.bf16.msra.mxu0 %v8934_v20  ;;  %6622 = vmatprep.subr.bf16.mxu1 %v9032_v13  ;;  %v8988_v20 = vld [vmem:[%s12116_s2 + $0x148] ss:$16 sps:$4 sm:$0xff]  }
 0x330   :  { %6583 = vmatprep.subr.bf16.mxu0 %v8939_v24  ;;  %v8991_v24 = vld [vmem:[%s12116_s2 + $0x128] ss:$16 sps:$4 sm:$0xff]  }
 0x332   :  { %6623 = vmatpush2.bf16.msra.mxu1 %v9030_v30 }
 0x333   :  { %6584 = vmatpush2.bf16.msra.mxu0 %v8937_v14  ;;  %6624 = vmatprep.subr.bf16.mxu1 %v9035_v11  ;;  %v8994_v14 = vld [vmem:[%s12116_s2 + $0x108] ss:$16 sps:$4 sm:$0xff]  }
 0x334   :  { %6585 = vmatprep.subr.bf16.mxu0 %v8942_v28 }
 0x336   :  { %6625 = vmatpush2.bf16.msra.mxu1 %v9033_v31 }
 0x337   :  { %6586 = vmatpush2.bf16.msra.mxu0 %v8940_v37  ;;  %6626 = vmatprep.subr.bf16.mxu1 %v9038_v36 }
 0x338   :  { %6587 = vmatprep.subr.bf16.mxu0 %v8945_v1 }
 0x33a   :  { %6627 = vmatpush2.bf16.msra.mxu1 %v9036_v5 }
 0x33b   :  { %6588 = vmatpush2.bf16.msra.mxu0 %v8943_v22  ;;  %6628 = vmatprep.subr.bf16.mxu1 %v9041_v32 }
 0x33c   :  { %6589 = vmatprep.subr.bf16.mxu0 %v8948_v46 }
 0x33e   :  { %6629 = vmatpush2.bf16.msra.mxu1 %v9039_v38 }
 0x33f   :  { %6590 = vmatpush2.bf16.msra.mxu0 %v8946_v44 }
 0x340   :  { %6641 = vmatprep.subr.bf16.mxu0 %v8951_v10 }
 0x342   :  { %v5575_v40 = vpop.f32.mrf.mxu0  ;;  %6592 = vmatmul.mubr.bf16.vlgmr.msra.gmra.mxu0 %v11880_v54 }
 0x343   :  { %v5616_v18 = vpop.f32.mrf.mxu1  ;;  %v5576_v29 = vadd.f32 %v5575_v40, %v11702_v17  ;;  %6642 = vmatpush1.bf16.msra.mxu0 %v8949_v56  ;;  %6673 = vmatprep.mubr.bf16.mxu0 %v11690_v33  ;;  %v9044_v33 = vld [vmem:[%s12116_s2 + $0x304] ss:$16 sps:$4 sm:$0xff]  }
 0x344   :  { %v5577_v47 = vpop.f32.mrf.mxu0  ;;  %6643 = vmatprep.subr.bf16.mxu0 %v8954_v23  ;;  %6630 = vmatprep.subr.bf16.mxu1 %v9044_v33  ;;  %v9048_v33 = vld [vmem:[%s12116_s2 + $0x2c8] ss:$16 sps:$4 sm:$0xff]  }
 0x345   :  { %v5618_v4 = vpop.f32.mrf.mxu1  ;;  %v11900_v59 = vadd.f32 %v5616_v18, %v5576_v29  ;;  %v5578_v60 = vadd.f32 %v5577_v47, %v11705_v48  ;;  %6631 = vmatpush2.bf16.msra.mxu1 %v9042_v50  ;;  %v9056_v50 = vld [vmem:[%s12116_s2 + $0x28c] ss:$16 sps:$4 sm:$0xff]  }
 0x346   :  { %v5579_v17 = vpop.f32.mrf.mxu0  ;;  %6682 = vmatprep.subr.bf16.mxu1 %v9047_v63  ;;  %v9065_v63 = vld [vmem:[%s12116_s2 + $0x22c] ss:$16 sps:$4 sm:$0xff]  }
 0x347   :  { %v5620_v0 = vpop.f32.mrf.mxu1  ;;  %v11909_v51 = vadd.f32 %v5618_v4, %v5578_v60  ;;  %6644 = vmatpush1.bf16.msra.mxu0 %v8952_v45  ;;  %v9050_v60 = vld [vmem:[%s12116_s2 + $0x2cc] ss:$16 sps:$4 sm:$0xff]  }
 0x348   :  { %v5580_v48 = vpop.f32.mrf.mxu0  ;;  %6645 = vmatprep.subr.bf16.mxu0 %v8957_v53  ;;  %v9045_v53 = vld [vmem:[%s12116_s2 + $0x2e8] ss:$16 sps:$4 sm:$0xff]   ;;  %v9053_v17 = vld [vmem:[%s12116_s2 + $0x2ac] ss:$16 sps:$4 sm:$0xff]  }
 0x349   :  { %v5621_v35 = vpop.f32.mrf.mxu1  ;;  %v9051_v0 = vld [vmem:[%s12116_s2 + $0x2a8] ss:$16 sps:$4 sm:$0xff]  }
 0x34a   :  { %v9057_v48 = vld [vmem:[%s12116_s2 + $0x268] ss:$16 sps:$4 sm:$0xff]   ;;  %v9062_v35 = vld [vmem:[%s12116_s2 + $0x24c] ss:$16 sps:$4 sm:$0xff]  }
 0x34b   :  { %6646 = vmatpush1.bf16.msra.mxu0 %v8955_v52  ;;  %v9059_v52 = vld [vmem:[%s12116_s2 + $0x26c] ss:$16 sps:$4 sm:$0xff]  }
 0x34c   :  { %6647 = vmatprep.subr.bf16.mxu0 %v8960_v55  ;;  %v9060_v55 = vld [vmem:[%s12116_s2 + $0x248] ss:$16 sps:$4 sm:$0xff]  }
 0x34f   :  { %6648 = vmatpush1.bf16.msra.mxu0 %v8958_v58  ;;  %v9063_v58 = vld [vmem:[%s12116_s2 + $0x228] ss:$16 sps:$4 sm:$0xff]  }
 0x350   :  { %6649 = vmatprep.subr.bf16.mxu0 %v8963_v61  ;;  %v9068_v61 = vld [vmem:[%s12116_s2 + $0x20c] ss:$16 sps:$4 sm:$0xff]  }
 0x353   :  { %6650 = vmatpush1.bf16.msra.mxu0 %v8961_v62  ;;  %v9066_v62 = vld [vmem:[%s12116_s2 + $0x208] ss:$16 sps:$4 sm:$0xff]  }
 0x354   :  { %6651 = vmatprep.subr.bf16.mxu0 %v8966_v12  ;;  %v9071_v12 = vld [vmem:[%s12116_s2 + $0x3ec] ss:$16 sps:$4 sm:$0xff]  }
 0x357   :  { %6652 = vmatpush1.bf16.msra.mxu0 %v8964_v39  ;;  %v9069_v39 = vld [vmem:[%s12116_s2 + $0x3e8] ss:$16 sps:$4 sm:$0xff]  }
 0x358   :  { %6653 = vmatprep.subr.bf16.mxu0 %v8969_v26  ;;  %v9074_v26 = vld [vmem:[%s12116_s2 + $0x3cc] ss:$16 sps:$4 sm:$0xff]  }
 0x35b   :  { %6654 = vmatpush1.bf16.msra.mxu0 %v8967_v6  ;;  %v9072_v6 = vld [vmem:[%s12116_s2 + $0x3c8] ss:$16 sps:$4 sm:$0xff]  }
 0x35c   :  { %6655 = vmatprep.subr.bf16.mxu0 %v8972_v2  ;;  %v9077_v2 = vld [vmem:[%s12116_s2 + $0x3ac] ss:$16 sps:$4 sm:$0xff]  }
 0x35f   :  { %6656 = vmatpush1.bf16.msra.mxu0 %v8970_v7  ;;  %v9075_v7 = vld [vmem:[%s12116_s2 + $0x3a8] ss:$16 sps:$4 sm:$0xff]  }
 0x360   :  { %6657 = vmatprep.subr.bf16.mxu0 %v8975_v8  ;;  %v9080_v8 = vld [vmem:[%s12116_s2 + $0x38c] ss:$16 sps:$4 sm:$0xff]  }
 0x363   :  { %6658 = vmatpush2.bf16.msra.mxu0 %v8973_v49  ;;  %v9078_v49 = vld [vmem:[%s12116_s2 + $0x388] ss:$16 sps:$4 sm:$0xff]  }
 0x364   :  { %6659 = vmatprep.subr.bf16.mxu0 %v8978_v19  ;;  %v9083_v19 = vld [vmem:[%s12116_s2 + $0x36c] ss:$16 sps:$4 sm:$0xff]  }
 0x367   :  { %6660 = vmatpush2.bf16.msra.mxu0 %v8976_v25  ;;  %v9081_v25 = vld [vmem:[%s12116_s2 + $0x368] ss:$16 sps:$4 sm:$0xff]  }
 0x368   :  { %6661 = vmatprep.subr.bf16.mxu0 %v8981_v57  ;;  %v9086_v57 = vld [vmem:[%s12116_s2 + $0x34c] ss:$16 sps:$4 sm:$0xff]  }
 0x36b   :  { %6662 = vmatpush2.bf16.msra.mxu0 %v8979_v9  ;;  %v9084_v9 = vld [vmem:[%s12116_s2 + $0x348] ss:$16 sps:$4 sm:$0xff]  }
 0x36c   :  { %6663 = vmatprep.subr.bf16.mxu0 %v8984_v34  ;;  %v9089_v34 = vld [vmem:[%s12116_s2 + $0x32c] ss:$16 sps:$4 sm:$0xff]  }
 0x36f   :  { %6664 = vmatpush2.bf16.msra.mxu0 %v8982_v41  ;;  %v9087_v41 = vld [vmem:[%s12116_s2 + $0x328] ss:$16 sps:$4 sm:$0xff]  }
 0x370   :  { %6665 = vmatprep.subr.bf16.mxu0 %v8987_v42 }
 0x373   :  { %6666 = vmatpush2.bf16.msra.mxu0 %v8985_v15  ;;  %v9092_v15 = vld [vmem:[%s12116_s2 + $0x30c] ss:$16 sps:$4 sm:$0xff]  }
 0x374   :  { %6667 = vmatprep.subr.bf16.mxu0 %v8990_v16 }
 0x377   :  { %6668 = vmatpush2.bf16.msra.mxu0 %v8988_v20  ;;  %v9090_v20 = vld [vmem:[%s12116_s2 + $0x308] ss:$16 sps:$4 sm:$0xff]  }
 0x378   :  { %6669 = vmatprep.subr.bf16.mxu0 %v8993_v21 }
 0x37b   :  { %6670 = vmatpush2.bf16.msra.mxu0 %v8991_v24 }
 0x37c   :  { %6671 = vmatprep.subr.bf16.mxu0 %v8996_v3 }
 0x37f   :  { %6672 = vmatpush2.bf16.msra.mxu0 %v8994_v14 }
 0x382   :  { %v5657_v27 = vpop.f32.mrf.mxu0  ;;  %6674 = vmatmul.mubr.bf16.vlgmr.msra.gmra.mxu0 %v11880_v54 }
 0x383   :  { %v5698_v28 = vpop.f32.mrf.mxu1  ;;  %v5658_v13 = vadd.f32 %v5657_v27, %v11900_v59 }
 0x384   :  { %v5659_v37 = vpop.f32.mrf.mxu0 }
 0x385   :  { %v5700_v30 = vpop.f32.mrf.mxu1  ;;  %v5699_v1 = vadd.f32 %v5698_v28, %v5658_v13  ;;  %v5660_v36 = vadd.f32 %v5659_v37, %v11909_v51  ;;  %v9054_v51 = vld [vmem:[%s12116_s2 + $0x288] ss:$16 sps:$4 sm:$0xff]  }
 0x386   :  { %v5661_v11 = vpop.f32.mrf.mxu0 }
 0x387   :  { %v5702_v22 = vpop.f32.mrf.mxu1  ;;  %v5701_v10 = vadd.f32 %v5700_v30, %v5660_v36  ;;  %v9119_v11 = vmov 1983009808   ;;  %v6723_v36 = vld [vmem:[%s12117_s3] sm:$0xff] }
 0x388   :  { %v5662_v31 = vpop.f32.mrf.mxu0  ;;  %v6727_v22 = vunpack.c.l.s4 %v9119_v11 }
 0x389   :  { %v5703_v46 = vpop.f32.mrf.mxu1 }
 0x38a   :  { %v6728_v31 = vunpack.c.0.s8 %v6727_v22 }
 0x38c   :  { %v6731_v46 = vsub.s32 %v6728_v31, %v9263_v43 }
 0x3c2   :  { %v5739_v44 = vpop.f32.mrf.mxu0 }
 0x3c3   :  { %v5780_v5 = vpop.f32.mrf.mxu1  ;;  %v5740_v56 = vadd.f32 %v5739_v44, %v5699_v1  ;;  %v6773_v44 = vmul.f32 %v6723_v36, %v6723_v36 }
 0x3c4   :  { %v5741_v23 = vpop.f32.mrf.mxu0 }
 0x3c5   :  { %v5782_v32 = vpop.f32.mrf.mxu1  ;;  %v5742_v40 = vadd.f32 %v5741_v23, %v5701_v10  ;;  %v5781_v18 = vadd.f32 %v5780_v5, %v5740_v56  ;;  %v6732_v5 = vrot.slane %v6723_v36, %v6731_v46  ;;  %v6782_v10 = vrot.slane %v6773_v44, %v6731_v46 }
 0x3c6   :  { %v5743_v54 = vpop.f32.mrf.mxu0 }
 0x3c7   :  { %v5784_v38 = vpop.f32.mrf.mxu1  ;;  %v5783_v29 = vadd.f32 %v5782_v32, %v5742_v40  ;;  %v12001_v59 = vpack.c.bf16 %v5781_v18, %v5781_v18  ;;  %v6740_v23 = vcombine.high %v6732_v5, %v6732_v5  ;;  %v6725_v32 = vcombine.high %v6723_v36, %v6723_v36 }
 0x3c8   :  { %v5744_v45 = vpop.f32.mrf.mxu0  ;;  %v6775_v18 = vcombine.high %v6773_v44, %v6773_v44  ;;  %v6790_v54 = vcombine.high %v6782_v10, %v6782_v10 }
 0x3c9   :  { %v5785_v47 = vpop.f32.mrf.mxu1  ;;  %v5790_v4 = vpack.c.bf16 %v5783_v29, %v5783_v29  ;;  %v6739_v45 = vrot.slane %v6725_v32, %v6731_v46 }
 0x3cb   :  { %6632 = vmatprep.mubr.bf16.mxu1 %v5790_v4 }
 0x3cc   :  { %6633 = vmatmul.mubr.bf16.vlgmr.msra.gmra.mxu1 %v12001_v59 }
 0x3cd   :  { %6683 = vmatpush1.bf16.msra.mxu1 %v9045_v53  ;;  %6714 = vmatprep.mubr.bf16.mxu1 %v5790_v4  ;;  %v6789_v4 = vrot.slane %v6775_v18, %v6731_v46  ;;  %v6796_v53 = vsel %vm6750_vm0, %v6782_v10, 0.0 }
 0x3ce   :  { %6684 = vmatprep.subr.bf16.mxu1 %v9050_v60 }
 0x3d1   :  { %6685 = vmatpush1.bf16.msra.mxu1 %v9048_v33 }
 0x3d2   :  { %6686 = vmatprep.subr.bf16.mxu1 %v9053_v17 }
 0x3d5   :  { %6687 = vmatpush1.bf16.msra.mxu1 %v9051_v0 }
 0x3d6   :  { %6688 = vmatprep.subr.bf16.mxu1 %v9056_v50  ;;  %v6741_v50 = vcombine.high %v6739_v45, %v6739_v45 }
 0x3d9   :  { %6689 = vmatpush1.bf16.msra.mxu1 %v9054_v51 }
 0x3da   :  { %6690 = vmatprep.subr.bf16.mxu1 %v9059_v52 }
 0x3dd   :  { %6691 = vmatpush1.bf16.msra.mxu1 %v9057_v48  ;;  %v6791_v48 = vcombine.high %v6789_v4, %v6789_v4 }
 0x3de   :  { %6692 = vmatprep.subr.bf16.mxu1 %v9062_v35 }
 0x3e1   :  { %6693 = vmatpush1.bf16.msra.mxu1 %v9060_v55  ;;  %v6799_v55 = vsel %vm6750_vm0, %v6789_v4, 0.0 }
 0x3e2   :  { %6694 = vmatprep.subr.bf16.mxu1 %v9065_v63 }
 0x3e5   :  { %6695 = vmatpush1.bf16.msra.mxu1 %v9063_v58 }
 0x3e6   :  { %6696 = vmatprep.subr.bf16.mxu1 %v9068_v61 }
 0x3e9   :  { %6697 = vmatpush1.bf16.msra.mxu1 %v9066_v62 }
 0x3ea   :  { %6698 = vmatprep.subr.bf16.mxu1 %v9071_v12 }
 0x3ed   :  { %6699 = vmatpush2.bf16.msra.mxu1 %v9069_v39 }
 0x3ee   :  { %6700 = vmatprep.subr.bf16.mxu1 %v9074_v26 }
 0x3f1   :  { %6701 = vmatpush2.bf16.msra.mxu1 %v9072_v6 }
 0x3f2   :  { %6702 = vmatprep.subr.bf16.mxu1 %v9077_v2 }
 0x3f5   :  { %6703 = vmatpush2.bf16.msra.mxu1 %v9075_v7 }
 0x3f6   :  { %6704 = vmatprep.subr.bf16.mxu1 %v9080_v8 }
 0x3f9   :  { %6705 = vmatpush2.bf16.msra.mxu1 %v9078_v49 }
 0x3fa   :  { %6706 = vmatprep.subr.bf16.mxu1 %v9083_v19 }
 0x3fd   :  { %6707 = vmatpush2.bf16.msra.mxu1 %v9081_v25 }
 0x3fe   :  { %6708 = vmatprep.subr.bf16.mxu1 %v9086_v57 }
 0x401   :  { %6709 = vmatpush2.bf16.msra.mxu1 %v9084_v9 }
 0x402   :  { %v6593_v42 = vpop.f32.mrf.mxu0  ;;  %6710 = vmatprep.subr.bf16.mxu1 %v9089_v34 }
 0x404   :  { %v6595_v16 = vpop.f32.mrf.mxu0 }
 0x405   :  { %6711 = vmatpush2.bf16.msra.mxu1 %v9087_v41  ;;  %v6801_v41 = vsel %vm6750_vm0, %v6791_v48, 0.0 }
 0x406   :  { %v6597_v21 = vpop.f32.mrf.mxu0  ;;  %6712 = vmatprep.subr.bf16.mxu1 %v9092_v15 }
 0x408   :  { %v6598_v24 = vpop.f32.mrf.mxu0 }
 0x409   :  { %6713 = vmatpush2.bf16.msra.mxu1 %v9090_v20 }
 0x40c   :  { %6715 = vmatmul.mubr.bf16.vlgmr.msra.gmra.mxu1 %v12001_v59  ;;  %v6797_v59 = vsel %vm6750_vm0, %v6790_v54, 0.0 }
 0x40d   :  { %v6798_v35 = vadd.f32 %v6797_v59, %v6796_v53 }
 0x40f   :  { %v6800_v57 = vadd.f32 %v6799_v55, %v6798_v35 }
 0x442   :  { %v6675_v3 = vpop.f32.mrf.mxu0 }
 0x444   :  { %v6677_v14 = vpop.f32.mrf.mxu0 }
 0x446   :  { %v6679_v27 = vpop.f32.mrf.mxu0 }
 0x448   :  { %v6680_v28 = vpop.f32.mrf.mxu0 }
 0x48c   :  { %v6634_v13 = vpop.f32.mrf.mxu1 }
 0x48d   :  { %v6635_v40 = vadd.f32 %v6634_v13, %v6593_v42 }
 0x48e   :  { %v6636_v37 = vpop.f32.mrf.mxu1 }
 0x48f   :  { %v6637_v56 = vadd.f32 %v6636_v37, %v6595_v16  ;;  %v6746_v47 = vmul.f32 %v6732_v5, %v6635_v40  ;;  %v6760_v43 = vmul.f32 %v6635_v40, %v6635_v40  ;;  %v6802_v16 = vadd.f32 %v6801_v41, %v6800_v57 }
 0x490   :  { %v6638_v30 = vpop.f32.mrf.mxu1 }
 0x491   :  { %v6747_v38 = vmul.f32 %v6740_v23, %v6637_v56  ;;  %v6761_v29 = vmul.f32 %v6637_v56, %v6637_v56  ;;  %v6751_v51 = vsel %vm6750_vm0, %v6746_v47, 0.0  ;;  %v6764_v63 = vsel %vm6750_vm0, %v6760_v43, 0.0 }
 0x492   :  { %v6639_v1 = vpop.f32.mrf.mxu1 }
 0x493   :  { %v6752_v33 = vsel %vm6750_vm0, %v6747_v38, 0.0  ;;  %v6765_v17 = vsel %vm6750_vm0, %v6761_v29, 0.0 }
 0x494   :  { %v6766_v39 = vadd.f32 %v6765_v17, %v6764_v63  ;;  %v6753_v26 = vadd.f32 %v6752_v33, %v6751_v51 }
 0x4cc   :  { %v6716_v60 = vpop.f32.mrf.mxu1 }
 0x4cd   :  { %v6717_v0 = vadd.f32 %v6716_v60, %v6675_v3 }
 0x4ce   :  { %v6718_v52 = vpop.f32.mrf.mxu1 }
 0x4cf   :  { %v6748_v58 = vmul.f32 %v6739_v45, %v6717_v0  ;;  %v6762_v61 = vmul.f32 %v6717_v0, %v6717_v0  ;;  %v6719_v62 = vadd.f32 %v6718_v52, %v6677_v14 }
 0x4d0   :  { %v6720_v12 = vpop.f32.mrf.mxu1 }
 0x4d1   :  { %v6749_v6 = vmul.f32 %v6741_v50, %v6719_v62  ;;  %v6763_v2 = vmul.f32 %v6719_v62, %v6719_v62  ;;  %v6767_v7 = vsel %vm6750_vm0, %v6762_v61, 0.0  ;;  %v6754_v8 = vsel %vm6750_vm0, %v6748_v58, 0.0 }
 0x4d2   :  { %v6721_v49 = vpop.f32.mrf.mxu1  ;;  %v6768_v19 = vadd.f32 %v6767_v7, %v6766_v39  ;;  %v6755_v25 = vadd.f32 %v6754_v8, %v6753_v26 }
 0x4d3   :  { %v6769_v9 = vsel %vm6750_vm0, %v6763_v2, 0.0  ;;  %v6756_v34 = vsel %vm6750_vm0, %v6749_v6, 0.0 }
 0x4d4   :  { %v6770_v42 = vadd.f32 %v6769_v9, %v6768_v19  ;;  %v6757_v15 = vadd.f32 %v6756_v34, %v6755_v25 }
 0x4d6   :  { %6771 = vadd.xlane.f32.xlu0 %v6770_v42  ;;  %6758 = vadd.xlane.f32.xlu1 %v6757_v15 }
 0x4da   :  { %6803 = vadd.xlane.f32.xlu0 %v6802_v16 }
 0x55f   :  { %v6772_v20 = vpop.xlane.xlu0 %6771  ;;  %v6759_v14 = vpop.xlane.xlu1 %6758 }
 0x563   :  { %v6804_v21 = vpop.xlane.xlu0 %6803 }
 0x564   :  { %v6805_v24 = vmul.f32 %v6804_v21, %v6772_v20 }
 0x566   :  { %9094 = vrsqrt.f32 %v6805_v24 }
 0x573   :  { %v9095_v3 = vpop.eup %9094 }
 0x574   :  { %v6807_v27 = vmul.f32 %v9095_v3, %v6759_v14 }
 0x576   :  { %vm6808_vm1 = vcmp.ne.f32.partialorder %v6807_v27, %v6807_v27 }
 0x577   :  { %v6809_v28 = vsel %vm6808_vm1, 0.0, %v6807_v27 }
 0x578   :  { %v7740_v13 = vclamps-f32 %v6809_v28, 3.4028235e+38 }
 0x57a   :  { %v6813_v37 = vsel %vm6812_vm2, %v7740_v13, 0.0 }
 0x57b   :  { %6814 = vadd.xlane.f32.xlu1 %v6813_v37 }
 0x604   :  { %v6815_v30 = vpop.xlane.xlu1 %6814 }
 0x605   :  { %v6816_v1 = vrot.slane %v6815_v30, 4 }
 0x607   :  { %v6817_v11 = vadd.f32 %v6816_v1, %v6815_v30 }
 0x609   :  { %v6818_v22 = vrot.slane %v6817_v11, 2 }
 0x60b   :  { %v6819_v31 = vadd.f32 %v6818_v22, %v6817_v11 }
 0x60d   :  { %v6820_v46 = vrot.slane %v6819_v31, 1 }
 0x60f   :  { %v6821_v36 = vadd.f32 %v6820_v46, %v6819_v31 }
 0x611   :  { %7741 = vpush %v6821_v36 }
 0x642   :  { %s7742_s3 = spop %7741 }
 0x643   :  { %s6825_s15 = smul.f32 0.5, %s7742_s3 }
 0x645   :  { %s6826_s17 = ssub.f32 1.0, %s6825_s15 }
 0x647   :  { %v6827_v44 = vstv %s6826_s17 }
 0x648   :  { %6829 = vst.msk [vmem:[#allocation2] sm:$0x1] %vm6828_vm3, %v6827_v44 }
 0x649   :  { %9107 = shalt.err (!%p9104_p4)
}
 0x64a   :  { %6839 = dma.vmem_to_hbm [thread:$0]  %s6837_s16, 16, %s12118_s4, [#allocation3]  }
 0x64b   :  { %9116 = dma.done.wait [#allocation3], 16  }
 0x64c   :  { %9117 = vsyncadd [#allocation3], 4294967280 }
 0x64d   :  { %6843 = vsyncpa [#allocation3], 1 }

</bundles_post_ra>
